<compile_context>
chip_gen: v7x
topology: tpu7x:2x2x1
jax: 0.10.0
libtpu: 0.0.40
codegen_flags: <defaults>
</compile_context>

<pallas_src>
from functools import partial

import jax
import jax.numpy as jnp
from jax import lax
from jax.experimental import pallas as pl
from jax.experimental.pallas import tpu as pltpu

L = 144          # sequence length after view(-1, 1, 144)
EPS = 1e-5       # BatchNorm eps


def mymodel_kernel(x_ref, w1_ref, w2_ref, w3_ref, fcv_ref,
                   c1_ref, c2w_ref, c2p_ref, mask_ref, scal_ref,
                   out_ref, flat_ref):
    f32 = jnp.float32
    TB = x_ref.shape[0]
    BL = flat_ref.shape[1]              # TB * 144

    # ---------- fc_1 + relu (dropout = identity in eval) ----------
    h = jnp.dot(x_ref[...], w1_ref[...], preferred_element_type=f32) + fcv_ref[0:1, :]
    h = jnp.maximum(h, 0.0)                                   # (TB, 512)

    # ---------- fc_2 + relu ----------
    h = jnp.dot(h, w2_ref[...], preferred_element_type=f32) + fcv_ref[1:2, 0:L]
    h = jnp.maximum(h, 0.0)                                   # (TB, 144)

    # ---------- relayout (TB, 144) -> (1, TB*144) via VMEM scratch ----------
    for b in range(TB):
        flat_ref[:, pl.ds(b * L, L)] = h[b:b + 1, :]
    hflat = flat_ref[...]                                     # (1, BL)

    sc = scal_ref[...]                                        # (1, 8)
    bn1_s, bn1_t = sc[:, 0:1], sc[:, 1:2]
    c3_b, c3_s, c3_t = sc[:, 2:3], sc[:, 3:4], sc[:, 4:5]
    fc4_b = sc[:, 5:6]

    # ---------- bn1 (single channel -> scalar affine) ----------
    a0 = hflat * bn1_s + bn1_t                                # (1, BL)

    # per-144-segment shift-validity masks (0/1 floats), shared by all conv layers
    m_l = mask_ref[0:1, :]          # valid lanes for x[l-1] (tap k=0)
    m_r = mask_ref[1:2, :]          # valid lanes for x[l+1] (tap k=2)

    def taps(a):
        left = pltpu.roll(a, 1, axis=1) * m_l        # x[l-1], zero at segment starts
        right = pltpu.roll(a, BL - 1, axis=1) * m_r  # x[l+1], zero at segment ends
        return left, right

    # ---------- conv1 (1->16) + relu + bn1_conv1 : VPU outer products ----------
    l0, r0 = taps(a0)
    c1 = c1_ref[...]                                          # (16, 8)
    z1 = c1[:, 0:1] * l0 + c1[:, 1:2] * a0 + c1[:, 2:3] * r0  # (16, BL)
    a1 = jnp.maximum(z1 + c1[:, 3:4], 0.0)
    a1 = a1 * c1[:, 4:5] + c1[:, 5:6]

    # ---------- conv2 (16->32) + relu + bn1_conv2 : 3 accumulated MXU matmuls ----------
    l1, r1 = taps(a1)
    z2 = jnp.dot(c2w_ref[pl.ds(0, 32), :], l1, preferred_element_type=f32)
    z2 = z2 + jnp.dot(c2w_ref[pl.ds(32, 32), :], a1, preferred_element_type=f32)
    z2 = z2 + jnp.dot(c2w_ref[pl.ds(64, 32), :], r1, preferred_element_type=f32)
    c2p = c2p_ref[...]                                        # (32, 8)
    a2 = jnp.maximum(z2 + c2p[:, 0:1], 0.0)
    a2 = a2 * c2p[:, 1:2] + c2p[:, 2:3]                       # (32, BL)

    # ---------- conv3 (32->1) + relu + bn1_conv3 : VPU mul + sublane reduce ----------
    l2, r2 = taps(a2)
    t = c2p[:, 3:4] * l2 + c2p[:, 4:5] * a2 + c2p[:, 5:6] * r2
    z3 = jnp.sum(t, axis=0, keepdims=True)                    # (1, BL)
    a3 = jnp.maximum(z3 + c3_b, 0.0)
    a3 = a3 * c3_s + c3_t                                     # (1, BL)

    # ---------- relayout back (1, TB*144) -> (TB, 144) ----------
    flat_ref[...] = a3
    h3 = jnp.concatenate([flat_ref[:, pl.ds(b * L, L)] for b in range(TB)], axis=0)

    # ---------- fc3 + relu ----------
    z = jnp.dot(h3, w3_ref[...], preferred_element_type=f32) + fcv_ref[2:3, 0:L]
    z = jnp.maximum(z, 0.0)                                   # (TB, 144)

    # ---------- fc4 (VPU mul + lane reduce) + sigmoid ----------
    z4 = jnp.sum(z * fcv_ref[3:4, 0:L], axis=-1, keepdims=True) + fc4_b
    out_ref[...] = 1.0 / (1.0 + jnp.exp(-z4))                 # (TB, 1)


def _bn_fold(g, b, m, v):
    s = g / jnp.sqrt(v + EPS)
    return s, b - m * s


def _pick_block(B):
    for tb in (64, 32, 16, 8):
        if B % tb == 0:
            return tb
    return B


def prepare_params(p, B):
    """One-time host-side weight prep.  Cache the result and reuse across calls."""
    f32 = jnp.float32
    tb = _pick_block(B)
    bl = tb * L

    bn1_s, bn1_t = _bn_fold(p['bn1_g'], p['bn1_b'], p['bn1_m'], p['bn1_v'])     # (1,)
    c1_s, c1_t = _bn_fold(p['bnc1_g'], p['bnc1_b'], p['bnc1_m'], p['bnc1_v'])   # (16,)
    c2_s, c2_t = _bn_fold(p['bnc2_g'], p['bnc2_b'], p['bnc2_m'], p['bnc2_v'])   # (32,)
    c3_s, c3_t = _bn_fold(p['bnc3_g'], p['bnc3_b'], p['bnc3_m'], p['bnc3_v'])   # (1,)

    # FC weights, zero-padded to tile-friendly shapes (bit-identical results)
    w1p = jnp.zeros((16, 512), f32).at[:11, :460].set(p['fc1_w'].T)
    w2p = jnp.zeros((512, L), f32).at[:460, :].set(p['fc2_w'].T)
    w3 = p['fc3_w'].T.astype(f32)                              # (144, 144)

    # FC row-vector params: biases + fc4 weight row (lane-dense)
    fcv = jnp.zeros((4, 512), f32)
    fcv = fcv.at[0, :460].set(p['fc1_b'])
    fcv = fcv.at[1, :L].set(p['fc2_b'])
    fcv = fcv.at[2, :L].set(p['fc3_b'])
    fcv = fcv.at[3, :L].set(p['fc4_w'][0])

    # conv1 pack: cols [w_k0, w_k1, w_k2, bias, bn_scale, bn_offset, 0, 0]
    c1pack = jnp.zeros((16, 8), f32)
    c1pack = c1pack.at[:, 0].set(p['c1_w'][:, 0, 0])
    c1pack = c1pack.at[:, 1].set(p['c1_w'][:, 0, 1])
    c1pack = c1pack.at[:, 2].set(p['c1_w'][:, 0, 2])
    c1pack = c1pack.at[:, 3].set(p['c1_b'])
    c1pack = c1pack.at[:, 4].set(c1_s)
    c1pack = c1pack.at[:, 5].set(c1_t)

    # conv2 per-tap weights stacked along sublanes: rows [0:32]=tap0, [32:64]=tap1, [64:96]=tap2
    c2w = jnp.concatenate([p['c2_w'][:, :, 0], p['c2_w'][:, :, 1],
                           p['c2_w'][:, :, 2]], axis=0).astype(f32)   # (96, 16)

    # conv2 per-channel params + conv3 per-tap weights
    c2pack = jnp.zeros((32, 8), f32)
    c2pack = c2pack.at[:, 0].set(p['c2_b'])
    c2pack = c2pack.at[:, 1].set(c2_s)
    c2pack = c2pack.at[:, 2].set(c2_t)
    c2pack = c2pack.at[:, 3].set(p['c3_w'][0, :, 0])
    c2pack = c2pack.at[:, 4].set(p['c3_w'][0, :, 1])
    c2pack = c2pack.at[:, 5].set(p['c3_w'][0, :, 2])

    # per-144-segment shift-validity masks as 0/1 floats
    pos = jnp.arange(bl, dtype=jnp.int32) % L
    mask = jnp.stack([(pos >= 1).astype(f32), (pos <= L - 2).astype(f32)], axis=0)  # (2, bl)

    # true scalars
    scal = jnp.zeros((1, 8), f32)
    scal = scal.at[0, 0].set(bn1_s[0]).at[0, 1].set(bn1_t[0])
    scal = scal.at[0, 2].set(p['c3_b'][0]).at[0, 3].set(c3_s[0]).at[0, 4].set(c3_t[0])
    scal = scal.at[0, 5].set(p['fc4_b'][0])

    args = (w1p, w2p, w3, fcv, c1pack, c2w, c2pack, mask, scal)
    return {"tb": tb, "args": args}


@partial(jax.jit, static_argnames=("tb",))
def _forward_impl(x, args, *, tb):
    f32 = jnp.float32
    B = x.shape[0]
    assert B % tb == 0, f"batch {B} must be divisible by block {tb}"
    nblk = B // tb
    bl = tb * L
    (w1p, w2p, w3, fcv, c1pack, c2w, c2pack, mask, scal) = args

    x_pad = jnp.zeros((B, 16), f32).at[:, :11].set(x.astype(f32))

    in_specs = [
        pl.BlockSpec((tb, 16), lambda i: (i, 0)),
        pl.BlockSpec(w1p.shape, lambda i: (0, 0)),
        pl.BlockSpec(w2p.shape, lambda i: (0, 0)),
        pl.BlockSpec(w3.shape, lambda i: (0, 0)),
        pl.BlockSpec(fcv.shape, lambda i: (0, 0)),
        pl.BlockSpec(c1pack.shape, lambda i: (0, 0)),
        pl.BlockSpec(c2w.shape, lambda i: (0, 0)),
        pl.BlockSpec(c2pack.shape, lambda i: (0, 0)),
        pl.BlockSpec(mask.shape, lambda i: (0, 0)),
        pl.BlockSpec(scal.shape, lambda i: (0, 0)),
    ]
    out_specs = pl.BlockSpec((tb, 1), lambda i: (i, 0))

    return pl.pallas_call(
        mymodel_kernel,
        out_shape=jax.ShapeDtypeStruct((B, 1), f32),
        grid_spec=pltpu.PrefetchScalarGridSpec(
            num_scalar_prefetch=0,
            grid=(nblk,),
            in_specs=in_specs,
            out_specs=out_specs,
            scratch_shapes=[pltpu.VMEM((1, bl), f32)]),
        compiler_params=pltpu.CompilerParams(
            dimension_semantics=("parallel",)),
    )(x_pad, w1p, w2p, w3, fcv, c1pack, c2w, c2pack, mask, scal)


def mymodel_forward(x, prepped):
    return _forward_impl(x, prepped["args"], tb=prepped["tb"])


# ------------------------- reference (plain JAX) -------------------------
def ref_forward(x, p):
    def bn(v, g, b, m, var):
        return ((v - m[None, :, None]) / jnp.sqrt(var[None, :, None] + EPS)
                * g[None, :, None] + b[None, :, None])

    def conv(v, w, b):
        y = lax.conv_general_dilated(v, w, (1,), [(1, 1)],
                                     dimension_numbers=('NCH', 'OIH', 'NCH'))
        return y + b[None, :, None]

    h = jax.nn.relu(x @ p['fc1_w'].T + p['fc1_b'])
    h = jax.nn.relu(h @ p['fc2_w'].T + p['fc2_b'])
    h = h.reshape(-1, 1, L)
    h = bn(h, p['bn1_g'], p['bn1_b'], p['bn1_m'], p['bn1_v'])
    h = bn(jax.nn.relu(conv(h, p['c1_w'], p['c1_b'])),
           p['bnc1_g'], p['bnc1_b'], p['bnc1_m'], p['bnc1_v'])
    h = bn(jax.nn.relu(conv(h, p['c2_w'], p['c2_b'])),
           p['bnc2_g'], p['bnc2_b'], p['bnc2_m'], p['bnc2_v'])
    h = bn(jax.nn.relu(conv(h, p['c3_w'], p['c3_b'])),
           p['bnc3_g'], p['bnc3_b'], p['bnc3_m'], p['bnc3_v'])
    h = h.reshape(-1, L)
    h = jax.nn.relu(h @ p['fc3_w'].T + p['fc3_b'])
    h = h @ p['fc4_w'].T + p['fc4_b']
    return jax.nn.sigmoid(h)


# ------------------------- deterministic params -------------------------
def init_params(key):
    ks = jax.random.split(key, 14)

    def u(k, fan_in, shape):
        bound = 1.0 / float(fan_in) ** 0.5
        return jax.random.uniform(k, shape, jnp.float32, -bound, bound)

    p = {}
    p['fc1_w'], p['fc1_b'] = u(ks[0], 11, (460, 11)), u(ks[1], 11, (460,))
    p['fc2_w'], p['fc2_b'] = u(ks[2], 460, (144, 460)), u(ks[3], 460, (144,))
    p['fc3_w'], p['fc3_b'] = u(ks[4], 144, (144, 144)), u(ks[5], 144, (144,))
    p['fc4_w'], p['fc4_b'] = u(ks[6], 144, (1, 144)), u(ks[7], 144, (1,))
    p['c1_w'], p['c1_b'] = u(ks[8], 1 * 3, (16, 1, 3)), u(ks[9], 1 * 3, (16,))
    p['c2_w'], p['c2_b'] = u(ks[10], 16 * 3, (32, 16, 3)), u(ks[11], 16 * 3, (32,))
    p['c3_w'], p['c3_b'] = u(ks[12], 32 * 3, (1, 32, 3)), u(ks[13], 32 * 3, (1,))
    for name, c in (('bn1', 1), ('bnc1', 16), ('bnc2', 32), ('bnc3', 1)):
        p[f'{name}_g'] = jnp.ones((c,), jnp.float32)
        p[f'{name}_b'] = jnp.zeros((c,), jnp.float32)
        p[f'{name}_m'] = jnp.zeros((c,), jnp.float32)
        p[f'{name}_v'] = jnp.ones((c,), jnp.float32)
    return p


if __name__ == "__main__":
    B = 8
    key = jax.random.PRNGKey(0)
    kx, kp = jax.random.split(key)
    x = jax.random.normal(kx, (B, 11), dtype=jnp.float32)
    params = init_params(kp)

    prepped = prepare_params(params, B)       # one-time host prep; cache & reuse across calls
    out = mymodel_forward(x, prepped)
    out = jax.block_until_ready(out)
    assert out.shape == (B, 1), out.shape

    ref = ref_forward(x, params)
    max_err = float(jnp.max(jnp.abs(out - ref)))
    assert max_err < 1e-4, f"mismatch vs reference: {max_err}"

    print("KERNEL_OK")
</pallas_src>

<mosaic_0001>
module attributes {stable_mosaic.version = 11 : i64} {
  func.func @mymodel_kernel(%arg0: i32, %arg1: memref<8x16xf32, #tpu.memory_space<vmem>>, %arg2: memref<16x512xf32, #tpu.memory_space<vmem>>, %arg3: memref<512x144xf32, #tpu.memory_space<vmem>>, %arg4: memref<144x144xf32, #tpu.memory_space<vmem>>, %arg5: memref<4x512xf32, #tpu.memory_space<vmem>>, %arg6: memref<16x8xf32, #tpu.memory_space<vmem>>, %arg7: memref<96x16xf32, #tpu.memory_space<vmem>>, %arg8: memref<32x8xf32, #tpu.memory_space<vmem>>, %arg9: memref<2x1152xf32, #tpu.memory_space<vmem>>, %arg10: memref<1x8xf32, #tpu.memory_space<vmem>>, %arg11: memref<8x1xf32, #tpu.memory_space<vmem>>, %arg12: memref<1x1152xf32, #tpu.memory_space<vmem>>) attributes {dimension_semantics = [#tpu.dimension_semantics<parallel>], iteration_bounds = array<i64: 1>, scalar_prefetch = 0 : i64, scratch_operands = 1 : i64, tpu.core_type = #tpu.core_type<tc>, window_params = [{transform_indices = @transform_0, window_bounds = array<i64: 8, 16>}, {pipeline_mode = #tpu.pipeline_mode<synchronous>, transform_indices = @transform_1, window_bounds = array<i64: 16, 512>}, {pipeline_mode = #tpu.pipeline_mode<synchronous>, transform_indices = @transform_2, window_bounds = array<i64: 512, 144>}, {pipeline_mode = #tpu.pipeline_mode<synchronous>, transform_indices = @transform_3, window_bounds = array<i64: 144, 144>}, {pipeline_mode = #tpu.pipeline_mode<synchronous>, transform_indices = @transform_4, window_bounds = array<i64: 4, 512>}, {pipeline_mode = #tpu.pipeline_mode<synchronous>, transform_indices = @transform_5, window_bounds = array<i64: 16, 8>}, {pipeline_mode = #tpu.pipeline_mode<synchronous>, transform_indices = @transform_6, window_bounds = array<i64: 96, 16>}, {pipeline_mode = #tpu.pipeline_mode<synchronous>, transform_indices = @transform_7, window_bounds = array<i64: 32, 8>}, {pipeline_mode = #tpu.pipeline_mode<synchronous>, transform_indices = @transform_8, window_bounds = array<i64: 2, 1152>}, {pipeline_mode = #tpu.pipeline_mode<synchronous>, transform_indices = @transform_9, window_bounds = array<i64: 1, 8>}, {transform_indices = @transform_10, window_bounds = array<i64: 8, 1>}]} {
    %c0 = arith.constant 0 : index
    %c0_0 = arith.constant 0 : index
    %0 = vector.load %arg1[%c0, %c0_0] : memref<8x16xf32, #tpu.memory_space<vmem>>, vector<8x16xf32>
    %c0_1 = arith.constant 0 : index
    %c0_2 = arith.constant 0 : index
    %1 = vector.load %arg2[%c0_1, %c0_2] : memref<16x512xf32, #tpu.memory_space<vmem>>, vector<16x512xf32>
    %cst = arith.constant dense<0.000000e+00> : vector<8x512xf32>
    %2 = tpu.matmul %0, %1, %cst {dimension_numbers = #tpu.dot_dimension_numbers<[1], [0], [0], [1], [0, 0, 1, 1], [], []>} : vector<8x16xf32>, vector<16x512xf32>, vector<8x512xf32> -> vector<8x512xf32>
    %c0_3 = arith.constant 0 : index
    %c0_4 = arith.constant 0 : index
    %3 = vector.load %arg5[%c0_3, %c0_4] : memref<4x512xf32, #tpu.memory_space<vmem>>, vector<1x512xf32>
    %4 = vector.broadcast %3 : vector<1x512xf32> to vector<8x512xf32>
    %5 = arith.addf %2, %4 : vector<8x512xf32>
    %cst_5 = arith.constant 0.000000e+00 : f32
    %6 = vector.broadcast %cst_5 : f32 to vector<8x512xf32>
    %7 = arith.maximumf %5, %6 : vector<8x512xf32>
    %c0_6 = arith.constant 0 : index
    %c0_7 = arith.constant 0 : index
    %8 = vector.load %arg3[%c0_6, %c0_7] : memref<512x144xf32, #tpu.memory_space<vmem>>, vector<512x144xf32>
    %cst_8 = arith.constant dense<0.000000e+00> : vector<8x144xf32>
    %9 = tpu.matmul %7, %8, %cst_8 {dimension_numbers = #tpu.dot_dimension_numbers<[1], [0], [0], [1], [0, 0, 1, 1], [], []>} : vector<8x512xf32>, vector<512x144xf32>, vector<8x144xf32> -> vector<8x144xf32>
    %c1 = arith.constant 1 : index
    %c0_9 = arith.constant 0 : index
    %10 = vector.load %arg5[%c1, %c0_9] : memref<4x512xf32, #tpu.memory_space<vmem>>, vector<1x144xf32>
    %11 = vector.broadcast %10 : vector<1x144xf32> to vector<8x144xf32>
    %12 = arith.addf %9, %11 : vector<8x144xf32>
    %cst_10 = arith.constant 0.000000e+00 : f32
    %13 = vector.broadcast %cst_10 : f32 to vector<8x144xf32>
    %14 = arith.maximumf %12, %13 : vector<8x144xf32>
    %15 = vector.extract_strided_slice %14 {offsets = [0, 0], sizes = [1, 144], strides = [1, 1]} : vector<8x144xf32> to vector<1x144xf32>
    %c0_11 = arith.constant 0 : index
    %c0_12 = arith.constant 0 : index
    %16 = vector.load %arg12[%c0_11, %c0_12] : memref<1x1152xf32, #tpu.memory_space<vmem>>, vector<1x144xf32>
    tpu.vector_store %arg12[%c0_11, %c0_12], %15 {strides = array<i32>} : memref<1x1152xf32, #tpu.memory_space<vmem>>, vector<1x144xf32>,
    %17 = vector.extract_strided_slice %14 {offsets = [1, 0], sizes = [1, 144], strides = [1, 1]} : vector<8x144xf32> to vector<1x144xf32>
    %c0_13 = arith.constant 0 : index
    %c144 = arith.constant 144 : index
    %18 = vector.load %arg12[%c0_13, %c144] : memref<1x1152xf32, #tpu.memory_space<vmem>>, vector<1x144xf32>
    tpu.vector_store %arg12[%c0_13, %c144], %17 {strides = array<i32>} : memref<1x1152xf32, #tpu.memory_space<vmem>>, vector<1x144xf32>,
    %19 = vector.extract_strided_slice %14 {offsets = [2, 0], sizes = [1, 144], strides = [1, 1]} : vector<8x144xf32> to vector<1x144xf32>
    %c0_14 = arith.constant 0 : index
    %c288 = arith.constant 288 : index
    %20 = vector.load %arg12[%c0_14, %c288] : memref<1x1152xf32, #tpu.memory_space<vmem>>, vector<1x144xf32>
    tpu.vector_store %arg12[%c0_14, %c288], %19 {strides = array<i32>} : memref<1x1152xf32, #tpu.memory_space<vmem>>, vector<1x144xf32>,
    %21 = vector.extract_strided_slice %14 {offsets = [3, 0], sizes = [1, 144], strides = [1, 1]} : vector<8x144xf32> to vector<1x144xf32>
    %c0_15 = arith.constant 0 : index
    %c432 = arith.constant 432 : index
    %22 = vector.load %arg12[%c0_15, %c432] : memref<1x1152xf32, #tpu.memory_space<vmem>>, vector<1x144xf32>
    tpu.vector_store %arg12[%c0_15, %c432], %21 {strides = array<i32>} : memref<1x1152xf32, #tpu.memory_space<vmem>>, vector<1x144xf32>,
    %23 = vector.extract_strided_slice %14 {offsets = [4, 0], sizes = [1, 144], strides = [1, 1]} : vector<8x144xf32> to vector<1x144xf32>
    %c0_16 = arith.constant 0 : index
    %c576 = arith.constant 576 : index
    %24 = vector.load %arg12[%c0_16, %c576] : memref<1x1152xf32, #tpu.memory_space<vmem>>, vector<1x144xf32>
    tpu.vector_store %arg12[%c0_16, %c576], %23 {strides = array<i32>} : memref<1x1152xf32, #tpu.memory_space<vmem>>, vector<1x144xf32>,
    %25 = vector.extract_strided_slice %14 {offsets = [5, 0], sizes = [1, 144], strides = [1, 1]} : vector<8x144xf32> to vector<1x144xf32>
    %c0_17 = arith.constant 0 : index
    %c720 = arith.constant 720 : index
    %26 = vector.load %arg12[%c0_17, %c720] : memref<1x1152xf32, #tpu.memory_space<vmem>>, vector<1x144xf32>
    tpu.vector_store %arg12[%c0_17, %c720], %25 {strides = array<i32>} : memref<1x1152xf32, #tpu.memory_space<vmem>>, vector<1x144xf32>,
    %27 = vector.extract_strided_slice %14 {offsets = [6, 0], sizes = [1, 144], strides = [1, 1]} : vector<8x144xf32> to vector<1x144xf32>
    %c0_18 = arith.constant 0 : index
    %c864 = arith.constant 864 : index
    %28 = vector.load %arg12[%c0_18, %c864] : memref<1x1152xf32, #tpu.memory_space<vmem>>, vector<1x144xf32>
    tpu.vector_store %arg12[%c0_18, %c864], %27 {strides = array<i32>} : memref<1x1152xf32, #tpu.memory_space<vmem>>, vector<1x144xf32>,
    %29 = vector.extract_strided_slice %14 {offsets = [7, 0], sizes = [1, 144], strides = [1, 1]} : vector<8x144xf32> to vector<1x144xf32>
    %c0_19 = arith.constant 0 : index
    %c1008 = arith.constant 1008 : index
    %30 = vector.load %arg12[%c0_19, %c1008] : memref<1x1152xf32, #tpu.memory_space<vmem>>, vector<1x144xf32>
    tpu.vector_store %arg12[%c0_19, %c1008], %29 {strides = array<i32>} : memref<1x1152xf32, #tpu.memory_space<vmem>>, vector<1x144xf32>,
    %c0_20 = arith.constant 0 : index
    %c0_21 = arith.constant 0 : index
    %31 = vector.load %arg12[%c0_20, %c0_21] : memref<1x1152xf32, #tpu.memory_space<vmem>>, vector<1x1152xf32>
    %c0_22 = arith.constant 0 : index
    %c0_23 = arith.constant 0 : index
    %32 = vector.load %arg10[%c0_22, %c0_23] : memref<1x8xf32, #tpu.memory_space<vmem>>, vector<1x8xf32>
    %33 = vector.extract_strided_slice %32 {offsets = [0, 0], sizes = [1, 1], strides = [1, 1]} : vector<1x8xf32> to vector<1x1xf32>
    %34 = vector.extract_strided_slice %32 {offsets = [0, 1], sizes = [1, 1], strides = [1, 1]} : vector<1x8xf32> to vector<1x1xf32>
    %35 = vector.extract_strided_slice %32 {offsets = [0, 2], sizes = [1, 1], strides = [1, 1]} : vector<1x8xf32> to vector<1x1xf32>
    %36 = vector.extract_strided_slice %32 {offsets = [0, 3], sizes = [1, 1], strides = [1, 1]} : vector<1x8xf32> to vector<1x1xf32>
    %37 = vector.extract_strided_slice %32 {offsets = [0, 4], sizes = [1, 1], strides = [1, 1]} : vector<1x8xf32> to vector<1x1xf32>
    %38 = vector.extract_strided_slice %32 {offsets = [0, 5], sizes = [1, 1], strides = [1, 1]} : vector<1x8xf32> to vector<1x1xf32>
    %39 = vector.broadcast %33 : vector<1x1xf32> to vector<1x1152xf32>
    %40 = arith.mulf %31, %39 : vector<1x1152xf32>
    %41 = vector.broadcast %34 : vector<1x1xf32> to vector<1x1152xf32>
    %42 = arith.addf %40, %41 : vector<1x1152xf32>
    %c0_24 = arith.constant 0 : index
    %c0_25 = arith.constant 0 : index
    %43 = vector.load %arg9[%c0_24, %c0_25] : memref<2x1152xf32, #tpu.memory_space<vmem>>, vector<1x1152xf32>
    %c1_26 = arith.constant 1 : index
    %c0_27 = arith.constant 0 : index
    %44 = vector.load %arg9[%c1_26, %c0_27] : memref<2x1152xf32, #tpu.memory_space<vmem>>, vector<1x1152xf32>
    %c1_i32 = arith.constant 1 : i32
    %45 = tpu.dynamic_rotate %42 by %c1_i32 dim 1 : vector<1x1152xf32>, i32 -> vector<1x1152xf32>
    %46 = arith.mulf %45, %43 : vector<1x1152xf32>
    %c1151_i32 = arith.constant 1151 : i32
    %47 = tpu.dynamic_rotate %42 by %c1151_i32 dim 1 : vector<1x1152xf32>, i32 -> vector<1x1152xf32>
    %48 = arith.mulf %47, %44 : vector<1x1152xf32>
    %c0_28 = arith.constant 0 : index
    %c0_29 = arith.constant 0 : index
    %49 = vector.load %arg6[%c0_28, %c0_29] : memref<16x8xf32, #tpu.memory_space<vmem>>, vector<16x8xf32>
    %50 = vector.extract_strided_slice %49 {offsets = [0, 0], sizes = [16, 1], strides = [1, 1]} : vector<16x8xf32> to vector<16x1xf32>
    %51 = vector.broadcast %50 : vector<16x1xf32> to vector<16x1152xf32>
    %52 = vector.broadcast %46 : vector<1x1152xf32> to vector<16x1152xf32>
    %53 = arith.mulf %51, %52 : vector<16x1152xf32>
    %54 = vector.extract_strided_slice %49 {offsets = [0, 1], sizes = [16, 1], strides = [1, 1]} : vector<16x8xf32> to vector<16x1xf32>
    %55 = vector.broadcast %54 : vector<16x1xf32> to vector<16x1152xf32>
    %56 = vector.broadcast %42 : vector<1x1152xf32> to vector<16x1152xf32>
    %57 = arith.mulf %55, %56 : vector<16x1152xf32>
    %58 = arith.addf %53, %57 : vector<16x1152xf32>
    %59 = vector.extract_strided_slice %49 {offsets = [0, 2], sizes = [16, 1], strides = [1, 1]} : vector<16x8xf32> to vector<16x1xf32>
    %60 = vector.broadcast %59 : vector<16x1xf32> to vector<16x1152xf32>
    %61 = vector.broadcast %48 : vector<1x1152xf32> to vector<16x1152xf32>
    %62 = arith.mulf %60, %61 : vector<16x1152xf32>
    %63 = arith.addf %58, %62 : vector<16x1152xf32>
    %64 = vector.extract_strided_slice %49 {offsets = [0, 3], sizes = [16, 1], strides = [1, 1]} : vector<16x8xf32> to vector<16x1xf32>
    %65 = vector.broadcast %64 : vector<16x1xf32> to vector<16x1152xf32>
    %66 = arith.addf %63, %65 : vector<16x1152xf32>
    %cst_30 = arith.constant 0.000000e+00 : f32
    %67 = vector.broadcast %cst_30 : f32 to vector<16x1152xf32>
    %68 = arith.maximumf %66, %67 : vector<16x1152xf32>
    %69 = vector.extract_strided_slice %49 {offsets = [0, 4], sizes = [16, 1], strides = [1, 1]} : vector<16x8xf32> to vector<16x1xf32>
    %70 = vector.broadcast %69 : vector<16x1xf32> to vector<16x1152xf32>
    %71 = arith.mulf %68, %70 : vector<16x1152xf32>
    %72 = vector.extract_strided_slice %49 {offsets = [0, 5], sizes = [16, 1], strides = [1, 1]} : vector<16x8xf32> to vector<16x1xf32>
    %73 = vector.broadcast %72 : vector<16x1xf32> to vector<16x1152xf32>
    %74 = arith.addf %71, %73 : vector<16x1152xf32>
    %c1_i32_31 = arith.constant 1 : i32
    %75 = tpu.dynamic_rotate %74 by %c1_i32_31 dim 1 : vector<16x1152xf32>, i32 -> vector<16x1152xf32>
    %76 = vector.broadcast %43 : vector<1x1152xf32> to vector<16x1152xf32>
    %77 = arith.mulf %75, %76 : vector<16x1152xf32>
    %c1151_i32_32 = arith.constant 1151 : i32
    %78 = tpu.dynamic_rotate %74 by %c1151_i32_32 dim 1 : vector<16x1152xf32>, i32 -> vector<16x1152xf32>
    %79 = vector.broadcast %44 : vector<1x1152xf32> to vector<16x1152xf32>
    %80 = arith.mulf %78, %79 : vector<16x1152xf32>
    %c0_33 = arith.constant 0 : index
    %c0_34 = arith.constant 0 : index
    %81 = vector.load %arg7[%c0_33, %c0_34] : memref<96x16xf32, #tpu.memory_space<vmem>>, vector<32x16xf32>
    %cst_35 = arith.constant dense<0.000000e+00> : vector<32x1152xf32>
    %82 = tpu.matmul %81, %77, %cst_35 {dimension_numbers = #tpu.dot_dimension_numbers<[1], [0], [0], [1], [0, 0, 1, 1], [], []>} : vector<32x16xf32>, vector<16x1152xf32>, vector<32x1152xf32> -> vector<32x1152xf32>
    %c32 = arith.constant 32 : index
    %c0_36 = arith.constant 0 : index
    %83 = vector.load %arg7[%c32, %c0_36] : memref<96x16xf32, #tpu.memory_space<vmem>>, vector<32x16xf32>
    %cst_37 = arith.constant dense<0.000000e+00> : vector<32x1152xf32>
    %84 = tpu.matmul %83, %74, %cst_37 {dimension_numbers = #tpu.dot_dimension_numbers<[1], [0], [0], [1], [0, 0, 1, 1], [], []>} : vector<32x16xf32>, vector<16x1152xf32>, vector<32x1152xf32> -> vector<32x1152xf32>
    %85 = arith.addf %82, %84 : vector<32x1152xf32>
    %c64 = arith.constant 64 : index
    %c0_38 = arith.constant 0 : index
    %86 = vector.load %arg7[%c64, %c0_38] : memref<96x16xf32, #tpu.memory_space<vmem>>, vector<32x16xf32>
    %cst_39 = arith.constant dense<0.000000e+00> : vector<32x1152xf32>
    %87 = tpu.matmul %86, %80, %cst_39 {dimension_numbers = #tpu.dot_dimension_numbers<[1], [0], [0], [1], [0, 0, 1, 1], [], []>} : vector<32x16xf32>, vector<16x1152xf32>, vector<32x1152xf32> -> vector<32x1152xf32>
    %88 = arith.addf %85, %87 : vector<32x1152xf32>
    %c0_40 = arith.constant 0 : index
    %c0_41 = arith.constant 0 : index
    %89 = vector.load %arg8[%c0_40, %c0_41] : memref<32x8xf32, #tpu.memory_space<vmem>>, vector<32x8xf32>
    %90 = vector.extract_strided_slice %89 {offsets = [0, 0], sizes = [32, 1], strides = [1, 1]} : vector<32x8xf32> to vector<32x1xf32>
    %91 = vector.broadcast %90 : vector<32x1xf32> to vector<32x1152xf32>
    %92 = arith.addf %88, %91 : vector<32x1152xf32>
    %cst_42 = arith.constant 0.000000e+00 : f32
    %93 = vector.broadcast %cst_42 : f32 to vector<32x1152xf32>
    %94 = arith.maximumf %92, %93 : vector<32x1152xf32>
    %95 = vector.extract_strided_slice %89 {offsets = [0, 1], sizes = [32, 1], strides = [1, 1]} : vector<32x8xf32> to vector<32x1xf32>
    %96 = vector.broadcast %95 : vector<32x1xf32> to vector<32x1152xf32>
    %97 = arith.mulf %94, %96 : vector<32x1152xf32>
    %98 = vector.extract_strided_slice %89 {offsets = [0, 2], sizes = [32, 1], strides = [1, 1]} : vector<32x8xf32> to vector<32x1xf32>
    %99 = vector.broadcast %98 : vector<32x1xf32> to vector<32x1152xf32>
    %100 = arith.addf %97, %99 : vector<32x1152xf32>
    %c1_i32_43 = arith.constant 1 : i32
    %101 = tpu.dynamic_rotate %100 by %c1_i32_43 dim 1 : vector<32x1152xf32>, i32 -> vector<32x1152xf32>
    %102 = vector.broadcast %43 : vector<1x1152xf32> to vector<32x1152xf32>
    %103 = arith.mulf %101, %102 : vector<32x1152xf32>
    %c1151_i32_44 = arith.constant 1151 : i32
    %104 = tpu.dynamic_rotate %100 by %c1151_i32_44 dim 1 : vector<32x1152xf32>, i32 -> vector<32x1152xf32>
    %105 = vector.broadcast %44 : vector<1x1152xf32> to vector<32x1152xf32>
    %106 = arith.mulf %104, %105 : vector<32x1152xf32>
    %107 = vector.extract_strided_slice %89 {offsets = [0, 3], sizes = [32, 1], strides = [1, 1]} : vector<32x8xf32> to vector<32x1xf32>
    %108 = vector.broadcast %107 : vector<32x1xf32> to vector<32x1152xf32>
    %109 = arith.mulf %108, %103 : vector<32x1152xf32>
    %110 = vector.extract_strided_slice %89 {offsets = [0, 4], sizes = [32, 1], strides = [1, 1]} : vector<32x8xf32> to vector<32x1xf32>
    %111 = vector.broadcast %110 : vector<32x1xf32> to vector<32x1152xf32>
    %112 = arith.mulf %111, %100 : vector<32x1152xf32>
    %113 = arith.addf %109, %112 : vector<32x1152xf32>
    %114 = vector.extract_strided_slice %89 {offsets = [0, 5], sizes = [32, 1], strides = [1, 1]} : vector<32x8xf32> to vector<32x1xf32>
    %115 = vector.broadcast %114 : vector<32x1xf32> to vector<32x1152xf32>
    %116 = arith.mulf %115, %106 : vector<32x1152xf32>
    %117 = arith.addf %113, %116 : vector<32x1152xf32>
    %cst_45 = arith.constant dense<0.000000e+00> : vector<1152xf32>
    %118 = vector.multi_reduction <add>, %117, %cst_45 [0] : vector<32x1152xf32> to vector<1152xf32>
    %119 = vector.shape_cast %118 : vector<1152xf32> to vector<1x1152xf32>
    %120 = vector.broadcast %35 : vector<1x1xf32> to vector<1x1152xf32>
    %121 = arith.addf %119, %120 : vector<1x1152xf32>
    %cst_46 = arith.constant 0.000000e+00 : f32
    %122 = vector.broadcast %cst_46 : f32 to vector<1x1152xf32>
    %123 = arith.maximumf %121, %122 : vector<1x1152xf32>
    %124 = vector.broadcast %36 : vector<1x1xf32> to vector<1x1152xf32>
    %125 = arith.mulf %123, %124 : vector<1x1152xf32>
    %126 = vector.broadcast %37 : vector<1x1xf32> to vector<1x1152xf32>
    %127 = arith.addf %125, %126 : vector<1x1152xf32>
    %c0_47 = arith.constant 0 : index
    %c0_48 = arith.constant 0 : index
    %128 = vector.load %arg12[%c0_47, %c0_48] : memref<1x1152xf32, #tpu.memory_space<vmem>>, vector<1x1152xf32>
    tpu.vector_store %arg12[%c0_47, %c0_48], %127 {strides = array<i32>} : memref<1x1152xf32, #tpu.memory_space<vmem>>, vector<1x1152xf32>,
    %c0_49 = arith.constant 0 : index
    %c0_50 = arith.constant 0 : index
    %129 = vector.load %arg12[%c0_49, %c0_50] : memref<1x1152xf32, #tpu.memory_space<vmem>>, vector<1x144xf32>
    %c0_51 = arith.constant 0 : index
    %c144_52 = arith.constant 144 : index
    %130 = vector.load %arg12[%c0_51, %c144_52] : memref<1x1152xf32, #tpu.memory_space<vmem>>, vector<1x144xf32>
    %c0_53 = arith.constant 0 : index
    %c288_54 = arith.constant 288 : index
    %131 = vector.load %arg12[%c0_53, %c288_54] : memref<1x1152xf32, #tpu.memory_space<vmem>>, vector<1x144xf32>
    %c0_55 = arith.constant 0 : index
    %c432_56 = arith.constant 432 : index
    %132 = vector.load %arg12[%c0_55, %c432_56] : memref<1x1152xf32, #tpu.memory_space<vmem>>, vector<1x144xf32>
    %c0_57 = arith.constant 0 : index
    %c576_58 = arith.constant 576 : index
    %133 = vector.load %arg12[%c0_57, %c576_58] : memref<1x1152xf32, #tpu.memory_space<vmem>>, vector<1x144xf32>
    %c0_59 = arith.constant 0 : index
    %c720_60 = arith.constant 720 : index
    %134 = vector.load %arg12[%c0_59, %c720_60] : memref<1x1152xf32, #tpu.memory_space<vmem>>, vector<1x144xf32>
    %c0_61 = arith.constant 0 : index
    %c864_62 = arith.constant 864 : index
    %135 = vector.load %arg12[%c0_61, %c864_62] : memref<1x1152xf32, #tpu.memory_space<vmem>>, vector<1x144xf32>
    %c0_63 = arith.constant 0 : index
    %c1008_64 = arith.constant 1008 : index
    %136 = vector.load %arg12[%c0_63, %c1008_64] : memref<1x1152xf32, #tpu.memory_space<vmem>>, vector<1x144xf32>
    %137 = tpu.concatenate %129, %130, %131, %132, %133, %134, %135, %136 in 0 : vector<1x144xf32>, vector<1x144xf32>, vector<1x144xf32>, vector<1x144xf32>, vector<1x144xf32>, vector<1x144xf32>, vector<1x144xf32>, vector<1x144xf32> -> vector<8x144xf32>
    %c0_65 = arith.constant 0 : index
    %c0_66 = arith.constant 0 : index
    %138 = vector.load %arg4[%c0_65, %c0_66] : memref<144x144xf32, #tpu.memory_space<vmem>>, vector<144x144xf32>
    %cst_67 = arith.constant dense<0.000000e+00> : vector<8x144xf32>
    %139 = tpu.matmul %137, %138, %cst_67 {dimension_numbers = #tpu.dot_dimension_numbers<[1], [0], [0], [1], [0, 0, 1, 1], [], []>} : vector<8x144xf32>, vector<144x144xf32>, vector<8x144xf32> -> vector<8x144xf32>
    %c2 = arith.constant 2 : index
    %c0_68 = arith.constant 0 : index
    %140 = vector.load %arg5[%c2, %c0_68] : memref<4x512xf32, #tpu.memory_space<vmem>>, vector<1x144xf32>
    %141 = vector.broadcast %140 : vector<1x144xf32> to vector<8x144xf32>
    %142 = arith.addf %139, %141 : vector<8x144xf32>
    %cst_69 = arith.constant 0.000000e+00 : f32
    %143 = vector.broadcast %cst_69 : f32 to vector<8x144xf32>
    %144 = arith.maximumf %142, %143 : vector<8x144xf32>
    %c3 = arith.constant 3 : index
    %c0_70 = arith.constant 0 : index
    %145 = vector.load %arg5[%c3, %c0_70] : memref<4x512xf32, #tpu.memory_space<vmem>>, vector<1x144xf32>
    %146 = vector.broadcast %145 : vector<1x144xf32> to vector<8x144xf32>
    %147 = arith.mulf %144, %146 : vector<8x144xf32>
    %cst_71 = arith.constant dense<0.000000e+00> : vector<8xf32>
    %148 = vector.multi_reduction <add>, %147, %cst_71 [1] : vector<8x144xf32> to vector<8xf32>
    %149 = vector.shape_cast %148 : vector<8xf32> to vector<8x1xf32>
    %150 = vector.broadcast %38 : vector<1x1xf32> to vector<8x1xf32>
    %151 = arith.addf %149, %150 : vector<8x1xf32>
    %cst_72 = arith.constant 0.000000e+00 : f32
    %152 = vector.broadcast %cst_72 : f32 to vector<8x1xf32>
    %153 = arith.subf %152, %151 : vector<8x1xf32>
    %154 = math.exp %153 : vector<8x1xf32>
    %cst_73 = arith.constant 1.000000e+00 : f32
    %155 = vector.broadcast %cst_73 : f32 to vector<8x1xf32>
    %156 = arith.addf %155, %154 : vector<8x1xf32>
    %cst_74 = arith.constant 1.000000e+00 : f32
    %157 = vector.broadcast %cst_74 : f32 to vector<8x1xf32>
    %158 = arith.divf %157, %156 : vector<8x1xf32>
    %c0_75 = arith.constant 0 : index
    %c0_76 = arith.constant 0 : index
    %159 = vector.load %arg11[%c0_75, %c0_76] : memref<8x1xf32, #tpu.memory_space<vmem>>, vector<8x1xf32>
    tpu.vector_store %arg11[%c0_75, %c0_76], %158 {strides = array<i32>} : memref<8x1xf32, #tpu.memory_space<vmem>>, vector<8x1xf32>,
    return
  }
  func.func @transform_0(%arg0: i32) -> (i32, i32) {
    %c0_i32 = arith.constant 0 : i32
    %c0_i32_0 = arith.constant 0 : i32
    return %arg0, %c0_i32 : i32, i32
  }
  func.func @transform_1(%arg0: i32) -> (i32, i32) {
    %c0_i32 = arith.constant 0 : i32
    %c0_i32_0 = arith.constant 0 : i32
    %c0_i32_1 = arith.constant 0 : i32
    return %c0_i32, %c0_i32_0 : i32, i32
  }
  func.func @transform_2(%arg0: i32) -> (i32, i32) {
    %c0_i32 = arith.constant 0 : i32
    %c0_i32_0 = arith.constant 0 : i32
    %c0_i32_1 = arith.constant 0 : i32
    return %c0_i32, %c0_i32_0 : i32, i32
  }
  func.func @transform_3(%arg0: i32) -> (i32, i32) {
    %c0_i32 = arith.constant 0 : i32
    %c0_i32_0 = arith.constant 0 : i32
    %c0_i32_1 = arith.constant 0 : i32
    return %c0_i32, %c0_i32_0 : i32, i32
  }
  func.func @transform_4(%arg0: i32) -> (i32, i32) {
    %c0_i32 = arith.constant 0 : i32
    %c0_i32_0 = arith.constant 0 : i32
    %c0_i32_1 = arith.constant 0 : i32
    return %c0_i32, %c0_i32_0 : i32, i32
  }
  func.func @transform_5(%arg0: i32) -> (i32, i32) {
    %c0_i32 = arith.constant 0 : i32
    %c0_i32_0 = arith.constant 0 : i32
    %c0_i32_1 = arith.constant 0 : i32
    return %c0_i32, %c0_i32_0 : i32, i32
  }
  func.func @transform_6(%arg0: i32) -> (i32, i32) {
    %c0_i32 = arith.constant 0 : i32
    %c0_i32_0 = arith.constant 0 : i32
    %c0_i32_1 = arith.constant 0 : i32
    return %c0_i32, %c0_i32_0 : i32, i32
  }
  func.func @transform_7(%arg0: i32) -> (i32, i32) {
    %c0_i32 = arith.constant 0 : i32
    %c0_i32_0 = arith.constant 0 : i32
    %c0_i32_1 = arith.constant 0 : i32
    return %c0_i32, %c0_i32_0 : i32, i32
  }
  func.func @transform_8(%arg0: i32) -> (i32, i32) {
    %c0_i32 = arith.constant 0 : i32
    %c0_i32_0 = arith.constant 0 : i32
    %c0_i32_1 = arith.constant 0 : i32
    return %c0_i32, %c0_i32_0 : i32, i32
  }
  func.func @transform_9(%arg0: i32) -> (i32, i32) {
    %c0_i32 = arith.constant 0 : i32
    %c0_i32_0 = arith.constant 0 : i32
    %c0_i32_1 = arith.constant 0 : i32
    return %c0_i32, %c0_i32_0 : i32, i32
  }
  func.func @transform_10(%arg0: i32) -> (i32, i32) {
    %c0_i32 = arith.constant 0 : i32
    %c0_i32_0 = arith.constant 0 : i32
    return %arg0, %c0_i32 : i32, i32
  }
}

</mosaic_0001>

<bundles_post_ra>
// kernel: _forward_impl.1
= control target key start
LH: loop header
LB: loop body
LE: loop exit
PB: predicated region body
PF: predicated region fallthrough
CT: control target
= control target key end

     0   :  { %v7370_v3 = vmov 0.0   ;;  %vm66_vm0 = vcmask 130048   ;;  %s4452_s27 = smov 16   ;;  %s4453_s28 = smov 48   ;;  %vm7358_vm9 = vcmask 261120   ;;  %vm556_vm12 = vcmask 392192   ;;  %s7347_s1 = inlined_call_operand.vmem [shape: f32[16,512], index: 1, kind: input, shape index: {}]   ;;  %s7348_s0 = inlined_call_operand.vmem [shape: f32[8,16], index: 0, kind: input, shape index: {}]   ;;  %s7349_s2 = inlined_call_operand.vmem [shape: f32[512,144], index: 2, kind: input, shape index: {}]   ;;  %s7350_s4 = inlined_call_operand.vmem [shape: f32[4,512], index: 4, kind: input, shape index: {}]   ;;  %s7351_s9 = inlined_call_operand.vmem [shape: f32[1,8], index: 9, kind: input, shape index: {}]   ;;  %s7352_s5 = inlined_call_operand.vmem [shape: f32[16,8], index: 5, kind: input, shape index: {}]   ;;  %s7353_s8 = inlined_call_operand.vmem [shape: f32[2,1152], index: 8, kind: input, shape index: {}]   ;;  %s7354_s6 = inlined_call_operand.vmem [shape: f32[96,16], index: 6, kind: input, shape index: {}]   ;;  %s7355_s7 = inlined_call_operand.vmem [shape: f32[32,8], index: 7, kind: input, shape index: {}]   ;;  %s7356_s3 = inlined_call_operand.vmem [shape: f32[144,144], index: 3, kind: input, shape index: {}]   ;;  %s7357_s10 = inlined_call_operand.vmem [shape: f32[8,1], index: 10, kind: output, shape index: {}]  }
   0x1   :  { %v37_v0 = vld [vmem:[%s7347_s1 + $0x8] sm:$0xff]  ;;  %v36_v2 = vld [vmem:[%s7347_s1] sm:$0xff]  ;;  %134 = vmatprep.mubr.f32.mxu0 %v7370_v3  ;;  %205 = vmatprep.mubr.f32.mxu1 %v7370_v3  ;;  %v39_v6 = vld [vmem:[%s7347_s1 + $0x18] sm:$0xff]  ;;  %s4454_s29 = smov 32   ;;  %s4455_s30 = smov 96   ;;  %vm581_vm14 = vcmask 523264  }
   0x2   :  { %v41_v1 = vld [vmem:[%s7347_s1 + $0x28] sm:$0xff]  ;;  %v40_v5 = vld [vmem:[%s7347_s1 + $0x20] sm:$0xff]  ;;  %v43_v9 = vld [vmem:[%s7347_s1 + $0x38] sm:$0xff]  ;;  %s4457_s15 = smov 112   ;;  %s4463_s17 = smov 127  }
   0x3   :  { %v4083_v4 = vpack.c.bf16 %v41_v1, %v37_v0  ;;  %v4085_v7 = vpack.c.bf16 %v40_v5, %v36_v2  ;;  %v35_v8 = vld [vmem:[%s7348_s0] sm:$0xff]  ;;  %v38_v10 = vld [vmem:[%s7347_s1 + $0x10] sm:$0xff]  ;;  %v4087_v12 = vpack.c.bf16 %v43_v9, %v39_v6  ;;  %v217_v14 = vld [vmem:[%s7349_s2 + $0x8] sm:$0xff]  ;;  %s4456_s0 = smov 80  }
   0x4   :  { %v42_v11 = vld [vmem:[%s7347_s1 + $0x30] sm:$0xff]  ;;  %v219_v15 = vld [vmem:[%s7349_s2 + $0x18] sm:$0xff]  ;;  %v216_v16 = vld [vmem:[%s7349_s2] sm:$0xff] }
   0x5   :  { %4084 = vmatprep.subr.bf16.mxu0 %v4083_v4  ;;  %v4089_v13 = vpack.c.bf16 %v42_v11, %v38_v10  ;;  %v4091_v17 = vpack.c.bf16 %v219_v15, %v217_v14  ;;  %v218_v18 = vld [vmem:[%s7349_s2 + $0x10] sm:$0xff]  ;;  %v221_v19 = vld [vmem:[%s7349_s2 + $0x28] sm:$0xff]  ;;  %v223_v20 = vld [vmem:[%s7349_s2 + $0x38] sm:$0xff]  ;;  %4088 = vmatprep.subr.bf16.mxu1 %v4087_v12 }
   0x6   :  { %4086 = vmatpush1.bf16.msra.mxu0 %v4085_v7  ;;  %v4093_v21 = vpack.c.bf16 %v218_v18, %v216_v16  ;;  %v4095_v22 = vpack.c.bf16 %v223_v20, %v221_v19  ;;  %v220_v23 = vld [vmem:[%s7349_s2 + $0x20] sm:$0xff]  ;;  %v222_v24 = vld [vmem:[%s7349_s2 + $0x30] sm:$0xff]  ;;  %v225_v25 = vld [vmem:[%s7349_s2 + $0x48] sm:$0xff] }
   0x7   :  { %4090 = vmatpush1.bf16.msra.mxu1 %v4089_v13  ;;  %4092 = vmatprep.subr.bf16.mxu0 %v4091_v17  ;;  %v227_v26 = vld [vmem:[%s7349_s2 + $0x58] sm:$0xff]  ;;  %v4097_v27 = vpack.c.bf16 %v222_v24, %v220_v23  ;;  %v224_v29 = vld [vmem:[%s7349_s2 + $0x40] sm:$0xff]  ;;  %v226_v30 = vld [vmem:[%s7349_s2 + $0x50] sm:$0xff] }
   0x8   :  { %v4099_v28 = vpack.c.bf16 %v227_v26, %v225_v25  ;;  %v229_v31 = vld [vmem:[%s7349_s2 + $0x68] sm:$0xff]  ;;  %v231_v32 = vld [vmem:[%s7349_s2 + $0x78] sm:$0xff]  ;;  %v4101_v33 = vpack.c.bf16 %v226_v30, %v224_v29  ;;  %v228_v35 = vld [vmem:[%s7349_s2 + $0x60] sm:$0xff] }
   0x9   :  { %3966 = vmatmul.mubr.msk.f32.vlgmr.msra.gmra.mrb[0].mxu0 %vm66_vm0, %v35_v8  ;;  %v4103_v34 = vpack.c.bf16 %v231_v32, %v229_v31  ;;  %v230_v36 = vld [vmem:[%s7349_s2 + $0x70] sm:$0xff]  ;;  %v233_v37 = vld [vmem:[%s7349_s2 + $0x88] sm:$0xff]  ;;  %v235_v38 = vld [vmem:[%s7349_s2 + $0x98] sm:$0xff] }
   0xa   :  { %4094 = vmatpush1.bf16.msra.mxu0 %v4093_v21  ;;  %3967 = vmatmul.mubr.msk.f32.vlgmr.msra.gmra.mrb[0].mxu1 %vm66_vm0, %v35_v8  ;;  %v4105_v39 = vpack.c.bf16 %v230_v36, %v228_v35  ;;  %v4107_v40 = vpack.c.bf16 %v235_v38, %v233_v37  ;;  %v232_v41 = vld [vmem:[%s7349_s2 + $0x80] sm:$0xff]  ;;  %v234_v42 = vld [vmem:[%s7349_s2 + $0x90] sm:$0xff]  ;;  %v237_v43 = vld [vmem:[%s7349_s2 + $0xa8] sm:$0xff] }
   0xb   :  { %4096 = vmatprep.subr.bf16.mxu0 %v4095_v22  ;;  %1568 = vmatprep.mubr.f32.mxu1 %v7370_v3  ;;  %v239_v44 = vld [vmem:[%s7349_s2 + $0xb8] sm:$0xff]  ;;  %v4109_v45 = vpack.c.bf16 %v234_v42, %v232_v41  ;;  %v236_v47 = vld [vmem:[%s7349_s2 + $0xa0] sm:$0xff]  ;;  %v238_v48 = vld [vmem:[%s7349_s2 + $0xb0] sm:$0xff] }
   0xc   :  { %v4111_v46 = vpack.c.bf16 %v239_v44, %v237_v43  ;;  %v241_v49 = vld [vmem:[%s7349_s2 + $0xc8] sm:$0xff]  ;;  %v243_v50 = vld [vmem:[%s7349_s2 + $0xd8] sm:$0xff]  ;;  %v4113_v51 = vpack.c.bf16 %v238_v48, %v236_v47  ;;  %v240_v53 = vld [vmem:[%s7349_s2 + $0xc0] sm:$0xff] }
   0xd   :  { %v4115_v52 = vpack.c.bf16 %v243_v50, %v241_v49  ;;  %v242_v54 = vld [vmem:[%s7349_s2 + $0xd0] sm:$0xff]  ;;  %v245_v55 = vld [vmem:[%s7349_s2 + $0xe8] sm:$0xff]  ;;  %v247_v56 = vld [vmem:[%s7349_s2 + $0xf8] sm:$0xff]  ;;  %v7359_v50 = vlaneseq }
   0xe   :  { %4098 = vmatpush1.bf16.msra.mxu0 %v4097_v27  ;;  %v4117_v57 = vpack.c.bf16 %v242_v54, %v240_v53  ;;  %v4119_v58 = vpack.c.bf16 %v247_v56, %v245_v55  ;;  %v244_v59 = vld [vmem:[%s7349_s2 + $0xe0] sm:$0xff]  ;;  %v246_v60 = vld [vmem:[%s7349_s2 + $0xf0] sm:$0xff]  ;;  %v249_v61 = vld [vmem:[%s7349_s2 + $0x108] sm:$0xff] }
   0xf   :  { %4100 = vmatprep.subr.bf16.mxu0 %v4099_v28  ;;  %v251_v62 = vld [vmem:[%s7349_s2 + $0x118] sm:$0xff]  ;;  %v4121_v63 = vpack.c.bf16 %v246_v60, %v244_v59  ;;  %v248_v1 = vld [vmem:[%s7349_s2 + $0x100] sm:$0xff]  ;;  %v250_v2 = vld [vmem:[%s7349_s2 + $0x110] sm:$0xff]  ;;  %vm521_vm1 = vcmp.lt.s32.totalorder %v7359_v50, 144  ;;  %vm537_vm2 = vcmp.ge.s32.totalorder %v7359_v50, 16  ;;  %vm538_vm3 = vcmp.lt.s32.totalorder %v7359_v50, 160 }
  0x10   :  { %v4123_v0 = vpack.c.bf16 %v251_v62, %v249_v61  ;;  %v253_v4 = vld [vmem:[%s7349_s2 + $0x128] sm:$0xff]  ;;  %v255_v5 = vld [vmem:[%s7349_s2 + $0x138] sm:$0xff]  ;;  %v4125_v6 = vpack.c.bf16 %v250_v2, %v248_v1  ;;  %v252_v8 = vld [vmem:[%s7349_s2 + $0x120] sm:$0xff]  ;;  %vm5024_vm5 = vcmp.ge.s32.totalorder %v7359_v50, 32  ;;  %vm5029_vm6 = vcmp.lt.s32.totalorder %v7359_v50, 176 }
  0x11   :  { %v4127_v7 = vpack.c.bf16 %v255_v5, %v253_v4  ;;  %v254_v9 = vld [vmem:[%s7349_s2 + $0x130] sm:$0xff]  ;;  %v257_v10 = vld [vmem:[%s7349_s2 + $0x148] sm:$0xff]  ;;  %v259_v11 = vld [vmem:[%s7349_s2 + $0x158] sm:$0xff]  ;;  %vm5035_vm7 = vcmp.ge.s32.totalorder %v7359_v50, 48  ;;  %vm5040_vm8 = vcmp.lt.s32.totalorder %v7359_v50, 192  ;;  %vm5045_vm10 = vcmp.ge.s32.totalorder %v7359_v50, 64 }
  0x12   :  { %4102 = vmatpush1.bf16.msra.mxu0 %v4101_v33  ;;  %v4129_v12 = vpack.c.bf16 %v254_v9, %v252_v8  ;;  %v4131_v13 = vpack.c.bf16 %v259_v11, %v257_v10  ;;  %v256_v14 = vld [vmem:[%s7349_s2 + $0x140] sm:$0xff]  ;;  %v258_v15 = vld [vmem:[%s7349_s2 + $0x150] sm:$0xff]  ;;  %v261_v16 = vld [vmem:[%s7349_s2 + $0x168] sm:$0xff]  ;;  %vm5050_vm11 = vcmp.lt.s32.totalorder %v7359_v50, 208 }
  0x13   :  { %4104 = vmatprep.subr.bf16.mxu0 %v4103_v34  ;;  %v263_v17 = vld [vmem:[%s7349_s2 + $0x178] sm:$0xff]  ;;  %v4133_v18 = vpack.c.bf16 %v258_v15, %v256_v14  ;;  %v260_v20 = vld [vmem:[%s7349_s2 + $0x160] sm:$0xff]  ;;  %v262_v21 = vld [vmem:[%s7349_s2 + $0x170] sm:$0xff] }
  0x14   :  { %v4135_v19 = vpack.c.bf16 %v263_v17, %v261_v16  ;;  %v265_v22 = vld [vmem:[%s7349_s2 + $0x188] sm:$0xff]  ;;  %v267_v23 = vld [vmem:[%s7349_s2 + $0x198] sm:$0xff]  ;;  %v4137_v24 = vpack.c.bf16 %v262_v21, %v260_v20  ;;  %v264_v26 = vld [vmem:[%s7349_s2 + $0x180] sm:$0xff] }
  0x15   :  { %v4139_v25 = vpack.c.bf16 %v267_v23, %v265_v22  ;;  %v266_v27 = vld [vmem:[%s7349_s2 + $0x190] sm:$0xff]  ;;  %v269_v28 = vld [vmem:[%s7349_s2 + $0x1a8] sm:$0xff]  ;;  %v271_v29 = vld [vmem:[%s7349_s2 + $0x1b8] sm:$0xff] }
  0x16   :  { %4106 = vmatpush1.bf16.msra.mxu0 %v4105_v39  ;;  %v4141_v30 = vpack.c.bf16 %v266_v27, %v264_v26  ;;  %v4143_v31 = vpack.c.bf16 %v271_v29, %v269_v28  ;;  %v268_v32 = vld [vmem:[%s7349_s2 + $0x1a0] sm:$0xff]  ;;  %v270_v33 = vld [vmem:[%s7349_s2 + $0x1b0] sm:$0xff]  ;;  %v273_v34 = vld [vmem:[%s7349_s2 + $0x1c8] sm:$0xff] }
  0x17   :  { %4108 = vmatprep.subr.bf16.mxu0 %v4107_v40  ;;  %v275_v35 = vld [vmem:[%s7349_s2 + $0x1d8] sm:$0xff]  ;;  %v4145_v36 = vpack.c.bf16 %v270_v33, %v268_v32  ;;  %v272_v38 = vld [vmem:[%s7349_s2 + $0x1c0] sm:$0xff]  ;;  %v274_v39 = vld [vmem:[%s7349_s2 + $0x1d0] sm:$0xff] }
  0x18   :  { %v4147_v37 = vpack.c.bf16 %v275_v35, %v273_v34  ;;  %v4149_v40 = vpack.c.bf16 %v274_v39, %v272_v38  ;;  %v277_v41 = vld [vmem:[%s7349_s2 + $0x1e8] sm:$0xff]  ;;  %v279_v42 = vld [vmem:[%s7349_s2 + $0x1f8] sm:$0xff]  ;;  %v276_v44 = vld [vmem:[%s7349_s2 + $0x1e0] sm:$0xff] }
  0x19   :  { %v4151_v43 = vpack.c.bf16 %v279_v42, %v277_v41  ;;  %v281_v47 = vld [vmem:[%s7349_s2 + $0x208] sm:$0xff]  ;;  %v283_v48 = vld [vmem:[%s7349_s2 + $0x218] sm:$0xff]  ;;  %v280_v62 = vld [vmem:[%s7349_s2 + $0x200] sm:$0xff] }
  0x1a   :  { %4110 = vmatpush1.bf16.msra.mxu0 %v4109_v45  ;;  %v278_v45 = vld [vmem:[%s7349_s2 + $0x1f0] sm:$0xff]  ;;  %v4155_v49 = vpack.c.bf16 %v283_v48, %v281_v47  ;;  %v4759_v53 = vld [vmem:[%s7350_s4] ss:$4 sm:$0xf]  ;;  %v287_v2 = vld [vmem:[%s7349_s2 + $0x238] sm:$0xff] }
  0x1b   :  { %4112 = vmatprep.subr.bf16.mxu0 %v4111_v46  ;;  %v4153_v46 = vpack.c.bf16 %v278_v45, %v276_v44  ;;  %v285_v1 = vld [vmem:[%s7349_s2 + $0x228] sm:$0xff]  ;;  %v284_v11 = vld [vmem:[%s7349_s2 + $0x220] sm:$0xff]  ;;  %v291_v14 = vld [vmem:[%s7349_s2 + $0x258] sm:$0xff] }
  0x1c   :  { %v4159_v10 = vpack.c.bf16 %v287_v2, %v285_v1  ;;  %v293_v20 = vld [vmem:[%s7349_s2 + $0x268] sm:$0xff]  ;;  %v295_v21 = vld [vmem:[%s7349_s2 + $0x278] sm:$0xff]  ;;  %v304_v42 = vld [vmem:[%s7349_s2 + $0x2c0] sm:$0xff] }
  0x1d   :  { %v4167_v23 = vpack.c.bf16 %v295_v21, %v293_v20  ;;  %v297_v26 = vld [vmem:[%s7349_s2 + $0x288] sm:$0xff]  ;;  %v299_v27 = vld [vmem:[%s7349_s2 + $0x298] sm:$0xff]  ;;  %v308_v48 = vld [vmem:[%s7349_s2 + $0x2e0] sm:$0xff] }
  0x1e   :  { %4114 = vmatpush1.bf16.msra.mxu0 %v4113_v51  ;;  %v4751_v51 = vshrl.u32 %v7359_v50, 7  ;;  %v4171_v29 = vpack.c.bf16 %v299_v27, %v297_v26  ;;  %v301_v32 = vld [vmem:[%s7349_s2 + $0x2a8] sm:$0xff]  ;;  %v303_v33 = vld [vmem:[%s7349_s2 + $0x2b8] sm:$0xff]  ;;  %v316_v2 = vld [vmem:[%s7349_s2 + $0x320] sm:$0xff] }
  0x1f   :  { %4116 = vmatprep.subr.bf16.mxu0 %v4115_v52  ;;  %v4175_v35 = vpack.c.bf16 %v303_v33, %v301_v32  ;;  %v305_v38 = vld [vmem:[%s7349_s2 + $0x2c8] sm:$0xff]  ;;  %v307_v39 = vld [vmem:[%s7349_s2 + $0x2d8] sm:$0xff]  ;;  %vm539_vm4 = vmand %vm537_vm2, %vm538_vm3  ;;  %vm5068_vm2 = vcmp.lt.s32.totalorder %v7359_v50, 224 }
  0x20   :  { %v4754_v52 = vsub.s32 0, %v4751_v51  ;;  %v4762_v54 = vsub.s32 1, %v4751_v51  ;;  %v4765_v55 = vsub.s32 3, %v4751_v51  ;;  %v4179_v41 = vpack.c.bf16 %v307_v39, %v305_v38  ;;  %v309_v44 = vld [vmem:[%s7349_s2 + $0x2e8] sm:$0xff]  ;;  %v311_v45 = vld [vmem:[%s7349_s2 + $0x2f8] sm:$0xff]  ;;  %vm550_vm13 = vmand %vm5024_vm5, %vm5029_vm6 }
  0x21   :  { %v4183_v47 = vpack.c.bf16 %v311_v45, %v309_v44  ;;  %v4944_v33 = vsub.s32 2, %v4751_v51  ;;  %v343_v38 = vld [vmem:[%s7349_s2 + $0x3f8] sm:$0xff]  ;;  %vm561_vm15 = vmand %vm5035_vm7, %vm5040_vm8  ;;  %vm5083_vm5 = vcmp.lt.s32.totalorder %v7359_v50, 240  ;;  %vm599_vm6 = vcmask 654336  }
  0x22   :  { %4118 = vmatpush1.bf16.msra.mxu0 %v4117_v57  ;;  %7443 = vst [vmem:[#allocation3_spill] sm:$0xff] %v4754_v52  ;;  %7444 = vst [vmem:[#allocation4_spill] sm:$0xff] %v4762_v54  ;;  %v49_v56 = vrot.slane %v4759_v53, %v4754_v52  ;;  %v53_v57 = vrot.slane %v4759_v53, %v4762_v54  ;;  %v61_v59 = vrot.slane %v4759_v53, %v4765_v55  ;;  %vm610_vm7 = vcmask 785408  }
  0x23   :  { %4120 = vmatprep.subr.bf16.mxu0 %v4119_v58  ;;  %vm586_vm3 = vmand %vm5045_vm10, %vm5050_vm11  ;;  %vm624_vm11 = vcmp.ge.s32.totalorder %v7359_v50, 112 }
  0x26   :  { %4122 = vmatpush1.bf16.msra.mxu0 %v4121_v63  ;;  %v282_v63 = vld [vmem:[%s7349_s2 + $0x210] sm:$0xff] }
  0x27   :  { %4124 = vmatprep.subr.bf16.mxu0 %v4123_v0 }
  0x2a   :  { %4126 = vmatpush1.bf16.msra.mxu0 %v4125_v6 }
  0x2b   :  { %4128 = vmatprep.subr.bf16.mxu0 %v4127_v7  ;;  %v4157_v7 = vpack.c.bf16 %v282_v63, %v280_v62  ;;  %v317_v62 = vld [vmem:[%s7349_s2 + $0x328] sm:$0xff]  ;;  %v319_v63 = vld [vmem:[%s7349_s2 + $0x338] sm:$0xff] }
  0x2c   :  { %v4191_v1 = vpack.c.bf16 %v319_v63, %v317_v62 }
  0x2e   :  { %4130 = vmatpush1.bf16.msra.mxu0 %v4129_v12  ;;  %v286_v12 = vld [vmem:[%s7349_s2 + $0x230] sm:$0xff] }
  0x2f   :  { %4132 = vmatprep.subr.bf16.mxu0 %v4131_v13  ;;  %v289_v13 = vld [vmem:[%s7349_s2 + $0x248] sm:$0xff]  ;;  %v4161_v16 = vpack.c.bf16 %v286_v12, %v284_v11  ;;  %v322_v11 = vld [vmem:[%s7349_s2 + $0x350] sm:$0xff] }
  0x30   :  { %v4163_v17 = vpack.c.bf16 %v291_v14, %v289_v13  ;;  %v325_v12 = vld [vmem:[%s7349_s2 + $0x368] sm:$0xff]  ;;  %v327_v13 = vld [vmem:[%s7349_s2 + $0x378] sm:$0xff] }
  0x32   :  { %4134 = vmatpush1.bf16.msra.mxu0 %v4133_v18  ;;  %v288_v18 = vld [vmem:[%s7349_s2 + $0x240] sm:$0xff] }
  0x33   :  { %4136 = vmatprep.subr.bf16.mxu0 %v4135_v19  ;;  %v290_v19 = vld [vmem:[%s7349_s2 + $0x250] sm:$0xff] }
  0x34   :  { %v4165_v22 = vpack.c.bf16 %v290_v19, %v288_v18  ;;  %v329_v18 = vld [vmem:[%s7349_s2 + $0x388] sm:$0xff]  ;;  %v331_v19 = vld [vmem:[%s7349_s2 + $0x398] sm:$0xff] }
  0x35   :  { %v4203_v21 = vpack.c.bf16 %v331_v19, %v329_v18  ;;  %v4997_v19 = vld [vmem:[%s7352_s5] sm:$0xff] }
  0x36   :  { %4138 = vmatpush1.bf16.msra.mxu0 %v4137_v24  ;;  %v292_v24 = vld [vmem:[%s7349_s2 + $0x260] sm:$0xff] }
  0x37   :  { %4140 = vmatprep.subr.bf16.mxu0 %v4139_v25  ;;  %v294_v25 = vld [vmem:[%s7349_s2 + $0x270] sm:$0xff] }
  0x38   :  { %v4169_v28 = vpack.c.bf16 %v294_v25, %v292_v24  ;;  %v333_v24 = vld [vmem:[%s7349_s2 + $0x3a8] sm:$0xff]  ;;  %v335_v25 = vld [vmem:[%s7349_s2 + $0x3b8] sm:$0xff] }
  0x39   :  { %v4207_v27 = vpack.c.bf16 %v335_v25, %v333_v24  ;;  %v7364_v24 = vmov 4  }
  0x3a   :  { %4142 = vmatpush1.bf16.msra.mxu0 %v4141_v30  ;;  %v296_v30 = vld [vmem:[%s7349_s2 + $0x280] sm:$0xff] }
  0x3b   :  { %4144 = vmatprep.subr.bf16.mxu0 %v4143_v31  ;;  %v298_v31 = vld [vmem:[%s7349_s2 + $0x290] sm:$0xff] }
  0x3c   :  { %v4173_v34 = vpack.c.bf16 %v298_v31, %v296_v30  ;;  %v337_v30 = vld [vmem:[%s7349_s2 + $0x3c8] sm:$0xff]  ;;  %v339_v31 = vld [vmem:[%s7349_s2 + $0x3d8] sm:$0xff] }
  0x3e   :  { %4146 = vmatpush1.bf16.msra.mxu0 %v4145_v36  ;;  %v300_v36 = vld [vmem:[%s7349_s2 + $0x2a0] sm:$0xff] }
  0x3f   :  { %4148 = vmatprep.subr.bf16.mxu0 %v4147_v37  ;;  %v302_v37 = vld [vmem:[%s7349_s2 + $0x2b0] sm:$0xff] }
  0x42   :  { %4150 = vmatpush1.bf16.msra.mxu0 %v4149_v40  ;;  %v4177_v40 = vpack.c.bf16 %v302_v37, %v300_v36  ;;  %v338_v36 = vld [vmem:[%s7349_s2 + $0x3d0] sm:$0xff]  ;;  %v341_v37 = vld [vmem:[%s7349_s2 + $0x3e8] sm:$0xff] }
  0x43   :  { %4152 = vmatprep.subr.bf16.mxu0 %v4151_v43  ;;  %v306_v43 = vld [vmem:[%s7349_s2 + $0x2d0] sm:$0xff] }
  0x46   :  { %4154 = vmatpush1.bf16.msra.mxu0 %v4153_v46  ;;  %v4181_v46 = vpack.c.bf16 %v306_v43, %v304_v42  ;;  %v340_v42 = vld [vmem:[%s7349_s2 + $0x3e0] sm:$0xff]  ;;  %v342_v43 = vld [vmem:[%s7349_s2 + $0x3f0] sm:$0xff] }
  0x47   :  { %4156 = vmatprep.subr.bf16.mxu0 %v4155_v49  ;;  %v310_v49 = vld [vmem:[%s7349_s2 + $0x2f0] sm:$0xff]  ;;  %v4217_v44 = vpack.c.bf16 %v342_v43, %v340_v42 }
  0xdc   :  { %v136_v58 = vpop.f32.mrb[0].mxu0 }
  0xdd   :  { %v137_v60 = vadd.f32 %v136_v58, %v49_v56  ;;  %v138_v61 = vpop.f32.mrb[1].mxu0  ;;  %v4785_v4 = vpop.f32.mrb[0].mxu1  ;;  %v313_v56 = vld [vmem:[%s7349_s2 + $0x308] sm:$0xff]  ;;  %v4185_v58 = vpack.c.bf16 %v310_v49, %v308_v48  ;;  %v3968_v48 = vld [vmem:[%s7350_s4 + $0x1] ss:$4 sm:$0x3] }
  0xde   :  { %v139_v0 = vadd.f32 %v138_v61, %v53_v57  ;;  %v209_v5 = vpop.f32.mrb[1].mxu1  ;;  %v315_v57 = vld [vmem:[%s7349_s2 + $0x318] sm:$0xff]  ;;  %v314_v61 = vld [vmem:[%s7349_s2 + $0x310] sm:$0xff]  ;;  %v4450_v49 = vmov 1966171168  }
  0xdf   :  { %v210_v8 = vadd.f32 %v209_v5, %v61_v59  ;;  %v212_v9 = vmax.f32 %v137_v60, 0.0  ;;  %v4187_v59 = vpack.c.bf16 %v315_v57, %v313_v56  ;;  %v312_v60 = vld [vmem:[%s7349_s2 + $0x300] sm:$0xff]  ;;  %v318_v5 = vld [vmem:[%s7349_s2 + $0x330] sm:$0xff]  ;;  %v505_v56 = vunpack.c.l.s4 %v4450_v49 }
  0xe0   :  { %v213_v6 = vmax.f32 %v139_v0, 0.0  ;;  %v4189_v0 = vpack.c.bf16 %v314_v61, %v312_v60  ;;  %v354_v57 = vrot.slane %v3968_v48, %v4762_v54 }
  0xe1   :  { %v215_v15 = vmax.f32 %v210_v8, 0.0  ;;  %v4193_v8 = vpack.c.bf16 %v318_v5, %v316_v2 }
  0xe2   :  { %421 = vmatprep.mubr.f32.mxu0 %v213_v6  ;;  %v321_v6 = vld [vmem:[%s7349_s2 + $0x348] sm:$0xff] }
  0xe3   :  { %422 = vmatmul.mubr.f32.vlgmr.msra.gmra.mrb[2].mxu0 %v212_v9 }
  0xe4   :  { %4158 = vmatpush1.bf16.msra.mxu0 %v4157_v7  ;;  %492 = vmatprep.mubr.f32.mxu0 %v215_v15  ;;  %v323_v7 = vld [vmem:[%s7349_s2 + $0x358] sm:$0xff]  ;;  %v4199_v15 = vpack.c.bf16 %v327_v13, %v325_v12 }
  0xe5   :  { %4160 = vmatprep.subr.bf16.mxu0 %v4159_v10  ;;  %v4195_v9 = vpack.c.bf16 %v323_v7, %v321_v6  ;;  %v320_v10 = vld [vmem:[%s7349_s2 + $0x340] sm:$0xff] }
  0xe6   :  { %v4197_v14 = vpack.c.bf16 %v322_v11, %v320_v10 }
  0xe8   :  { %4162 = vmatpush1.bf16.msra.mxu0 %v4161_v16  ;;  %v324_v16 = vld [vmem:[%s7349_s2 + $0x360] sm:$0xff] }
  0xe9   :  { %4164 = vmatprep.subr.bf16.mxu0 %v4163_v17  ;;  %v326_v17 = vld [vmem:[%s7349_s2 + $0x370] sm:$0xff] }
  0xea   :  { %v4201_v20 = vpack.c.bf16 %v326_v17, %v324_v16  ;;  %v630_v17 = vld [vmem:[%s7351_s9] sm:$0x1] }
  0xec   :  { %4166 = vmatpush1.bf16.msra.mxu0 %v4165_v22  ;;  %v328_v22 = vld [vmem:[%s7349_s2 + $0x380] sm:$0xff] }
  0xed   :  { %4168 = vmatprep.subr.bf16.mxu0 %v4167_v23  ;;  %v330_v23 = vld [vmem:[%s7349_s2 + $0x390] sm:$0xff] }
  0xee   :  { %v4205_v26 = vpack.c.bf16 %v330_v23, %v328_v22  ;;  %v7362_v22 = vmov 3   ;;  %v7360_v23 = vmov 5  }
  0xf0   :  { %4170 = vmatpush1.bf16.msra.mxu0 %v4169_v28  ;;  %v332_v28 = vld [vmem:[%s7349_s2 + $0x3a0] sm:$0xff] }
  0xf1   :  { %4172 = vmatprep.subr.bf16.mxu0 %v4171_v29  ;;  %v334_v29 = vld [vmem:[%s7349_s2 + $0x3b0] sm:$0xff] }
  0xf2   :  { %v4209_v32 = vpack.c.bf16 %v334_v29, %v332_v28 }
  0xf4   :  { %4174 = vmatpush1.bf16.msra.mxu0 %v4173_v34  ;;  %v4211_v34 = vpack.c.bf16 %v339_v31, %v337_v30 }
  0xf5   :  { %4176 = vmatprep.subr.bf16.mxu0 %v4175_v35  ;;  %v336_v35 = vld [vmem:[%s7349_s2 + $0x3c0] sm:$0xff]  ;;  %s4451_s2 = smov 64  }
  0xf6   :  { %v4213_v39 = vpack.c.bf16 %v338_v36, %v336_v35 }
  0xf8   :  { %4178 = vmatpush1.bf16.msra.mxu0 %v4177_v40  ;;  %v57_v40 = vrot.slane %v4759_v53, %v4944_v33  ;;  %v4448_v53 = vmov 0  }
  0xf9   :  { %4180 = vmatprep.subr.bf16.mxu0 %v4179_v41  ;;  %v4215_v41 = vpack.c.bf16 %v343_v38, %v341_v37  ;;  %4409 = vset.pattern.permute.xlu1 %v4448_v53  ;;  %v5204_v37 = vand.u32 127, %v7359_v50  ;;  %v5209_v38 = vld [vmem:[%s7353_s8] ss:$2 sm:$0xff] }
  0xfa   :  { %v208_v45 = vadd.f32 %v4785_v4, %v57_v40  ;;  %v350_v4 = vrot.slane %v3968_v48, %v4754_v52  ;;  %v5220_v42 = vrot.slane %v5209_v38, %v4754_v52 }
  0xfc   :  { %4182 = vmatpush1.bf16.msra.mxu0 %v4181_v46  ;;  %v214_v46 = vmax.f32 %v208_v45, 0.0  ;;  %7466 = vst [vmem:[#allocation6_spill] sm:$0xff] %v5220_v42  ;;  %v5231_v45 = vld [vmem:[%s7353_s8 + $0x1] ss:$2 sm:$0xff] }
  0xfd   :  { %4184 = vmatprep.subr.bf16.mxu0 %v4183_v47  ;;  %v7368_v47 = vmov 1  }
  0xfe   :  { %4410 = vset.pattern.permute.xlu0 %v7368_v47 }
 0x100   :  { %4186 = vmatpush1.bf16.msra.mxu0 %v4185_v58 }
 0x101   :  { %4188 = vmatprep.subr.bf16.mxu0 %v4187_v59  ;;  %v506_v59 = vunpack.c.0.s8 %v505_v56 }
 0x104   :  { %4190 = vmatpush1.bf16.msra.mxu0 %v4189_v0 }
 0x105   :  { %4192 = vmatprep.subr.bf16.mxu0 %v4191_v1  ;;  %v4976_v1 = vsub.s32 %v506_v59, %v4751_v51 }
 0x107   :  { %7445 = vst [vmem:[#allocation5_spill] sm:$0xff] %v4976_v1 }
 0x108   :  { %4194 = vmatpush1.bf16.msra.mxu0 %v4193_v8 }
 0x109   :  { %4196 = vmatprep.subr.bf16.mxu0 %v4195_v9 }
 0x10c   :  { %4198 = vmatpush1.bf16.msra.mxu0 %v4197_v14 }
 0x10d   :  { %4200 = vmatprep.subr.bf16.mxu0 %v4199_v15 }
 0x110   :  { %4202 = vmatpush1.bf16.msra.mxu0 %v4201_v20  ;;  %v5004_v20 = vld [vmem:[%s7352_s5 + $0x8] sm:$0xff]  ;;  %s4462_s5 = smov 1  }
 0x111   :  { %4204 = vmatprep.subr.bf16.mxu0 %v4203_v21  ;;  %v7366_v21 = vmov 2  }
 0x114   :  { %4206 = vmatpush1.bf16.msra.mxu0 %v4205_v26 }
 0x115   :  { %4208 = vmatprep.subr.bf16.mxu0 %v4207_v27 }
 0x118   :  { %4210 = vmatpush1.bf16.msra.mxu0 %v4209_v32 }
 0x119   :  { %4212 = vmatprep.subr.bf16.mxu0 %v4211_v34 }
 0x11c   :  { %4214 = vmatpush1.bf16.msra.mxu0 %v4213_v39 }
 0x11d   :  { %4216 = vmatprep.subr.bf16.mxu0 %v4215_v41 }
 0x120   :  { %4218 = vmatpush1.bf16.msra.mxu0 %v4217_v44 }
 0x123   :  { %493 = vmatmul.mubr.f32.vlgmr.msra.gmra.mrb[2].mxu0 %v214_v46 }
 0x124   :  { %1390 = vmatprep.mubr.f32.mxu0 %v7370_v3 }
 0x1f6   :  { %v494_v58 = vpop.f32.mrb[2].mxu0 }
 0x1f7   :  { %v4315_v60 = vadd.f32 %v494_v58, %v350_v4  ;;  %v496_v61 = vpop.f32.mrb[3].mxu0 }
 0x1f8   :  { %v4316_v62 = vadd.f32 %v496_v61, %v354_v57 }
 0x1f9   :  { %v499_v63 = vmax.f32 %v4315_v60, 0.0 }
 0x1fa   :  { %v500_v0 = vmax.f32 %v4316_v62, 0.0 }
 0x1fc   :  { %v503_v2 = vcombine.low %v499_v63, %v500_v0  ;;  %v563_v5 = vcombine.high %v499_v63, %v500_v0 }
 0x1fe   :  { %v510_v6 = vrot.slane %v503_v2, %v4976_v1  ;;  %v570_v7 = vrot.slane %v563_v5, %v4976_v1 }
 0x200   :  { %v577_v8 = vrot.slane %v570_v7, %v4976_v1  ;;  %v524_v9 = vcombine.high %v510_v6, %v510_v6  ;;  %v517_v10 = vrot.slane %v510_v6, %v4976_v1  ;;  %v588_v13 = vcombine.high %v570_v7, %v570_v7 }
 0x202   :  { %578 = vrot.lane.b32.xlu1 %v577_v8, %s4451_s2  ;;  %v531_v11 = vrot.slane %v524_v9, %v4976_v1  ;;  %523 = vst.msk [vmem:[#allocation2] sm:$0x3] %vm521_vm1, %v517_v10  ;;  %v541_v14 = vcombine.high %v517_v10, %v517_v10  ;;  %v606_v15 = vcombine.high %v577_v8, %v577_v8  ;;  %vm5063_vm1 = vcmp.ge.s32.totalorder %v7359_v50, 80 }
 0x203   :  { %v595_v16 = vrot.slane %v588_v13, %v4976_v1  ;;  %vm604_vm8 = vmand %vm5063_vm1, %vm5068_vm2  ;;  %vm810_vm1 = vcmp.lt.s32.totalorder %v5204_v37, 127 }
 0x204   :  { %532 = vrot.lane.b32.xlu0 %v531_v11, %s4452_s27  ;;  %v552_v12 = vcombine.high %v531_v11, %v531_v11 }
 0x205   :  { %v617_v18 = vcombine.high %v595_v16, %v595_v16 }
 0x206   :  { %553 = vrot.lane.b32.xlu1 %v552_v12, %s4453_s28 }
 0x208   :  { %542 = vrot.lane.b32.xlu0 %v541_v14, %s4454_s29  ;;  %v5111_v14 = vsub.s32 7, %v4751_v51 }
 0x20a   :  { %607 = vrot.lane.b32.xlu1 %v606_v15, %s4455_s30 }
 0x20c   :  { %596 = vrot.lane.b32.xlu0 %v595_v16, %s4456_s0 }
 0x20e   :  { %633 = vperm.xlu1 %4409, %v630_v17  }
 0x210   :  { %618 = vrot.lane.b32.xlu0 %v617_v18, %s4457_s15 }
 0x212   :  { %880 = vperm.xlu1 %4409, %v4997_v19  }
 0x214   :  { %643 = vperm.xlu0 %4410, %v630_v17  }
 0x216   :  { %885 = vperm.xlu1 %4409, %v5004_v20  }
 0x218   :  { %943 = vperm.xlu0 %4410, %v4997_v19  }
 0x21a   :  { %4411 = vset.pattern.permute.xlu1 %v7368_v47 }
 0x21b   :  { %947 = vperm.xlu1 %4411, %v5004_v20  }
 0x21c   :  { %4413 = vset.pattern.permute.xlu0 %v7366_v21 }
 0x21d   :  { %991 = vperm.xlu0 %4413, %v5004_v20  }
 0x21f   :  { %4412 = vset.pattern.permute.xlu1 %v7366_v21 }
 0x220   :  { %987 = vperm.xlu1 %4412, %v4997_v19  }
 0x221   :  { %4415 = vset.pattern.permute.xlu0 %v7362_v22 }
 0x222   :  { %1071 = vperm.xlu0 %4415, %v5004_v20  }
 0x224   :  { %4414 = vset.pattern.permute.xlu1 %v7362_v22 }
 0x225   :  { %1067 = vperm.xlu1 %4414, %v4997_v19  }
 0x226   :  { %4417 = vset.pattern.permute.xlu0 %v7360_v23 }
 0x229   :  { %4416 = vset.pattern.permute.xlu1 %v7364_v24 }
 0x22a   :  { %1111 = vperm.xlu1 %4416, %v4997_v19  }
 0x274   :  { %v579_v25 = vpop.permute.xlu1 %578 }
 0x275   :  { %v580_v39 = vrot.slane %v579_v25, 7 }
 0x276   :  { %v533_v26 = vpop.permute.xlu0 %532 }
 0x277   :  { %v534_v27 = vrot.slane %v533_v26, 7  ;;  %v582_v4 = vsel %vm581_vm14, %v580_v39, %v579_v25  ;;  %v5144_v25 = vsub.s32 4, %v4751_v51 }
 0x278   :  { %v554_v28 = vpop.permute.xlu1 %553 }
 0x279   :  { %v535_v31 = vsel %vm66_vm0, %v534_v27, %v533_v26  ;;  %v555_v35 = vrot.slane %v554_v28, 7 }
 0x27a   :  { %540 = vst.msk [vmem:[#allocation2 + $0x1] sm:$0x3] %vm539_vm4, %v535_v31  ;;  %v543_v36 = vpop.permute.xlu0 %542  ;;  %vm5078_vm4 = vcmp.ge.s32.totalorder %v7359_v50, 96 }
 0x27b   :  { %v544_v40 = vrot.slane %v543_v36, 7  ;;  %v557_v48 = vsel %vm556_vm12, %v555_v35, %v554_v28  ;;  %vm615_vm10 = vmand %vm5078_vm4, %vm5083_vm5  ;;  %v5165_v28 = vsub.s32 6, %v4751_v51  ;;  %vm3782_vm4 = vcmask 1041408  }
 0x27c   :  { %v608_v41 = vpop.permute.xlu1 %607  ;;  %vm3785_vm5 = vcmask 1042432  }
 0x27d   :  { %v546_v44 = vsel %vm7358_vm9, %v544_v40, %v543_v36  ;;  %v609_v49 = vrot.slane %v608_v41, 7 }
 0x27e   :  { %551 = vst.msk [vmem:[#allocation2 + $0x2] sm:$0x3] %vm550_vm13, %v546_v44  ;;  %v597_v56 = vpop.permute.xlu0 %596  ;;  %vm625_vm13 = vcmp.lt.s32.totalorder %v7359_v50, 256  ;;  %v3969_v44 = vld [vmem:[%s7353_s8 + $0x10] ss:$2 sm:$0x1] }
 0x27f   :  { %562 = vst.msk [vmem:[#allocation2 + $0x3] sm:$0x3] %vm561_vm15, %v557_v48  ;;  %v598_v57 = vrot.slane %v597_v56, 7  ;;  %v611_v59 = vsel %vm610_vm7, %v609_v49, %v608_v41  ;;  %vm621_vm15 = vcmask 916480   ;;  %vm626_vm9 = vmand %vm624_vm11, %vm625_vm13  ;;  %v5216_v41 = vrot.slane %v5209_v38, %v4762_v54 }
 0x280   :  { %587 = vst.msk [vmem:[#allocation2 + $0x4] sm:$0x3] %vm586_vm3, %v582_v4  ;;  %v5239_v4 = vrot.slane %v3969_v44, %v4754_v52  ;;  %vm3779_vm3 = vcmask 1040384   ;;  %vm3794_vm11 = vcmask 1045504   ;;  %vm3797_vm13 = vcmask 1046528  }
 0x281   :  { %v600_v58 = vsel %vm599_vm6, %v598_v57, %v597_v56 }
 0x282   :  { %605 = vst.msk [vmem:[#allocation2 + $0x5] sm:$0x3] %vm604_vm8, %v600_v58  ;;  %v619_v60 = vpop.permute.xlu0 %618  ;;  %7467 = vst [vmem:[#allocation7_spill] sm:$0xff] %v5239_v4  ;;  %vm3788_vm8 = vcmask 1043456  }
 0x283   :  { %616 = vst.msk [vmem:[#allocation2 + $0x6] sm:$0x3] %vm615_vm10, %v611_v59  ;;  %v620_v61 = vrot.slane %v619_v60, 7  ;;  %v5248_v59 = vrot.slane %v5231_v45, %v4754_v52  ;;  %vm3791_vm10 = vcmask 1044480  }
 0x285   :  { %v622_v62 = vsel %vm621_vm15, %v620_v61, %v619_v60  ;;  %7468 = vst [vmem:[#allocation8_spill] sm:$0xff] %v5248_v59  ;;  %v3971_v60 = vld [vmem:[%s7353_s8 + $0x11] ss:$2 sm:$0x1] }
 0x286   :  { %627 = vst.msk [vmem:[#allocation2 + $0x7] sm:$0x3] %vm626_vm9, %v622_v62  ;;  %vm726_vm9 = vcmp.lt.s32.totalorder %v5204_v37, 1 }
 0x28d   :  { %v634_v63 = vpop.permute.xlu1 %633  ;;  %v628_v2 = vld [vmem:[#allocation2] sm:$0xff]  ;;  %v629_v8 = vld [vmem:[#allocation2 + $0x8] sm:$0x1] }
 0x28e   :  { %v639_v0 = vrot.slane %v634_v63, %v4754_v52 }
 0x290   :  { %v640_v6 = vmul.f32 %v639_v0, %v628_v2  ;;  %v641_v9 = vmul.f32 %v639_v0, %v629_v8 }
 0x293   :  { %v644_v5 = vpop.permute.xlu0 %643 }
 0x294   :  { %v649_v7 = vrot.slane %v644_v5, %v4754_v52 }
 0x296   :  { %v650_v10 = vadd.f32 %v649_v7, %v640_v6  ;;  %v651_v11 = vadd.f32 %v649_v7, %v641_v9  ;;  %v5260_v6 = vrot.slane %v5231_v45, %v4762_v54  ;;  %v5263_v7 = vrot.slane %v3971_v60, %v4754_v52 }
 0x297   :  { %v5193_v31 = vpop.permute.xlu0 %943 }
 0x298   :  { %v5105_v12 = vrot.slane %v650_v10, %v4762_v54  ;;  %v5108_v13 = vrot.slane %v650_v10, %v4754_v52  ;;  %v5118_v15 = vrot.slane %v651_v11, %v4754_v52  ;;  %v5121_v16 = vrot.slane %v650_v10, %v5111_v14  ;;  %7469 = vst [vmem:[#allocation9_spill] sm:$0xff] %v5260_v6 }
 0x299   :  { %v5132_v17 = vrot.slane %v650_v10, %v4944_v33  ;;  %v5141_v18 = vrot.slane %v650_v10, %v4765_v55  ;;  %v5152_v26 = vrot.slane %v650_v10, %v5144_v25  ;;  %7470 = vst [vmem:[#allocation10_spill] sm:$0xff] %v5263_v7 }
 0x29a   :  { %708 = vrot.lane.b32.xlu1 %v5105_v12, %s4462_s5  ;;  %706 = vrot.lane.b32.xlu0 %v5108_v13, %s4462_s5 }
 0x29c   :  { %v5197_v34 = vpop.permute.xlu0 %991 }
 0x29e   :  { %720 = vrot.lane.b32.xlu1 %v5121_v16, %s4462_s5  ;;  %722 = vrot.lane.b32.xlu0 %v5118_v15, %s4462_s5 }
 0x2a1   :  { %v5201_v36 = vpop.permute.xlu0 %1071 }
 0x2a2   :  { %792 = vrot.lane.b32.xlu1 %v5108_v13, %s4463_s17  ;;  %794 = vrot.lane.b32.xlu0 %v5105_v12, %s4463_s17 }
 0x2a6   :  { %796 = vrot.lane.b32.xlu1 %v5132_v17, %s4463_s17  ;;  %808 = vrot.lane.b32.xlu0 %v5118_v15, %s4463_s17 }
 0x2aa   :  { %1115 = vperm.xlu1 %4416, %v5004_v20   ;;  %1137 = vperm.xlu0 %4417, %v4997_v19   ;;  %v5155_v19 = vsub.s32 5, %v4751_v51  ;;  %v5185_v51 = vpop.permute.xlu1 %880 }
 0x2ac   :  { %v5162_v27 = vrot.slane %v650_v10, %v5155_v19 }
 0x2ae   :  { %4418 = vset.pattern.permute.xlu1 %v7360_v23  ;;  %712 = vrot.lane.b32.xlu0 %v5141_v18, %s4462_s5 }
 0x2af   :  { %1141 = vperm.xlu1 %4418, %v5004_v20   ;;  %4420 = vset.pattern.permute.xlu0 %v4448_v53  ;;  %v5173_v20 = vrot.slane %v650_v10, %v5165_v28 }
 0x2b2   :  { %800 = vrot.lane.b32.xlu0 %v5152_v26, %s4463_s17 }
 0x2b3   :  { %710 = vrot.lane.b32.xlu1 %v5132_v17, %s4462_s5 }
 0x2b4   :  { %4419 = vset.pattern.permute.xlu1 %v4448_v53  ;;  %v5187_v53 = vpop.permute.xlu1 %885 }
 0x2b6   :  { %716 = vrot.lane.b32.xlu0 %v5162_v27, %s4462_s5 }
 0x2b7   :  { %798 = vrot.lane.b32.xlu1 %v5141_v18, %s4463_s17 }
 0x2b8   :  { %v5189_v29 = vpop.permute.xlu1 %947 }
 0x2ba   :  { %804 = vrot.lane.b32.xlu0 %v5173_v20, %s4463_s17 }
 0x2bb   :  { %714 = vrot.lane.b32.xlu1 %v5152_v26, %s4462_s5 }
 0x2bc   :  { %v5191_v30 = vpop.permute.xlu1 %987 }
 0x2be   :  { %806 = vrot.lane.b32.xlu0 %v5121_v16, %s4463_s17 }
 0x2bf   :  { %802 = vrot.lane.b32.xlu1 %v5162_v27, %s4463_s17 }
 0x2c0   :  { %v5195_v32 = vpop.permute.xlu1 %1067 }
 0x2c3   :  { %718 = vrot.lane.b32.xlu1 %v5173_v20, %s4462_s5 }
 0x2c4   :  { %v5199_v35 = vpop.permute.xlu1 %1111 }
 0x30c   :  { %v5211_v39 = vpop.permute.xlu1 %708  ;;  %v707_v40 = vpop.permute.xlu0 %706 }
 0x30d   :  { %v734_v43 = vsel %vm726_vm9, %v707_v40, %v5211_v39 }
 0x30e   :  { %v784_v56 = vmul.f32 %v5216_v41, %v734_v43 }
 0x310   :  { %v5233_v46 = vpop.permute.xlu1 %720  ;;  %v723_v48 = vpop.permute.xlu0 %722  ;;  %v895_v2 = vrot.slane %v784_v56, %v4754_v52 }
 0x311   :  { %v735_v49 = vsel %vm726_vm9, %v723_v48, %v707_v40  ;;  %v727_v58 = vsel %vm726_vm9, %v5233_v46, %v723_v48  ;;  %v950_v40 = vmul.f32 %v5193_v31, %v5108_v13 }
 0x312   :  { %v783_v57 = vmul.f32 %v5220_v42, %v735_v49  ;;  %v791_v5 = vmul.f32 %v5239_v4, %v727_v58  ;;  %v925_v49 = vmul.f32 %v895_v2, %v5185_v51  ;;  %v5466_v4 = vmul.f32 %v5193_v31, %v5121_v16 }
 0x314   :  { %v891_v61 = vrot.slane %v783_v57, %v4754_v52  ;;  %v793_v62 = vpop.permute.xlu1 %792  ;;  %v795_v63 = vpop.permute.xlu0 %794  ;;  %v923_v56 = vrot.slane %v791_v5, %v4754_v52 }
 0x315   :  { %v818_v0 = vsel %vm810_vm1, %v793_v62, %v795_v63 }
 0x316   :  { %v924_v8 = vmul.f32 %v891_v61, %v5185_v51  ;;  %v867_v9 = vmul.f32 %v5248_v59, %v818_v0  ;;  %v933_v23 = vmul.f32 %v891_v61, %v5187_v53 }
 0x318   :  { %v5267_v10 = vpop.permute.xlu1 %796  ;;  %v5269_v11 = vpop.permute.xlu0 %808  ;;  %v997_v43 = vrot.slane %v867_v9, %v4754_v52  ;;  %v968_v60 = vadd.f32 %v950_v40, %v924_v8  ;;  %v951_v9 = vmul.f32 %v5193_v31, %v5105_v12  ;;  %v960_v8 = vmul.f32 %v5189_v29, %v5105_v12 }
 0x319   :  { %v817_v44 = vsel %vm810_vm1, %v795_v63, %v5267_v10  ;;  %v819_v48 = vsel %vm810_vm1, %v5269_v11, %v793_v62  ;;  %v934_v62 = vmul.f32 %v895_v2, %v5187_v53  ;;  %v959_v40 = vmul.f32 %v5189_v29, %v5108_v13 }
 0x31a   :  { %v868_v57 = vmul.f32 %v5260_v6, %v817_v44  ;;  %v875_v58 = vmul.f32 %v5263_v7, %v819_v48  ;;  %v1030_v0 = vmul.f32 %v997_v43, %v5191_v30  ;;  %v969_v5 = vadd.f32 %v951_v9, %v925_v49 }
 0x31b   :  { %v932_v44 = vmul.f32 %v923_v56, %v5185_v51  ;;  %v958_v2 = vmul.f32 %v5193_v31, %v5118_v15  ;;  %v977_v9 = vadd.f32 %v959_v40, %v933_v23  ;;  %v7482_v6 = vmov 0.0  }
 0x31c   :  { %v1001_v63 = vrot.slane %v868_v57, %v4754_v52  ;;  %v1029_v50 = vrot.slane %v875_v58, %v4754_v52  ;;  %v1048_v22 = vadd.f32 %v1030_v0, %v968_v60  ;;  %v1039_v57 = vmul.f32 %v997_v43, %v5197_v34 }
 0x31d   :  { %v978_v0 = vadd.f32 %v960_v8, %v934_v62  ;;  %v976_v24 = vadd.f32 %v958_v2, %v932_v44  ;;  %v941_v43 = vmul.f32 %v923_v56, %v5187_v53 }
 0x31e   :  { %v1031_v48 = vmul.f32 %v1001_v63, %v5191_v30  ;;  %v1040_v58 = vmul.f32 %v1001_v63, %v5197_v34  ;;  %v1038_v61 = vmul.f32 %v1029_v50, %v5191_v30  ;;  %v1074_v49 = vadd.f32 %v5195_v32, %v1048_v22 }
 0x31f   :  { %v1057_v12 = vadd.f32 %v1039_v57, %v977_v9  ;;  %v967_v63 = vmul.f32 %v5189_v29, %v5118_v15  ;;  %v1047_v1 = vmul.f32 %v1029_v50, %v5197_v34  ;;  %v5356_v9 = vrot.slane %v5209_v38, %v5111_v14 }
 0x320   :  { %v1049_v60 = vadd.f32 %v1031_v48, %v969_v5  ;;  %v1058_v21 = vadd.f32 %v1040_v58, %v978_v0  ;;  %v1092_v47 = vmax.f32 %v1074_v49, 0.0  ;;  %v1056_v3 = vadd.f32 %v1038_v61, %v976_v24 }
 0x321   :  { %v1083_v22 = vadd.f32 %v5201_v36, %v1057_v12  ;;  %v985_v44 = vadd.f32 %v967_v63, %v941_v43  ;;  %v5328_v58 = vrot.slane %v5209_v38, %v4944_v33  ;;  %v5345_v49 = vrot.slane %v5231_v45, %v4765_v55  ;;  %7475 = vst [vmem:[#allocation15_spill] sm:$0xff] %v5356_v9 }
 0x322   :  { %v1075_v13 = vadd.f32 %v5195_v32, %v1049_v60  ;;  %v1084_v54 = vadd.f32 %v5201_v36, %v1058_v21  ;;  %v1118_v23 = vmul.f32 %v5199_v35, %v1092_v47  ;;  %v1082_v5 = vadd.f32 %v5195_v32, %v1056_v3 }
 0x323   :  { %v1101_v15 = vmax.f32 %v1083_v22, 0.0  ;;  %v1065_v21 = vadd.f32 %v1047_v1, %v985_v44  ;;  %7471 = vst [vmem:[#allocation11_spill] sm:$0xff] %v5328_v58  ;;  %v5336_v1 = vrot.slane %v5209_v38, %v4765_v55  ;;  %7474 = vst [vmem:[#allocation14_spill] sm:$0xff] %v5345_v49  ;;  %v5360_v12 = vrot.slane %v5231_v45, %v5111_v14 }
 0x324   :  { %v1093_v62 = vmax.f32 %v1075_v13, 0.0  ;;  %v1102_v8 = vmax.f32 %v1084_v54, 0.0  ;;  %v1100_v47 = vmax.f32 %v1082_v5, 0.0  ;;  %v5332_v54 = vrot.slane %v5231_v45, %v4944_v33 }
 0x325   :  { %7473 = vst [vmem:[#allocation13_spill] sm:$0xff] %v5336_v1  ;;  %v1091_v33 = vadd.f32 %v5201_v36, %v1065_v21  ;;  %7476 = vst [vmem:[#allocation16_spill] sm:$0xff] %v5360_v12  ;;  %v5364_v55 = vrot.slane %v5209_v38, %v5144_v25  ;;  %v5371_v43 = vrot.slane %v5231_v45, %v5144_v25 }
 0x326   :  { %v1119_v50 = vmul.f32 %v5199_v35, %v1093_v62  ;;  %7472 = vst [vmem:[#allocation12_spill] sm:$0xff] %v5332_v54  ;;  %v1126_v13 = vmul.f32 %v5199_v35, %v1100_v47  ;;  %v5375_v63 = vrot.slane %v5209_v38, %v5155_v19  ;;  %v5387_v62 = vrot.slane %v5231_v45, %v5155_v19  ;;  %v5417_v47 = vld [vmem:[%s7354_s6 + $0x20] sm:$0xff] }
 0x327   :  { %7477 = vst [vmem:[#allocation17_spill] sm:$0xff] %v5364_v55  ;;  %v5391_v25 = vrot.slane %v5209_v38, %v5165_v28  ;;  %v5395_v5 = vrot.slane %v5231_v45, %v5165_v28  ;;  %v1109_v21 = vmax.f32 %v1091_v33, 0.0  ;;  %v953_v28 = vmul.f32 %v5193_v31, %v5141_v18 }
 0x328   :  { %7478 = vst [vmem:[#allocation18_spill] sm:$0xff] %v5375_v63  ;;  %7479 = vst [vmem:[#allocation19_spill] sm:$0xff] %v5387_v62 }
 0x329   :  { %v5312_v48 = vpop.permute.xlu1 %1115  ;;  %v5314_v24 = vpop.permute.xlu0 %1137  ;;  %7480 = vst [vmem:[#allocation20_spill] sm:$0xff] %v5391_v25  ;;  %7481 = vst [vmem:[#allocation21_spill] sm:$0xff] %v5395_v5 }
 0x32a   :  { %v5317_v56 = vadd.f32 %v5314_v24, %v1118_v23  ;;  %v1127_v3 = vmul.f32 %v5312_v48, %v1101_v15  ;;  %v1128_v57 = vmul.f32 %v5312_v48, %v1102_v8  ;;  %v5341_v61 = vadd.f32 %v5314_v24, %v1119_v50 }
 0x32b   :  { %v5398_v15 = vadd.f32 %v5314_v24, %v1126_v13  ;;  %v952_v8 = vmul.f32 %v5193_v31, %v5132_v17  ;;  %v1135_v33 = vmul.f32 %v5312_v48, %v1109_v21  ;;  %v5430_v13 = vmul.f32 %v5193_v31, %v5152_v26 }
 0x32c   :  { %1162 = vrot.lane.b32.xlu1 %v5317_v56, %s4462_s5 }
 0x32d   :  { %v5322_v40 = vpop.permute.xlu0 %712 }
 0x32e   :  { %v5338_v2 = vpop.permute.xlu1 %1141 }
 0x32f   :  { %v5348_v60 = vadd.f32 %v5338_v2, %v1127_v3  ;;  %v5351_v0 = vadd.f32 %v5338_v2, %v1128_v57  ;;  %v962_v3 = vmul.f32 %v5189_v29, %v5141_v18  ;;  %v963_v18 = vmul.f32 %v5189_v29, %v5152_v26 }
 0x330   :  { %1166 = vrot.lane.b32.xlu1 %v5341_v61, %s4462_s5  ;;  %v5445_v21 = vadd.f32 %v5338_v2, %v1135_v33 }
 0x331   :  { %v5377_v22 = vpop.permute.xlu0 %800  ;;  %1164 = vrot.lane.b32.xlu0 %v5348_v60, %s4462_s5  ;;  %v4219_v14 = vpack.c.bf16 %v5351_v0, %v5341_v61  ;;  %v4221_v23 = vpack.c.bf16 %v5348_v60, %v5317_v56 }
 0x332   :  { %v711_v44 = vpop.permute.xlu1 %710 }
 0x333   :  { %v732_v19 = vsel %vm726_vm9, %v711_v44, %v5322_v40  ;;  %v733_v38 = vsel %vm726_vm9, %v5211_v39, %v711_v44  ;;  %4220 = vmatprep.subr.bf16.mxu0 %v4219_v14  ;;  %v961_v39 = vmul.f32 %v5189_v29, %v5132_v17  ;;  %v955_v17 = vmul.f32 %v5193_v31, %v5162_v27 }
 0x334   :  { %v785_v45 = vmul.f32 %v5328_v58, %v733_v38  ;;  %v786_v50 = vmul.f32 %v5336_v1, %v732_v19  ;;  %1194 = vrot.lane.b32.xlu1 %v5398_v15, %s4462_s5  ;;  %4222 = vmatpush1.bf16.msra.mxu0 %v4221_v23 }
 0x335   :  { %v5423_v57 = vpop.permute.xlu0 %716  ;;  %1168 = vrot.lane.b32.xlu0 %v5351_v0, %s4462_s5 }
 0x336   :  { %v899_v14 = vrot.slane %v785_v45, %v4754_v52  ;;  %v903_v23 = vrot.slane %v786_v50, %v4754_v52  ;;  %v799_v44 = vpop.permute.xlu1 %798  ;;  %v964_v45 = vmul.f32 %v5189_v29, %v5162_v27  ;;  %v5462_v27 = vmul.f32 %v5193_v31, %v5173_v20 }
 0x337   :  { %v815_v19 = vsel %vm810_vm1, %v799_v44, %v5377_v22  ;;  %v816_v38 = vsel %vm810_vm1, %v5267_v10, %v799_v44  ;;  %3972 = vmatmul.mubr.msk.f32.vlgmr.msra.gmra.mrb[4].mxu0 %vm66_vm0, %v5417_v47 }
 0x338   :  { %v926_v50 = vmul.f32 %v899_v14, %v5185_v51  ;;  %v927_v26 = vmul.f32 %v903_v23, %v5185_v51  ;;  %v935_v7 = vmul.f32 %v899_v14, %v5187_v53  ;;  %v936_v59 = vmul.f32 %v903_v23, %v5187_v53  ;;  %1396 = vmatprep.mubr.f32.mxu0 %v7482_v6 }
 0x339   :  { %v869_v10 = vmul.f32 %v5332_v54, %v816_v38  ;;  %v870_v33 = vmul.f32 %v5345_v49, %v815_v19  ;;  %v805_v44 = vpop.permute.xlu0 %804  ;;  %1196 = vrot.lane.b32.xlu0 %v5445_v21, %s4462_s5  ;;  %v5470_v38 = vmul.f32 %v5189_v29, %v5173_v20  ;;  %v5474_v19 = vmul.f32 %v5189_v29, %v5121_v16  ;;  %v5479_v54 = vld [vmem:[%s7354_s6 + $0x28] sm:$0xff] }
 0x33a   :  { %v970_v14 = vadd.f32 %v952_v8, %v926_v50  ;;  %v971_v23 = vadd.f32 %v953_v28, %v927_v26  ;;  %v715_v1 = vpop.permute.xlu1 %714  ;;  %v979_v16 = vadd.f32 %v961_v39, %v935_v7  ;;  %v980_v29 = vadd.f32 %v962_v3, %v936_v59 }
 0x33b   :  { %v1005_v49 = vrot.slane %v869_v10, %v4754_v52  ;;  %v1009_v31 = vrot.slane %v870_v33, %v4754_v52  ;;  %v730_v8 = vsel %vm726_vm9, %v715_v1, %v5423_v57  ;;  %v731_v20 = vsel %vm726_vm9, %v5322_v40, %v715_v1  ;;  %3973 = vmatmul.mubr.msk.f32.gmra.mrb[6].mxu0 %vm66_vm0, %v5479_v54 }
 0x33c   :  { %v787_v28 = vmul.f32 %v5364_v55, %v731_v20  ;;  %v788_v50 = vmul.f32 %v5375_v63, %v730_v8  ;;  %1402 = vmatprep.mubr.f32.mxu0 %v7482_v6  ;;  %v5508_v8 = vld [vmem:[%s7354_s6 + $0x30] sm:$0xff] }
 0x33d   :  { %v1032_v26 = vmul.f32 %v1005_v49, %v5191_v30  ;;  %v1033_v10 = vmul.f32 %v1009_v31, %v5191_v30  ;;  %v1041_v33 = vmul.f32 %v1005_v49, %v5197_v34  ;;  %v1042_v58 = vmul.f32 %v1009_v31, %v5197_v34  ;;  %v807_v40 = vpop.permute.xlu0 %806 }
 0x33e   :  { %v907_v1 = vrot.slane %v787_v28, %v4754_v52  ;;  %v911_v7 = vrot.slane %v788_v50, %v4754_v52  ;;  %v811_v59 = vsel %vm810_vm1, %v807_v40, %v5269_v11  ;;  %v812_v39 = vsel %vm810_vm1, %v805_v44, %v807_v40  ;;  %v803_v3 = vpop.permute.xlu1 %802 }
 0x33f   :  { %v1051_v49 = vadd.f32 %v1033_v10, %v971_v23  ;;  %v1060_v31 = vadd.f32 %v1042_v58, %v980_v29  ;;  %v873_v20 = vmul.f32 %v5395_v5, %v812_v39  ;;  %v874_v28 = vmul.f32 %v5360_v12, %v811_v59  ;;  %3974 = vmatmul.mubr.msk.f32.gmra.mrb[8].mxu0 %vm66_vm0, %v5508_v8 }
 0x340   :  { %v928_v11 = vmul.f32 %v907_v1, %v5185_v51  ;;  %v929_v50 = vmul.f32 %v911_v7, %v5185_v51  ;;  %v937_v40 = vmul.f32 %v907_v1, %v5187_v53  ;;  %v938_v63 = vmul.f32 %v911_v7, %v5187_v53  ;;  %1408 = vmatprep.mubr.f32.mxu0 %v7482_v6  ;;  %v5527_v1 = vld [vmem:[%s7354_s6 + $0x38] sm:$0xff] }
 0x341   :  { %v1077_v23 = vadd.f32 %v5195_v32, %v1051_v49  ;;  %v1086_v58 = vadd.f32 %v5201_v36, %v1060_v31  ;;  %v1021_v29 = vrot.slane %v873_v20, %v4754_v52  ;;  %v1025_v10 = vrot.slane %v874_v28, %v4754_v52 }
 0x342   :  { %v972_v59 = vadd.f32 %v5430_v13, %v928_v11  ;;  %v973_v39 = vadd.f32 %v955_v17, %v929_v50  ;;  %v981_v5 = vadd.f32 %v963_v18, %v937_v40  ;;  %v982_v12 = vadd.f32 %v964_v45, %v938_v63  ;;  %v719_v55 = vpop.permute.xlu1 %718 }
 0x343   :  { %v5530_v7 = vmul.f32 %v1021_v29, %v5191_v30  ;;  %v1037_v49 = vmul.f32 %v1025_v10, %v5191_v30  ;;  %v5534_v31 = vmul.f32 %v1021_v29, %v5197_v34  ;;  %v1046_v20 = vmul.f32 %v1025_v10, %v5197_v34  ;;  %3975 = vmatmul.mubr.msk.f32.gmra.mrb[10].mxu0 %vm66_vm0, %v5527_v1 }
 0x344   :  { %v813_v63 = vsel %vm810_vm1, %v803_v3, %v805_v44  ;;  %v814_v13 = vsel %vm810_vm1, %v5377_v22, %v803_v3  ;;  %v728_v17 = vsel %vm726_vm9, %v719_v55, %v5233_v46  ;;  %v729_v18 = vsel %vm726_vm9, %v5423_v57, %v719_v55  ;;  %1479 = vmatprep.mubr.f32.mxu0 %v7482_v6 }
 0x345   :  { %v871_v45 = vmul.f32 %v5371_v43, %v814_v13  ;;  %v872_v28 = vmul.f32 %v5387_v62, %v813_v63  ;;  %v789_v44 = vmul.f32 %v5391_v25, %v729_v18  ;;  %v790_v11 = vmul.f32 %v5356_v9, %v728_v17 }
 0x346   :  { %v1059_v50 = vadd.f32 %v1041_v33, %v979_v16  ;;  %v1050_v22 = vadd.f32 %v1032_v26, %v970_v14  ;;  %v1095_v3 = vmax.f32 %v1077_v23, 0.0  ;;  %v1104_v40 = vmax.f32 %v1086_v58, 0.0 }
 0x347   :  { %v1013_v46 = vrot.slane %v871_v45, %v4754_v52  ;;  %v1017_v29 = vrot.slane %v872_v28, %v4754_v52  ;;  %v915_v55 = vrot.slane %v789_v44, %v4754_v52  ;;  %v919_v57 = vrot.slane %v790_v11, %v4754_v52 }
 0x348   :  { %v1085_v10 = vadd.f32 %v5201_v36, %v1059_v50  ;;  %v1076_v63 = vadd.f32 %v5195_v32, %v1050_v22  ;;  %v1121_v13 = vmul.f32 %v5199_v35, %v1095_v3  ;;  %v1130_v17 = vmul.f32 %v5312_v48, %v1104_v40 }
 0x349   :  { %v1034_v14 = vmul.f32 %v1013_v46, %v5191_v30  ;;  %v1035_v16 = vmul.f32 %v1017_v29, %v5191_v30  ;;  %v1043_v26 = vmul.f32 %v1013_v46, %v5197_v34  ;;  %v1044_v33 = vmul.f32 %v1017_v29, %v5197_v34 }
 0x34a   :  { %v930_v23 = vmul.f32 %v915_v55, %v5185_v51  ;;  %v931_v58 = vmul.f32 %v919_v57, %v5185_v51  ;;  %v939_v18 = vmul.f32 %v915_v55, %v5187_v53  ;;  %v940_v45 = vmul.f32 %v919_v57, %v5187_v53 }
 0x34b   :  { %v1053_v28 = vadd.f32 %v1035_v16, %v973_v39  ;;  %v1062_v44 = vadd.f32 %v1044_v33, %v982_v12  ;;  %v1103_v11 = vmax.f32 %v1085_v10, 0.0  ;;  %v1094_v50 = vmax.f32 %v1076_v63, 0.0 }
 0x34c   :  { %v974_v22 = vadd.f32 %v5462_v27, %v930_v23  ;;  %v975_v30 = vadd.f32 %v5466_v4, %v931_v58  ;;  %v983_v3 = vadd.f32 %v5470_v38, %v939_v18  ;;  %v984_v34 = vadd.f32 %v5474_v19, %v940_v45 }
 0x34d   :  { %v1079_v40 = vadd.f32 %v5195_v32, %v1053_v28  ;;  %v1088_v51 = vadd.f32 %v5201_v36, %v1062_v44  ;;  %v1129_v46 = vmul.f32 %v5312_v48, %v1103_v11  ;;  %v1120_v53 = vmul.f32 %v5199_v35, %v1094_v50 }
 0x34e   :  { %v1055_v39 = vadd.f32 %v1037_v49, %v975_v30  ;;  %v1064_v12 = vadd.f32 %v1046_v20, %v984_v34  ;;  %v5580_v29 = vadd.f32 %v5314_v24, %v1121_v13  ;;  %v5583_v27 = vadd.f32 %v5338_v2, %v1130_v17 }
 0x34f   :  { %v5586_v4 = vadd.f32 %v5338_v2, %v1129_v46  ;;  %v5589_v38 = vadd.f32 %v5314_v24, %v1120_v53  ;;  %v1061_v19 = vadd.f32 %v1043_v26, %v981_v5  ;;  %v1052_v55 = vadd.f32 %v1034_v14, %v972_v59 }
 0x350   :  { %v4223_v57 = vpack.c.bf16 %v5583_v27, %v5580_v29  ;;  %v1097_v10 = vmax.f32 %v1079_v40, 0.0  ;;  %v1106_v49 = vmax.f32 %v1088_v51, 0.0  ;;  %v1081_v20 = vadd.f32 %v5195_v32, %v1055_v39 }
 0x351   :  { %1172 = vrot.lane.b32.xlu0 %v5586_v4, %s4462_s5  ;;  %1170 = vrot.lane.b32.xlu1 %v5589_v38, %s4462_s5  ;;  %v4225_v63 = vpack.c.bf16 %v5586_v4, %v5589_v38  ;;  %v1087_v13 = vadd.f32 %v5201_v36, %v1061_v19  ;;  %v1078_v5 = vadd.f32 %v5195_v32, %v1052_v55 }
 0x352   :  { %4224 = vmatprep.subr.bf16.mxu0 %v4223_v57  ;;  %v1123_v59 = vmul.f32 %v5199_v35, %v1097_v10  ;;  %v1132_v17 = vmul.f32 %v5312_v48, %v1106_v49  ;;  %v1090_v14 = vadd.f32 %v5201_v36, %v1064_v12  ;;  %v1099_v16 = vmax.f32 %v1081_v20, 0.0  ;;  %v5744_v57 = vld [vmem:[%s7354_s6] sm:$0xff]  ;;  %v5752_v10 = vld [vmem:[%s7354_s6 + $0x8] sm:$0xff]  ;;  %v5760_v49 = vld [vmem:[%s7354_s6 + $0x10] sm:$0xff] }
 0x353   :  { %4226 = vmatpush1.bf16.msra.mxu0 %v4225_v63  ;;  %v1105_v26 = vmax.f32 %v1087_v13, 0.0  ;;  %v1096_v33 = vmax.f32 %v1078_v5, 0.0  ;;  %v1063_v23 = vadd.f32 %v5534_v31, %v983_v3  ;;  %v1054_v58 = vadd.f32 %v5530_v7, %v974_v22  ;;  %v5765_v20 = vld [vmem:[%s7355_s7] sm:$0xff]  ;;  %v5774_v63 = vld [vmem:[%s7354_s6 + $0x18] sm:$0xff]  ;;  %v5779_v13 = vld [vmem:[%s7355_s7 + $0x10] sm:$0xff] }
 0x354   :  { %v5608_v18 = vadd.f32 %v5314_v24, %v1123_v59  ;;  %v5611_v45 = vadd.f32 %v5338_v2, %v1132_v17  ;;  %v1108_v28 = vmax.f32 %v1090_v14, 0.0  ;;  %v1125_v44 = vmul.f32 %v5199_v35, %v1099_v16  ;;  %v5788_v5 = vld [vmem:[%s7355_s7 + $0x18] sm:$0xff] }
 0x355   :  { %1176 = vrot.lane.b32.xlu0 %v5583_v27, %s4462_s5  ;;  %1174 = vrot.lane.b32.xlu1 %v5580_v29, %s4462_s5  ;;  %v1131_v11 = vmul.f32 %v5312_v48, %v1105_v26  ;;  %v1122_v31 = vmul.f32 %v5199_v35, %v1096_v33  ;;  %v1089_v7 = vadd.f32 %v5201_v36, %v1063_v23  ;;  %v5798_v26 = vld [vmem:[%s7355_s7 + $0x8] sm:$0xff] }
 0x356   :  { %v4227_v50 = vpack.c.bf16 %v5611_v45, %v5608_v18  ;;  %v1134_v22 = vmul.f32 %v5312_v48, %v1108_v28  ;;  %v5625_v30 = vadd.f32 %v5314_v24, %v1125_v44  ;;  %v1080_v3 = vadd.f32 %v5195_v32, %v1054_v58  ;;  %3976 = vmatmul.mubr.msk.f32.vlgmr.msra.gmra.mrb[12].mxu0 %vm66_vm0, %v5417_v47  ;;  %v7483_v58 = vld [vmem:[#allocation11_spill] sm:$0xff] }
 0x357   :  { %v1157_v34 = vadd.f32 %v5338_v2, %v1131_v11  ;;  %v1148_v40 = vadd.f32 %v5314_v24, %v1122_v31  ;;  %v1107_v51 = vmax.f32 %v1089_v7, 0.0  ;;  %1485 = vmatprep.mubr.f32.mxu0 %v7482_v6  ;;  %v7484_v11 = vmov 1   ;;  %v7485_v31 = vld [vmem:[#allocation13_spill] sm:$0xff] }
 0x358   :  { %4228 = vmatprep.subr.bf16.mxu1 %v4227_v50  ;;  %v1160_v36 = vadd.f32 %v5338_v2, %v1134_v22  ;;  %v1098_v46 = vmax.f32 %v1080_v3, 0.0 }
 0x359   :  { %1180 = vrot.lane.b32.xlu0 %v1157_v34, %s4462_s5  ;;  %1178 = vrot.lane.b32.xlu1 %v1148_v40, %s4462_s5  ;;  %v4229_v53 = vpack.c.bf16 %v1157_v34, %v1148_v40  ;;  %v1133_v32 = vmul.f32 %v5312_v48, %v1107_v51  ;;  %v4235_v48 = vpack.c.bf16 %v5445_v21, %v5398_v15 }
 0x35a   :  { %v4231_v39 = vpack.c.bf16 %v1160_v36, %v5625_v30  ;;  %v1124_v12 = vmul.f32 %v5199_v35, %v1098_v46  ;;  %3977 = vmatmul.mubr.msk.f32.gmra.mrb[14].mxu0 %vm66_vm0, %v5479_v54 }
 0x35b   :  { %4230 = vmatpush1.bf16.msra.mxu1 %v4229_v53  ;;  %v1159_v19 = vadd.f32 %v5338_v2, %v1133_v32  ;;  %1491 = vmatprep.mubr.f32.mxu0 %v7482_v6  ;;  %v7486_v53 = vmov 2   ;;  %v7487_v32 = vld [vmem:[#allocation17_spill] sm:$0xff] }
 0x35c   :  { %4232 = vmatprep.subr.bf16.mxu1 %v4231_v39  ;;  %v1150_v55 = vadd.f32 %v5314_v24, %v1124_v12 }
 0x35d   :  { %1184 = vrot.lane.b32.xlu0 %v5611_v45, %s4462_s5  ;;  %1182 = vrot.lane.b32.xlu1 %v5608_v18, %s4462_s5 }
 0x35e   :  { %3980 = vmatmul.mubr.msk.f32.vlgmr.msra.gmra.mrb[2].mxu1 %vm66_vm0, %v5417_v47  ;;  %v4233_v35 = vpack.c.bf16 %v1159_v19, %v1150_v55  ;;  %3978 = vmatmul.mubr.msk.f32.gmra.mrb[16].mxu0 %vm66_vm0, %v5508_v8 }
 0x35f   :  { %1574 = vmatprep.mubr.f32.mxu1 %v7482_v6  ;;  %1497 = vmatprep.mubr.f32.mxu0 %v7482_v6 }
 0x360   :  { %4234 = vmatpush1.bf16.msra.mxu1 %v4233_v35  ;;  %v7488_v35 = vld [vmem:[#allocation18_spill] sm:$0xff] }
 0x361   :  { %1188 = vrot.lane.b32.xlu0 %v1159_v19, %s4462_s5  ;;  %1186 = vrot.lane.b32.xlu1 %v1150_v55, %s4462_s5 }
 0x362   :  { %3981 = vmatmul.mubr.msk.f32.gmra.mrb[4].mxu1 %vm66_vm0, %v5479_v54  ;;  %4236 = vmatprep.subr.bf16.mxu1 %v4235_v48 }
 0x363   :  { %1580 = vmatprep.mubr.f32.mxu1 %v7482_v6  ;;  %3979 = vmatmul.mubr.msk.f32.gmra.mrb[18].mxu0 %vm66_vm0, %v5527_v1 }
 0x365   :  { %1192 = vrot.lane.b32.xlu0 %v1160_v36, %s4462_s5  ;;  %1190 = vrot.lane.b32.xlu1 %v5625_v30, %s4462_s5 }
 0x366   :  { %3982 = vmatmul.mubr.msk.f32.gmra.mrb[6].mxu1 %vm66_vm0, %v5508_v8 }
 0x367   :  { %1586 = vmatprep.mubr.f32.mxu1 %v7482_v6 }
 0x369   :  { %1240 = vrot.lane.b32.xlu0 %v5351_v0, %s4463_s17  ;;  %1238 = vrot.lane.b32.xlu1 %v5341_v61, %s4463_s17 }
 0x36a   :  { %3983 = vmatmul.mubr.msk.f32.gmra.mrb[8].mxu1 %vm66_vm0, %v5527_v1 }
 0x36b   :  { %1657 = vmatprep.mubr.f32.mxu1 %v7482_v6 }
 0x36d   :  { %1244 = vrot.lane.b32.xlu0 %v5586_v4, %s4463_s17  ;;  %1242 = vrot.lane.b32.xlu1 %v5589_v38, %s4463_s17 }
 0x36e   :  { %3984 = vmatmul.mubr.msk.f32.vlgmr.msra.gmra.mrb[10].mxu1 %vm66_vm0, %v5417_v47 }
 0x36f   :  { %4238 = vmatpush3.bf16.msra.mxu1 %v4235_v48  ;;  %1663 = vmatprep.mubr.f32.mxu1 %v7482_v6 }
 0x371   :  { %1236 = vrot.lane.b32.xlu0 %v5348_v60, %s4463_s17  ;;  %1234 = vrot.lane.b32.xlu1 %v5317_v56, %s4463_s17 }
 0x372   :  { %3985 = vmatmul.mubr.msk.f32.gmra.mrb[12].mxu1 %vm66_vm0, %v5479_v54 }
 0x373   :  { %1669 = vmatprep.mubr.f32.mxu1 %v7482_v6 }
 0x375   :  { %1248 = vrot.lane.b32.xlu0 %v5583_v27, %s4463_s17  ;;  %1246 = vrot.lane.b32.xlu1 %v5580_v29, %s4463_s17 }
 0x376   :  { %3986 = vmatmul.mubr.msk.f32.gmra.mrb[14].mxu1 %vm66_vm0, %v5508_v8 }
 0x377   :  { %1675 = vmatprep.mubr.f32.mxu1 %v7482_v6 }
 0x379   :  { %1252 = vrot.lane.b32.xlu0 %v1157_v34, %s4463_s17  ;;  %1250 = vrot.lane.b32.xlu1 %v1148_v40, %s4463_s17 }
 0x37a   :  { %3987 = vmatmul.mubr.msk.f32.gmra.mrb[16].mxu1 %vm66_vm0, %v5527_v1 }
 0x37b   :  { %4057 = vmatprep.mubr.msk.f32.mxu1 %vm66_vm0, %v5417_v47 }
 0x37d   :  { %1256 = vrot.lane.b32.xlu0 %v5611_v45, %s4463_s17  ;;  %1254 = vrot.lane.b32.xlu1 %v5608_v18, %s4463_s17 }
 0x37e   :  { %4058 = vmatmul.mubr.msk.f32.vlgmr.msra.gmra.mrb[18].mxu1 %vm66_vm0, %v5479_v54 }
 0x37f   :  { %4060 = vmatprep.mubr.msk.f32.mxu1 %vm66_vm0, %v5508_v8 }
 0x381   :  { %1260 = vrot.lane.b32.xlu0 %v1159_v19, %s4463_s17  ;;  %1258 = vrot.lane.b32.xlu1 %v1150_v55, %s4463_s17 }
 0x382   :  { %4061 = vmatmul.mubr.msk.f32.gmra.mrb[20].mxu1 %vm66_vm0, %v5527_v1 }
 0x383   :  { %1843 = vmatprep.mubr.f32.mxu1 %v7482_v6 }
 0x385   :  { %1264 = vrot.lane.b32.xlu0 %v1160_v36, %s4463_s17  ;;  %1262 = vrot.lane.b32.xlu1 %v5625_v30, %s4463_s17 }
 0x389   :  { %1268 = vrot.lane.b32.xlu0 %v5445_v21, %s4463_s17  ;;  %1266 = vrot.lane.b32.xlu1 %v5398_v15, %s4463_s17 }
 0x38d   :  { %2719 = vperm.xlu1 %4419, %v5765_v20   ;;  %2724 = vperm.xlu0 %4420, %v5798_v26  }
 0x391   :  { %2729 = vperm.xlu1 %4419, %v5779_v13   ;;  %4421 = vset.pattern.permute.xlu0 %v7484_v11 }
 0x392   :  { %2810 = vperm.xlu0 %4421, %v5765_v20  }
 0x395   :  { %2734 = vperm.xlu1 %4419, %v5788_v5  }
 0x396   :  { %4423 = vset.pattern.permute.xlu0 %v7486_v53 }
 0x397   :  { %2862 = vperm.xlu0 %4423, %v5765_v20  }
 0x399   :  { %4422 = vset.pattern.permute.xlu1 %v7484_v11 }
 0x39a   :  { %2814 = vperm.xlu1 %4422, %v5798_v26  }
 0x39b   :  { %2870 = vperm.xlu0 %4423, %v5779_v13  }
 0x39e   :  { %v1163_v24 = vpop.permute.xlu1 %1162  ;;  %2818 = vperm.xlu1 %4422, %v5779_v13  }
 0x3a2   :  { %v1167_v56 = vpop.permute.xlu1 %1166  ;;  %4424 = vset.pattern.permute.xlu1 %v7486_v53 }
 0x3a3   :  { %v1165_v54 = vpop.permute.xlu0 %1164  ;;  %v1212_v2 = vsel %vm726_vm9, %v1163_v24, %v1167_v56  ;;  %2866 = vperm.xlu1 %4424, %v5798_v26  }
 0x3a4   :  { %v1217_v47 = vmul.f32 %v1212_v2, %v5216_v41 }
 0x3a6   :  { %v5725_v61 = vpop.permute.xlu1 %1194 }
 0x3a7   :  { %v1169_v60 = vpop.permute.xlu0 %1168  ;;  %v1214_v15 = vsel %vm726_vm9, %v5725_v61, %v1163_v24  ;;  %4425 = vset.pattern.permute.xlu1 %v7484_v11 }
 0x3a8   :  { %v1213_v0 = vsel %vm726_vm9, %v1165_v54, %v1169_v60  ;;  %v1216_v27 = vmul.f32 %v1214_v15, %v5220_v42  ;;  %2822 = vperm.xlu1 %4425, %v5788_v5  }
 0x3a9   :  { %v1226_v8 = vmul.f32 %v1213_v0, %v5216_v41 }
 0x3ab   :  { %v5734_v21 = vpop.permute.xlu0 %1196  ;;  %v4239_v1 = vpack.c.bf16 %v1226_v8, %v1217_v47 }
 0x3ac   :  { %v1215_v29 = vsel %vm726_vm9, %v5734_v21, %v1165_v54  ;;  %4426 = vset.pattern.permute.xlu1 %v7486_v53 }
 0x3ad   :  { %v1225_v4 = vmul.f32 %v1215_v29, %v5220_v42  ;;  %4240 = vmatprep.subr.bf16.mxu1 %v4239_v1  ;;  %2874 = vperm.xlu1 %4426, %v5788_v5  }
 0x3af   :  { %v4241_v38 = vpack.c.bf16 %v1225_v4, %v1216_v27 }
 0x3b1   :  { %4242 = vmatpush1.bf16.msra.mxu1 %v4241_v38 }
 0x3b4   :  { %3992 = vmatmul.mubr.msk.f32.vlgmr.msra.gmra.mrb[22].mxu1 %vm66_vm0, %v5744_v57 }
 0x3b5   :  { %1849 = vmatprep.mubr.f32.mxu1 %v7482_v6 }
 0x3b8   :  { %3993 = vmatmul.mubr.msk.f32.gmra.mrb[24].mxu1 %vm66_vm0, %v5752_v10 }
 0x3b9   :  { %1855 = vmatprep.mubr.f32.mxu1 %v7482_v6 }
 0x3bc   :  { %3994 = vmatmul.mubr.msk.f32.gmra.mrb[26].mxu1 %vm66_vm0, %v5760_v49 }
 0x3bd   :  { %1861 = vmatprep.mubr.f32.mxu1 %v7482_v6 }
 0x3c0   :  { %3995 = vmatmul.mubr.msk.f32.gmra.mrb[28].mxu1 %vm66_vm0, %v5774_v63 }
 0x3c1   :  { %1932 = vmatprep.mubr.f32.mxu1 %v7482_v6 }
 0x3c3   :  { %v1173_v59 = vpop.permute.xlu0 %1172  ;;  %v1171_v17 = vpop.permute.xlu1 %1170 }
 0x3c4   :  { %v1211_v14 = vsel %vm726_vm9, %v1169_v60, %v1173_v59  ;;  %v1210_v16 = vsel %vm726_vm9, %v1167_v56, %v1171_v17 }
 0x3c5   :  { %v1227_v18 = vmul.f32 %v1211_v14, %v7483_v58  ;;  %v1218_v45 = vmul.f32 %v1210_v16, %v7483_v58 }
 0x3c7   :  { %v1177_v33 = vpop.permute.xlu0 %1176  ;;  %v1175_v23 = vpop.permute.xlu1 %1174  ;;  %v4245_v34 = vpack.c.bf16 %v1227_v18, %v1218_v45 }
 0x3c8   :  { %v1209_v28 = vsel %vm726_vm9, %v1173_v59, %v1177_v33  ;;  %v1208_v44 = vsel %vm726_vm9, %v1171_v17, %v1175_v23  ;;  %v7489_v17 = vmov 4  }
 0x3c9   :  { %v1228_v7 = vmul.f32 %v1209_v28, %v7485_v31  ;;  %v1219_v50 = vmul.f32 %v1208_v44, %v7485_v31  ;;  %4429 = vset.pattern.permute.xlu0 %v7489_v17 }
 0x3ca   :  { %3258 = vperm.xlu0 %4429, %v5798_v26  }
 0x3cb   :  { %v1181_v22 = vpop.permute.xlu0 %1180  ;;  %v1179_v30 = vpop.permute.xlu1 %1178  ;;  %v4243_v3 = vpack.c.bf16 %v1228_v7, %v1219_v50  ;;  %v7491_v50 = vmov 3  }
 0x3cc   :  { %v1207_v40 = vsel %vm726_vm9, %v1177_v33, %v1181_v22  ;;  %v1206_v51 = vsel %vm726_vm9, %v1175_v23, %v1179_v30  ;;  %4427 = vset.pattern.permute.xlu1 %v7491_v50 }
 0x3cd   :  { %4244 = vmatprep.subr.bf16.mxu1 %v4243_v3  ;;  %v1229_v39 = vmul.f32 %v1207_v40, %v7487_v32  ;;  %v1220_v12 = vmul.f32 %v1206_v51, %v7487_v32  ;;  %3206 = vperm.xlu1 %4427, %v5798_v26   ;;  %v7493_v51 = vld [vmem:[#allocation9_spill] sm:$0xff] }
 0x3ce   :  { %4246 = vmatpush1.bf16.msra.mxu1 %v4245_v34  ;;  %3266 = vperm.xlu0 %4429, %v5788_v5  }
 0x3cf   :  { %v1185_v36 = vpop.permute.xlu0 %1184  ;;  %v1183_v46 = vpop.permute.xlu1 %1182  ;;  %v4249_v60 = vpack.c.bf16 %v1229_v39, %v1220_v12 }
 0x3d0   :  { %v1205_v19 = vsel %vm726_vm9, %v1181_v22, %v1185_v36  ;;  %v1204_v55 = vsel %vm726_vm9, %v1179_v30, %v1183_v46  ;;  %v7492_v22 = vmov 5  }
 0x3d1   :  { %v1230_v48 = vmul.f32 %v1205_v19, %v7488_v35  ;;  %v1221_v24 = vmul.f32 %v1204_v55, %v7488_v35  ;;  %3996 = vmatmul.mubr.msk.f32.vlgmr.msra.gmra.mrb[30].mxu1 %vm66_vm0, %v5744_v57  ;;  %4428 = vset.pattern.permute.xlu1 %v7489_v17 }
 0x3d2   :  { %1938 = vmatprep.mubr.f32.mxu1 %v7482_v6  ;;  %4434 = vset.pattern.permute.xlu0 %v7492_v22 }
 0x3d3   :  { %v1189_v56 = vpop.permute.xlu0 %1188  ;;  %v1187_v54 = vpop.permute.xlu1 %1186  ;;  %v4247_v2 = vpack.c.bf16 %v1230_v48, %v1221_v24  ;;  %3342 = vperm.xlu0 %4434, %v5765_v20   ;;  %3254 = vperm.xlu1 %4428, %v5765_v20  }
 0x3d4   :  { %v1203_v1 = vsel %vm726_vm9, %v1185_v36, %v1189_v56  ;;  %v1202_v29 = vsel %vm726_vm9, %v1183_v46, %v1187_v54 }
 0x3d5   :  { %3997 = vmatmul.mubr.msk.f32.gmra.mrb[32].mxu1 %vm66_vm0, %v5752_v10  ;;  %4248 = vmatprep.subr.bf16.mxu1 %v4247_v2  ;;  %v1231_v23 = vmul.f32 %v1203_v1, %v5391_v25  ;;  %v1222_v18 = vmul.f32 %v1202_v29, %v5391_v25 }
 0x3d6   :  { %4250 = vmatpush1.bf16.msra.mxu1 %v4249_v60  ;;  %1944 = vmatprep.mubr.f32.mxu1 %v7482_v6 }
 0x3d7   :  { %v1193_v0 = vpop.permute.xlu0 %1192  ;;  %v1191_v47 = vpop.permute.xlu1 %1190  ;;  %3354 = vperm.xlu0 %4434, %v5788_v5   ;;  %4430 = vset.pattern.permute.xlu1 %v7491_v50 }
 0x3d8   :  { %v1201_v8 = vsel %vm726_vm9, %v1189_v56, %v1193_v0  ;;  %v1200_v15 = vsel %vm726_vm9, %v1187_v54, %v1191_v47  ;;  %v1199_v38 = vsel %vm726_vm9, %v1193_v0, %v5734_v21  ;;  %v1198_v59 = vsel %vm726_vm9, %v1191_v47, %v5725_v61  ;;  %v7490_v21 = vld [vmem:[#allocation7_spill] sm:$0xff]  ;;  %3210 = vperm.xlu1 %4430, %v5779_v13   ;;  %v7494_v0 = vld [vmem:[#allocation8_spill] sm:$0xff] }
 0x3d9   :  { %v1232_v27 = vmul.f32 %v1201_v8, %v5356_v9  ;;  %v1223_v4 = vmul.f32 %v1200_v15, %v5356_v9  ;;  %3998 = vmatmul.mubr.msk.f32.gmra.mrb[34].mxu1 %vm66_vm0, %v5760_v49  ;;  %v1233_v45 = vmul.f32 %v1199_v38, %v7490_v21  ;;  %v1224_v28 = vmul.f32 %v1198_v59, %v7490_v21  ;;  %v7495_v15 = vld [vmem:[#allocation14_spill] sm:$0xff] }
 0x3da   :  { %1950 = vmatprep.mubr.f32.mxu1 %v7482_v6  ;;  %v4253_v61 = vpack.c.bf16 %v1231_v23, %v1222_v18 }
 0x3db   :  { %v1241_v14 = vpop.permute.xlu0 %1240  ;;  %v1239_v16 = vpop.permute.xlu1 %1238  ;;  %v4251_v33 = vpack.c.bf16 %v1232_v27, %v1223_v4  ;;  %v4255_v7 = vpack.c.bf16 %v1233_v45, %v1224_v28  ;;  %4436 = vset.pattern.permute.xlu0 %v7491_v50 }
 0x3dc   :  { %3202 = vperm.xlu0 %4436, %v5765_v20   ;;  %4431 = vset.pattern.permute.xlu1 %v7489_v17 }
 0x3dd   :  { %3999 = vmatmul.mubr.msk.f32.gmra.mrb[36].mxu1 %vm66_vm0, %v5774_v63  ;;  %4252 = vmatprep.subr.bf16.mxu1 %v4251_v33 }
 0x3de   :  { %2021 = vmatprep.mubr.f32.mxu1 %v7482_v6  ;;  %3262 = vperm.xlu1 %4431, %v5779_v13  }
 0x3df   :  { %v5870_v44 = vpop.permute.xlu0 %1244  ;;  %v5872_v11 = vpop.permute.xlu1 %1242 }
 0x3e0   :  { %v1283_v34 = vsel %vm810_vm1, %v1241_v14, %v5870_v44  ;;  %v1282_v40 = vsel %vm810_vm1, %v1239_v16, %v5872_v11 }
 0x3e1   :  { %4000 = vmatmul.mubr.msk.f32.vlgmr.msra.gmra.mrb[2].mxu1 %vm66_vm0, %v5744_v57  ;;  %v1298_v36 = vmul.f32 %v1283_v34, %v7493_v51  ;;  %v1289_v46 = vmul.f32 %v1282_v40, %v7493_v51 }
 0x3e2   :  { %4254 = vmatpush1.bf16.msra.mxu1 %v4253_v61  ;;  %2027 = vmatprep.mubr.f32.mxu1 %v7482_v6 }
 0x3e3   :  { %4256 = vmatprep.subr.bf16.mxu1 %v4255_v7  ;;  %v5884_v30 = vpop.permute.xlu0 %1236  ;;  %v5886_v3 = vpop.permute.xlu1 %1234  ;;  %v4259_v19 = vpack.c.bf16 %v1298_v36, %v1289_v46  ;;  %4432 = vset.pattern.permute.xlu1 %v7492_v22  ;;  %v2223_v36 = vld [vmem:[%s7354_s6 + $0x58] sm:$0xff] }
 0x3e4   :  { %v1285_v20 = vsel %vm810_vm1, %v5884_v30, %v1241_v14  ;;  %v1284_v24 = vsel %vm810_vm1, %v5886_v3, %v1239_v16  ;;  %3346 = vperm.xlu1 %4432, %v5798_v26  }
 0x3e5   :  { %4001 = vmatmul.mubr.msk.f32.gmra.mrb[4].mxu1 %vm66_vm0, %v5752_v10  ;;  %v1297_v47 = vmul.f32 %v1285_v20, %v7494_v0  ;;  %v1288_v8 = vmul.f32 %v1284_v24, %v7494_v0 }
 0x3e6   :  { %2033 = vmatprep.mubr.f32.mxu1 %v7482_v6 }
 0x3e7   :  { %v1249_v39 = vpop.permute.xlu0 %1248  ;;  %v1247_v12 = vpop.permute.xlu1 %1246  ;;  %v4261_v4 = vpack.c.bf16 %v1297_v47, %v1288_v8 }
 0x3e8   :  { %4433 = vset.pattern.permute.xlu1 %v7491_v50  ;;  %v1281_v38 = vsel %vm810_vm1, %v5870_v44, %v1249_v39  ;;  %v1280_v59 = vsel %vm810_vm1, %v5872_v11, %v1247_v12 }
 0x3e9   :  { %4002 = vmatmul.mubr.msk.f32.gmra.mrb[6].mxu1 %vm66_vm0, %v5760_v49  ;;  %3214 = vperm.xlu1 %4433, %v5788_v5   ;;  %v7496_v5 = vld [vmem:[#allocation12_spill] sm:$0xff] }
 0x3ea   :  { %2039 = vmatprep.mubr.f32.mxu1 %v7482_v6  ;;  %v1299_v33 = vmul.f32 %v1281_v38, %v7496_v5  ;;  %v1290_v23 = vmul.f32 %v1280_v59, %v7496_v5 }
 0x3eb   :  { %v5912_v55 = vpop.permute.xlu0 %1252  ;;  %v5914_v48 = vpop.permute.xlu1 %1250 }
 0x3ec   :  { %v1279_v2 = vsel %vm810_vm1, %v1249_v39, %v5912_v55  ;;  %v1278_v60 = vsel %vm810_vm1, %v1247_v12, %v5914_v48  ;;  %v4265_v45 = vpack.c.bf16 %v1299_v33, %v1290_v23  ;;  %v7497_v12 = vld [vmem:[#allocation16_spill] sm:$0xff] }
 0x3ed   :  { %4003 = vmatmul.mubr.msk.f32.gmra.mrb[8].mxu1 %vm66_vm0, %v5774_v63  ;;  %v1300_v1 = vmul.f32 %v1279_v2, %v7495_v15  ;;  %v1291_v29 = vmul.f32 %v1278_v60, %v7495_v15  ;;  %4435 = vset.pattern.permute.xlu1 %v7492_v22  ;;  %v7498_v60 = vld [vmem:[#allocation21_spill] sm:$0xff] }
 0x3ee   :  { %2110 = vmatprep.mubr.f32.mxu1 %v7482_v6  ;;  %3350 = vperm.xlu1 %4435, %v5779_v13  }
 0x3ef   :  { %v1257_v56 = vpop.permute.xlu0 %1256  ;;  %v1255_v54 = vpop.permute.xlu1 %1254  ;;  %v4263_v14 = vpack.c.bf16 %v1300_v1, %v1291_v29  ;;  %v7499_v1 = vld [vmem:[#allocation10_spill] sm:$0xff] }
 0x3f0   :  { %v1277_v50 = vsel %vm810_vm1, %v5912_v55, %v1257_v56  ;;  %v1276_v22 = vsel %vm810_vm1, %v5914_v48, %v1255_v54 }
 0x3f1   :  { %4004 = vmatmul.mubr.msk.f32.vlgmr.msra.gmra.mrb[10].mxu1 %vm66_vm0, %v5744_v57  ;;  %v1301_v46 = vmul.f32 %v1277_v50, %v5371_v43  ;;  %v1292_v39 = vmul.f32 %v1276_v22, %v5371_v43 }
 0x3f2   :  { %4258 = vmatpush3.bf16.msra.mxu1 %v4255_v7  ;;  %2116 = vmatprep.mubr.f32.mxu1 %v7482_v6 }
 0x3f3   :  { %4260 = vmatprep.subr.bf16.mxu1 %v4259_v19  ;;  %v1261_v26 = vpop.permute.xlu0 %1260  ;;  %v1259_v27 = vpop.permute.xlu1 %1258  ;;  %4437 = vset.pattern.permute.xlu1 %v7486_v53  ;;  %v2222_v53 = vld [vmem:[%s7354_s6 + $0x50] sm:$0xff]  ;;  %v4269_v48 = vpack.c.bf16 %v1301_v46, %v1292_v39 }
 0x3f4   :  { %v1274_v16 = vsel %vm810_vm1, %v1255_v54, %v1259_v27 }
 0x3f5   :  { %4005 = vmatmul.mubr.msk.f32.gmra.mrb[12].mxu1 %vm66_vm0, %v5752_v10  ;;  %v1293_v18 = vmul.f32 %v1274_v16, %v5387_v62 }
 0x3f6   :  { %2122 = vmatprep.mubr.f32.mxu1 %v7482_v6 }
 0x3f7   :  { %v1265_v28 = vpop.permute.xlu0 %1264  ;;  %v1263_v61 = vpop.permute.xlu1 %1262 }
 0x3f8   :  { %v1273_v24 = vsel %vm810_vm1, %v1261_v26, %v1265_v28 }
 0x3f9   :  { %4006 = vmatmul.mubr.msk.f32.gmra.mrb[14].mxu1 %vm66_vm0, %v5760_v49  ;;  %v1303_v47 = vmul.f32 %v1273_v24, %v7498_v60 }
 0x3fa   :  { %2128 = vmatprep.mubr.f32.mxu1 %v7482_v6 }
 0x3fb   :  { %v1269_v11 = vpop.permute.xlu0 %1268  ;;  %v1267_v7 = vpop.permute.xlu1 %1266 }
 0x3fc   :  { %v1271_v34 = vsel %vm810_vm1, %v1265_v28, %v1269_v11  ;;  %v1270_v40 = vsel %vm810_vm1, %v1263_v61, %v1267_v7  ;;  %v1287_v54 = vsel %vm810_vm1, %v1269_v11, %v5884_v30  ;;  %v1286_v2 = vsel %vm810_vm1, %v1267_v7, %v5886_v3 }
 0x3fd   :  { %4007 = vmatmul.mubr.msk.f32.gmra.mrb[16].mxu1 %vm66_vm0, %v5774_v63  ;;  %v1304_v19 = vmul.f32 %v1271_v34, %v7497_v12  ;;  %v1295_v55 = vmul.f32 %v1270_v40, %v7497_v12  ;;  %v1305_v29 = vmul.f32 %v1287_v54, %v7499_v1 }
 0x3fe   :  { %4067 = vmatprep.mubr.msk.f32.mxu1 %vm66_vm0, %v5744_v57  ;;  %v1275_v57 = vsel %vm810_vm1, %v1257_v56, %v1261_v26  ;;  %v1272_v56 = vsel %vm810_vm1, %v1259_v27, %v1263_v61  ;;  %v1296_v26 = vmul.f32 %v1286_v2, %v7499_v1 }
 0x3ff   :  { %v4271_v20 = vpack.c.bf16 %v1304_v19, %v1295_v55  ;;  %v1294_v8 = vmul.f32 %v1272_v56, %v7498_v60 }
 0x400   :  { %v4275_v30 = vpack.c.bf16 %v1305_v29, %v1296_v26 }
 0x401   :  { %4068 = vmatmul.mubr.msk.f32.vlgmr.msra.gmra.mrb[18].mxu1 %vm66_vm0, %v5752_v10  ;;  %v1302_v10 = vmul.f32 %v1275_v57, %v5387_v62  ;;  %v4273_v27 = vpack.c.bf16 %v1303_v47, %v1294_v8 }
 0x402   :  { %4262 = vmatpush1.bf16.msra.mxu1 %v4261_v4  ;;  %4070 = vmatprep.mubr.msk.f32.mxu1 %vm66_vm0, %v5760_v49  ;;  %v5974_v49 = vld [vmem:[%s7354_s6 + $0x40] sm:$0xff] }
 0x403   :  { %4264 = vmatprep.subr.bf16.mxu1 %v4263_v14  ;;  %v4267_v13 = vpack.c.bf16 %v1302_v10, %v1293_v18 }
 0x405   :  { %4071 = vmatmul.mubr.msk.f32.gmra.mrb[20].mxu1 %vm66_vm0, %v5774_v63  ;;  %v2221_v63 = vld [vmem:[%s7354_s6 + $0x48] sm:$0xff] }
 0x406   :  { %2300 = vmatprep.mubr.f32.mxu1 %v7482_v6 }
 0x409   :  { %4012 = vmatmul.mubr.msk.f32.vlgmr.msra.gmra.mrb[22].mxu1 %vm66_vm0, %v5974_v49 }
 0x40a   :  { %4266 = vmatpush1.bf16.msra.mxu1 %v4265_v45  ;;  %2306 = vmatprep.mubr.f32.mxu1 %v7482_v6  ;;  %v5983_v44 = vpop.f32.mrb[4].mxu0 }
 0x40b   :  { %4268 = vmatprep.subr.bf16.mxu1 %v4267_v13  ;;  %v1394_v3 = vpop.f32.mrb[5].mxu0 }
 0x40c   :  { %v6068_v61 = vpop.permute.xlu1 %2719 }
 0x40d   :  { %4013 = vmatmul.mubr.msk.f32.gmra.mrb[24].mxu1 %vm66_vm0, %v2221_v63 }
 0x40e   :  { %2312 = vmatprep.mubr.f32.mxu1 %v7482_v6  ;;  %v1398_v4 = vpop.f32.mrb[6].mxu0 }
 0x40f   :  { %v1400_v38 = vpop.f32.mrb[7].mxu0 }
 0x410   :  { %v6070_v13 = vpop.permute.xlu1 %2729 }
 0x411   :  { %4014 = vmatmul.mubr.msk.f32.gmra.mrb[26].mxu1 %vm66_vm0, %v2222_v53 }
 0x412   :  { %2318 = vmatprep.mubr.f32.mxu1 %v7482_v6  ;;  %v1404_v59 = vpop.f32.mrb[8].mxu0 }
 0x413   :  { %v1406_v14 = vpop.f32.mrb[9].mxu0 }
 0x415   :  { %4015 = vmatmul.mubr.msk.f32.gmra.mrb[28].mxu1 %vm66_vm0, %v2223_v36 }
 0x416   :  { %2389 = vmatprep.mubr.f32.mxu1 %v7482_v6  ;;  %v1410_v57 = vpop.f32.mrb[10].mxu0 }
 0x417   :  { %v1412_v16 = vpop.f32.mrb[11].mxu0 }
 0x419   :  { %4016 = vmatmul.mubr.msk.f32.vlgmr.msra.gmra.mrb[30].mxu1 %vm66_vm0, %v5974_v49 }
 0x41a   :  { %4270 = vmatpush1.bf16.msra.mxu1 %v4269_v48  ;;  %2395 = vmatprep.mubr.f32.mxu1 %v7482_v6 }
 0x41b   :  { %4272 = vmatprep.subr.bf16.mxu1 %v4271_v20 }
 0x41d   :  { %4017 = vmatmul.mubr.msk.f32.gmra.mrb[32].mxu1 %vm66_vm0, %v2221_v63 }
 0x41e   :  { %2401 = vmatprep.mubr.f32.mxu1 %v7482_v6 }
 0x421   :  { %4018 = vmatmul.mubr.msk.f32.gmra.mrb[34].mxu1 %vm66_vm0, %v2222_v53 }
 0x422   :  { %2407 = vmatprep.mubr.f32.mxu1 %v7482_v6 }
 0x425   :  { %4019 = vmatmul.mubr.msk.f32.gmra.mrb[36].mxu1 %vm66_vm0, %v2223_v36 }
 0x426   :  { %2478 = vmatprep.mubr.f32.mxu1 %v7482_v6 }
 0x429   :  { %4020 = vmatmul.mubr.msk.f32.vlgmr.msra.gmra.mrb[2].mxu1 %vm66_vm0, %v5974_v49  ;;  %v1481_v33 = vpop.f32.mrb[12].mxu0 }
 0x42a   :  { %4274 = vmatpush1.bf16.msra.mxu1 %v4273_v27  ;;  %2484 = vmatprep.mubr.f32.mxu1 %v7482_v6 }
 0x42b   :  { %4276 = vmatprep.subr.bf16.mxu1 %v4275_v30 }
 0x42d   :  { %4021 = vmatmul.mubr.msk.f32.gmra.mrb[4].mxu1 %vm66_vm0, %v2221_v63 }
 0x42e   :  { %2490 = vmatprep.mubr.f32.mxu1 %v7482_v6 }
 0x431   :  { %4022 = vmatmul.mubr.msk.f32.gmra.mrb[6].mxu1 %vm66_vm0, %v2222_v53 }
 0x432   :  { %2496 = vmatprep.mubr.f32.mxu1 %v7482_v6 }
 0x435   :  { %4023 = vmatmul.mubr.msk.f32.gmra.mrb[8].mxu1 %vm66_vm0, %v2223_v36 }
 0x436   :  { %2567 = vmatprep.mubr.f32.mxu1 %v7482_v6 }
 0x439   :  { %4024 = vmatmul.mubr.msk.f32.vlgmr.msra.gmra.mrb[10].mxu1 %vm66_vm0, %v5974_v49 }
 0x43a   :  { %4278 = vmatpush3.bf16.msra.mxu1 %v4275_v30  ;;  %2573 = vmatprep.mubr.f32.mxu1 %v7482_v6 }
 0x43d   :  { %4025 = vmatmul.mubr.msk.f32.gmra.mrb[12].mxu1 %vm66_vm0, %v2221_v63 }
 0x43e   :  { %2579 = vmatprep.mubr.f32.mxu1 %v7482_v6 }
 0x441   :  { %4026 = vmatmul.mubr.msk.f32.gmra.mrb[14].mxu1 %vm66_vm0, %v2222_v53 }
 0x442   :  { %2585 = vmatprep.mubr.f32.mxu1 %v7482_v6  ;;  %v1483_v6 = vpop.f32.mrb[13].mxu0 }
 0x443   :  { %v6056_v23 = vpop.f32.mrb[14].mxu0 }
 0x444   :  { %v6058_v10 = vpop.f32.mrb[15].mxu0 }
 0x445   :  { %4027 = vmatmul.mubr.msk.f32.gmra.mrb[16].mxu1 %vm66_vm0, %v2223_v36  ;;  %v6060_v18 = vpop.f32.mrb[16].mxu0 }
 0x446   :  { %4077 = vmatprep.mubr.msk.f32.mxu1 %vm66_vm0, %v5974_v49  ;;  %v6062_v49 = vpop.f32.mrb[17].mxu0 }
 0x447   :  { %v6064_v45 = vpop.f32.mrb[18].mxu0 }
 0x448   :  { %v6066_v28 = vpop.f32.mrb[19].mxu0 }
 0x449   :  { %4078 = vmatmul.mubr.msk.f32.vlgmr.msra.gmra.mrb[18].mxu1 %vm66_vm0, %v2221_v63  ;;  %v6072_v63 = vpop.permute.xlu0 %2724 }
 0x44a   :  { %4080 = vmatprep.mubr.msk.f32.mxu1 %vm66_vm0, %v2222_v53  ;;  %v6074_v53 = vpop.permute.xlu1 %2734 }
 0x44d   :  { %4081 = vmatmul.mubr.msk.f32.gmra.mrb[20].mxu1 %vm66_vm0, %v2223_v36  ;;  %v6077_v34 = vpop.permute.xlu0 %2810 }
 0x44e   :  { %v6080_v36 = vpop.permute.xlu1 %2814 }
 0x451   :  { %v6086_v2 = vpop.permute.xlu0 %2862 }
 0x4dc   :  { %v2302_v11 = vpop.f32.mrb[22].mxu1 }
 0x4dd   :  { %v4317_v7 = vadd.f32 %v2302_v11, %v5983_v44  ;;  %v2304_v50 = vpop.f32.mrb[23].mxu1 }
 0x4de   :  { %v4318_v22 = vadd.f32 %v2304_v50, %v1394_v3  ;;  %v6092_v3 = vpop.permute.xlu1 %2818 }
 0x4df   :  { %v2737_v40 = vadd.f32 %v4317_v7, %v6068_v61 }
 0x4e0   :  { %v2738_v46 = vadd.f32 %v4318_v22, %v6068_v61  ;;  %v2308_v39 = vpop.f32.mrb[24].mxu1 }
 0x4e1   :  { %v2773_v19 = vmax.f32 %v2737_v40, 0.0  ;;  %v4319_v55 = vadd.f32 %v2308_v39, %v1398_v4  ;;  %v2310_v48 = vpop.f32.mrb[25].mxu1 }
 0x4e2   :  { %v2774_v20 = vmax.f32 %v2738_v46, 0.0  ;;  %v4320_v24 = vadd.f32 %v2310_v48, %v1400_v38  ;;  %v6108_v39 = vpop.permute.xlu1 %2866 }
 0x4e3   :  { %v2746_v56 = vadd.f32 %v4319_v55, %v6072_v63  ;;  %v2825_v44 = vmul.f32 %v6077_v34, %v2773_v19 }
 0x4e4   :  { %v2747_v54 = vadd.f32 %v4320_v24, %v6072_v63  ;;  %v2314_v47 = vpop.f32.mrb[26].mxu1  ;;  %v2826_v8 = vmul.f32 %v6077_v34, %v2774_v20 }
 0x4e5   :  { %v2782_v29 = vmax.f32 %v2746_v56, 0.0  ;;  %v4321_v26 = vadd.f32 %v2314_v47, %v1404_v59  ;;  %v2316_v27 = vpop.f32.mrb[27].mxu1  ;;  %v6090_v30 = vadd.f32 %v6086_v2, %v2825_v44 }
 0x4e6   :  { %v4322_v4 = vadd.f32 %v2316_v27, %v1406_v14  ;;  %v2783_v38 = vmax.f32 %v2747_v54, 0.0  ;;  %v6099_v7 = vadd.f32 %v6086_v2, %v2826_v8  ;;  %v6130_v27 = vpop.permute.xlu0 %2870 }
 0x4e7   :  { %7500 = vst [vmem:[#allocation11_spill] sm:$0xff] %v6090_v30  ;;  %3057 = vrot.lane.b32.xlu0 %v6090_v30, %s4463_s17  ;;  %2913 = vrot.lane.b32.xlu1 %v6090_v30, %s4462_s5  ;;  %v2834_v59 = vmul.f32 %v6080_v36, %v2782_v29  ;;  %v2755_v50 = vadd.f32 %v4321_v26, %v6070_v13 }
 0x4e8   :  { %v2320_v11 = vpop.f32.mrb[28].mxu1  ;;  %v2756_v22 = vadd.f32 %v4322_v4, %v6070_v13  ;;  %v2835_v19 = vmul.f32 %v6080_v36, %v2783_v38 }
 0x4e9   :  { %v4323_v40 = vadd.f32 %v2320_v11, %v1410_v57  ;;  %v2322_v46 = vpop.f32.mrb[29].mxu1  ;;  %v6112_v48 = vadd.f32 %v6108_v39, %v2834_v59  ;;  %v2791_v20 = vmax.f32 %v2755_v50, 0.0 }
 0x4ea   :  { %v4324_v14 = vadd.f32 %v2322_v46, %v1412_v16  ;;  %v2792_v24 = vmax.f32 %v2756_v22, 0.0  ;;  %v6120_v47 = vadd.f32 %v6108_v39, %v2835_v19 }
 0x4eb   :  { %3065 = vrot.lane.b32.xlu0 %v6099_v7, %s4463_s17  ;;  %2921 = vrot.lane.b32.xlu1 %v6099_v7, %s4462_s5  ;;  %7501 = vst [vmem:[#allocation13_spill] sm:$0xff] %v6112_v48  ;;  %v2764_v16 = vadd.f32 %v4323_v40, %v6074_v53  ;;  %v2843_v8 = vmul.f32 %v6092_v3, %v2791_v20  ;;  %v6141_v40 = vpop.permute.xlu1 %2822 }
 0x4ec   :  { %v2391_v55 = vpop.f32.mrb[30].mxu1  ;;  %v2844_v29 = vmul.f32 %v6092_v3, %v2792_v24  ;;  %v2765_v38 = vadd.f32 %v4324_v14, %v6074_v53 }
 0x4ed   :  { %v4325_v56 = vadd.f32 %v2391_v55, %v1481_v33  ;;  %v2393_v57 = vpop.f32.mrb[31].mxu1  ;;  %v2800_v4 = vmax.f32 %v2764_v16, 0.0  ;;  %v6136_v22 = vadd.f32 %v6130_v27, %v2843_v8 }
 0x4ee   :  { %v4326_v44 = vadd.f32 %v2393_v57, %v1483_v6  ;;  %v2801_v14 = vmax.f32 %v2765_v38, 0.0 }
 0x4ef   :  { %3059 = vrot.lane.b32.xlu1 %v6112_v48, %s4463_s17  ;;  %2915 = vrot.lane.b32.xlu0 %v6112_v48, %s4462_s5  ;;  %v2739_v59 = vadd.f32 %v4325_v56, %v6068_v61  ;;  %7502 = vst [vmem:[#allocation17_spill] sm:$0xff] %v6136_v22 }
 0x4f0   :  { %v2397_v54 = vpop.f32.mrb[32].mxu1  ;;  %v2740_v20 = vadd.f32 %v4326_v44, %v6068_v61  ;;  %v2853_v16 = vmul.f32 %v6141_v40, %v2801_v14 }
 0x4f1   :  { %v4327_v33 = vadd.f32 %v2397_v54, %v6056_v23  ;;  %v2399_v26 = vpop.f32.mrb[33].mxu1  ;;  %v2775_v55 = vmax.f32 %v2739_v59, 0.0 }
 0x4f2   :  { %v4328_v6 = vadd.f32 %v2399_v26, %v6058_v10  ;;  %v6139_v10 = vadd.f32 %v6130_v27, %v2844_v29 }
 0x4f3   :  { %3067 = vrot.lane.b32.xlu1 %v6120_v47, %s4463_s17  ;;  %2923 = vrot.lane.b32.xlu0 %v6120_v47, %s4462_s5  ;;  %v2827_v44 = vmul.f32 %v6077_v34, %v2775_v55  ;;  %v2748_v29 = vadd.f32 %v4327_v33, %v6072_v63 }
 0x4f4   :  { %v2403_v11 = vpop.f32.mrb[34].mxu1 }
 0x4f5   :  { %v4329_v50 = vadd.f32 %v2403_v11, %v6060_v18  ;;  %v2405_v23 = vpop.f32.mrb[35].mxu1  ;;  %v2852_v18 = vmul.f32 %v6141_v40, %v2800_v4  ;;  %v6172_v38 = vadd.f32 %v6086_v2, %v2827_v44  ;;  %v2784_v59 = vmax.f32 %v2748_v29, 0.0 }
 0x4f6   :  { %v4330_v46 = vadd.f32 %v2405_v23, %v6062_v49  ;;  %v6156_v49 = vpop.permute.xlu1 %2874  ;;  %v2749_v23 = vadd.f32 %v4328_v6, %v6072_v63 }
 0x4f7   :  { %2917 = vrot.lane.b32.xlu1 %v6136_v22, %s4462_s5  ;;  %2925 = vrot.lane.b32.xlu0 %v6139_v10, %s4462_s5  ;;  %v6160_v8 = vadd.f32 %v6156_v49, %v2852_v18  ;;  %v6169_v26 = vadd.f32 %v6156_v49, %v2853_v16  ;;  %v2836_v18 = vmul.f32 %v6080_v36, %v2784_v59 }
 0x4f8   :  { %v2409_v19 = vpop.f32.mrb[36].mxu1  ;;  %v2785_v55 = vmax.f32 %v2749_v23, 0.0  ;;  %v2757_v59 = vadd.f32 %v4329_v50, %v6070_v13 }
 0x4f9   :  { %v4331_v24 = vadd.f32 %v2409_v19, %v6064_v45  ;;  %v2411_v56 = vpop.f32.mrb[37].mxu1  ;;  %7503 = vst [vmem:[#allocation9_spill] sm:$0xff] %v6160_v8  ;;  %v2776_v45 = vmax.f32 %v2740_v20, 0.0  ;;  %v2758_v20 = vadd.f32 %v4330_v46, %v6070_v13  ;;  %v6196_v16 = vadd.f32 %v6108_v39, %v2836_v18 }
 0x4fa   :  { %v4332_v57 = vadd.f32 %v2411_v56, %v6066_v28  ;;  %v2837_v44 = vmul.f32 %v6080_v36, %v2785_v55  ;;  %v2793_v52 = vmax.f32 %v2757_v59, 0.0 }
 0x4fb   :  { %3061 = vrot.lane.b32.xlu1 %v6136_v22, %s4463_s17  ;;  %3069 = vrot.lane.b32.xlu0 %v6139_v10, %s4463_s17  ;;  %v2828_v11 = vmul.f32 %v6077_v34, %v2776_v45  ;;  %v2794_v45 = vmax.f32 %v2758_v20, 0.0  ;;  %v2766_v18 = vadd.f32 %v4331_v24, %v6074_v53 }
 0x4fc   :  { %v2480_v54 = vpop.f32.mrb[2].mxu1  ;;  %v2767_v24 = vadd.f32 %v4332_v57, %v6074_v53  ;;  %v2845_v21 = vmul.f32 %v6092_v3, %v2793_v52 }
 0x4fd   :  { %v2482_v28 = vpop.f32.mrb[3].mxu1  ;;  %v6185_v19 = vadd.f32 %v6086_v2, %v2828_v11  ;;  %v6208_v11 = vadd.f32 %v6108_v39, %v2837_v44  ;;  %v2846_v23 = vmul.f32 %v6092_v3, %v2794_v45  ;;  %v2802_v1 = vmax.f32 %v2766_v18, 0.0 }
 0x4fe   :  { %v2803_v18 = vmax.f32 %v2767_v24, 0.0  ;;  %v6245_v57 = vadd.f32 %v6130_v27, %v2845_v21 }
 0x4ff   :  { %3063 = vrot.lane.b32.xlu0 %v6160_v8, %s4463_s17  ;;  %2919 = vrot.lane.b32.xlu1 %v6160_v8, %s4462_s5  ;;  %v6222_v44 = vadd.f32 %v6130_v27, %v2846_v23  ;;  %v2854_v59 = vmul.f32 %v6141_v40, %v2802_v1  ;;  %v2741_v23 = vadd.f32 %v6068_v61, %v2480_v54 }
 0x500   :  { %v2486_v4 = vpop.f32.mrb[4].mxu1  ;;  %v2742_v54 = vadd.f32 %v6068_v61, %v2482_v28  ;;  %v2855_v24 = vmul.f32 %v6141_v40, %v2803_v18 }
 0x501   :  { %v6176_v33 = vpop.f32.mrb[5].mxu1  ;;  %v6248_v52 = vadd.f32 %v6156_v49, %v2854_v59  ;;  %v2777_v1 = vmax.f32 %v2741_v23, 0.0  ;;  %v2750_v59 = vadd.f32 %v6072_v63, %v2486_v4 }
 0x502   :  { %v2778_v0 = vmax.f32 %v2742_v54, 0.0  ;;  %v6269_v28 = vadd.f32 %v6156_v49, %v2855_v24  ;;  %v2751_v4 = vadd.f32 %v6072_v63, %v6176_v33 }
 0x503   :  { %2927 = vrot.lane.b32.xlu1 %v6169_v26, %s4462_s5  ;;  %3073 = vrot.lane.b32.xlu0 %v6172_v38, %s4463_s17  ;;  %v2829_v21 = vmul.f32 %v6077_v34, %v2777_v1  ;;  %v2786_v54 = vmax.f32 %v2750_v59, 0.0 }
 0x504   :  { %v6182_v14 = vpop.f32.mrb[6].mxu1  ;;  %v2830_v1 = vmul.f32 %v6077_v34, %v2778_v0  ;;  %v2787_v48 = vmax.f32 %v2751_v4, 0.0 }
 0x505   :  { %v2494_v56 = vpop.f32.mrb[7].mxu1  ;;  %v6274_v18 = vadd.f32 %v6086_v2, %v2829_v21  ;;  %v2838_v21 = vmul.f32 %v6080_v36, %v2786_v54 }
 0x506   :  { %v6286_v24 = vadd.f32 %v6086_v2, %v2830_v1  ;;  %v2760_v0 = vadd.f32 %v6070_v13, %v2494_v56  ;;  %v2839_v59 = vmul.f32 %v6080_v36, %v2787_v48  ;;  %v2759_v1 = vadd.f32 %v6070_v13, %v6182_v14  ;;  %v6314_v48 = vpop.permute.xlu1 %3206 }
 0x507   :  { %3071 = vrot.lane.b32.xlu1 %v6169_v26, %s4463_s17  ;;  %3081 = vrot.lane.b32.xlu0 %v6185_v19, %s4463_s17  ;;  %v6295_v33 = vadd.f32 %v6108_v39, %v2838_v21 }
 0x508   :  { %v6193_v6 = vpop.f32.mrb[8].mxu1  ;;  %7504 = vst [vmem:[#allocation14_spill] sm:$0xff] %v6286_v24  ;;  %v2796_v30 = vmax.f32 %v2760_v0, 0.0  ;;  %v6303_v56 = vadd.f32 %v6108_v39, %v2839_v59  ;;  %v2795_v21 = vmax.f32 %v2759_v1, 0.0 }
 0x509   :  { %v6199_v29 = vpop.f32.mrb[9].mxu1  ;;  %v2768_v4 = vadd.f32 %v6074_v53, %v6193_v6 }
 0x50a   :  { %7505 = vst [vmem:[#allocation12_spill] sm:$0xff] %v6303_v56  ;;  %v2848_v54 = vmul.f32 %v6092_v3, %v2796_v30  ;;  %v2769_v30 = vadd.f32 %v6074_v53, %v6199_v29  ;;  %v2847_v14 = vmul.f32 %v6092_v3, %v2795_v21  ;;  %v6329_v25 = vpop.permute.xlu1 %3254 }
 0x50b   :  { %2929 = vrot.lane.b32.xlu1 %v6172_v38, %s4462_s5  ;;  %2931 = vrot.lane.b32.xlu0 %v6196_v16, %s4462_s5  ;;  %v2804_v59 = vmax.f32 %v2768_v4, 0.0 }
 0x50c   :  { %v6205_v46 = vpop.f32.mrb[10].mxu1  ;;  %v6317_v0 = vadd.f32 %v6130_v27, %v2848_v54  ;;  %v2805_v54 = vmax.f32 %v2769_v30, 0.0  ;;  %v6336_v4 = vadd.f32 %v6130_v27, %v2847_v14 }
 0x50d   :  { %v6213_v55 = vpop.f32.mrb[11].mxu1  ;;  %v2856_v6 = vmul.f32 %v6141_v40, %v2804_v59  ;;  %v2743_v1 = vadd.f32 %v6068_v61, %v6205_v46 }
 0x50e   :  { %7506 = vst [vmem:[#allocation22_spill] sm:$0xff] %v6317_v0  ;;  %7507 = vst [vmem:[#allocation23_spill] sm:$0xff] %v6336_v4  ;;  %v2744_v59 = vadd.f32 %v6068_v61, %v6213_v55  ;;  %v2857_v46 = vmul.f32 %v6141_v40, %v2805_v54 }
 0x50f   :  { %2937 = vrot.lane.b32.xlu1 %v6185_v19, %s4462_s5  ;;  %2939 = vrot.lane.b32.xlu0 %v6208_v11, %s4462_s5  ;;  %v6339_v29 = vadd.f32 %v6156_v49, %v2856_v6  ;;  %v2779_v21 = vmax.f32 %v2743_v1, 0.0  ;;  %v6353_v1 = vpop.permute.xlu0 %3258 }
 0x510   :  { %v6219_v20 = vpop.f32.mrb[12].mxu1  ;;  %v2780_v14 = vmax.f32 %v2744_v59, 0.0  ;;  %v6360_v55 = vadd.f32 %v6156_v49, %v2857_v46 }
 0x511   :  { %v6224_v50 = vpop.f32.mrb[13].mxu1  ;;  %7508 = vst [vmem:[#allocation24_spill] sm:$0xff] %v6339_v29  ;;  %v2831_v30 = vmul.f32 %v6077_v34, %v2779_v21  ;;  %v2752_v6 = vadd.f32 %v6072_v63, %v6219_v20 }
 0x512   :  { %7509 = vst [vmem:[#allocation25_spill] sm:$0xff] %v6360_v55  ;;  %v2832_v21 = vmul.f32 %v6077_v34, %v2780_v14  ;;  %v2753_v20 = vadd.f32 %v6072_v63, %v6224_v50 }
 0x513   :  { %3075 = vrot.lane.b32.xlu1 %v6196_v16, %s4463_s17  ;;  %2941 = vrot.lane.b32.xlu0 %v6222_v44, %s4462_s5  ;;  %v6363_v54 = vadd.f32 %v6086_v2, %v2831_v30  ;;  %v2788_v59 = vmax.f32 %v2752_v6, 0.0  ;;  %v6370_v62 = vpop.permute.xlu0 %3266 }
 0x514   :  { %v6231_v45 = vpop.f32.mrb[14].mxu1  ;;  %v6377_v46 = vadd.f32 %v6086_v2, %v2832_v21  ;;  %v2789_v14 = vmax.f32 %v2753_v20, 0.0 }
 0x515   :  { %v6236_v12 = vpop.f32.mrb[15].mxu1  ;;  %7510 = vst [vmem:[#allocation26_spill] sm:$0xff] %v6363_v54  ;;  %v2840_v30 = vmul.f32 %v6080_v36, %v2788_v59  ;;  %v2761_v20 = vadd.f32 %v6070_v13, %v6231_v45 }
 0x516   :  { %7511 = vst [vmem:[#allocation27_spill] sm:$0xff] %v6377_v46  ;;  %v2762_v6 = vadd.f32 %v6070_v13, %v6236_v12  ;;  %v2841_v21 = vmul.f32 %v6080_v36, %v2789_v14 }
 0x517   :  { %3083 = vrot.lane.b32.xlu1 %v6208_v11, %s4463_s17  ;;  %3085 = vrot.lane.b32.xlu0 %v6222_v44, %s4463_s17  ;;  %v6386_v50 = vpop.permute.xlu0 %3342 }
 0x518   :  { %v6242_v42 = vpop.f32.mrb[16].mxu1  ;;  %v2798_v59 = vmax.f32 %v2762_v6, 0.0  ;;  %v6399_v12 = vadd.f32 %v6108_v39, %v2841_v21  ;;  %v2797_v6 = vmax.f32 %v2761_v20, 0.0 }
 0x519   :  { %v6251_v9 = vpop.f32.mrb[17].mxu1 }
 0x51b   :  { %2933 = vrot.lane.b32.xlu1 %v6245_v57, %s4462_s5  ;;  %2935 = vrot.lane.b32.xlu0 %v6248_v52, %s4462_s5 }
 0x51c   :  { %v6258_v60 = vpop.f32.mrb[18].mxu1 }
 0x51d   :  { %v6262_v23 = vpop.f32.mrb[19].mxu1 }
 0x51f   :  { %3077 = vrot.lane.b32.xlu1 %v6245_v57, %s4463_s17  ;;  %3079 = vrot.lane.b32.xlu0 %v6248_v52, %s4463_s17 }
 0x520   :  { %v6271_v8 = vpop.f32.mrb[20].mxu1 }
 0x521   :  { %v6279_v22 = vpop.f32.mrb[21].mxu1 }
 0x523   :  { %3089 = vrot.lane.b32.xlu0 %v6274_v18, %s4463_s17  ;;  %2943 = vrot.lane.b32.xlu1 %v6269_v28, %s4462_s5 }
 0x527   :  { %3097 = vrot.lane.b32.xlu0 %v6286_v24, %s4463_s17  ;;  %3087 = vrot.lane.b32.xlu1 %v6269_v28, %s4463_s17 }
 0x52b   :  { %2947 = vrot.lane.b32.xlu0 %v6295_v33, %s4462_s5  ;;  %2945 = vrot.lane.b32.xlu1 %v6274_v18, %s4462_s5 }
 0x52f   :  { %2955 = vrot.lane.b32.xlu0 %v6303_v56, %s4462_s5  ;;  %2953 = vrot.lane.b32.xlu1 %v6286_v24, %s4462_s5  ;;  %v6406_v24 = vpop.permute.xlu0 %3354 }
 0x533   :  { %2957 = vrot.lane.b32.xlu0 %v6317_v0, %s4462_s5  ;;  %3091 = vrot.lane.b32.xlu1 %v6295_v33, %s4463_s17 }
 0x537   :  { %3101 = vrot.lane.b32.xlu0 %v6317_v0, %s4463_s17  ;;  %3099 = vrot.lane.b32.xlu1 %v6303_v56, %s4463_s17  ;;  %v6348_v0 = vpop.permute.xlu1 %3210 }
 0x53b   :  { %2951 = vrot.lane.b32.xlu0 %v6339_v29, %s4462_s5  ;;  %2949 = vrot.lane.b32.xlu1 %v6336_v4, %s4462_s5  ;;  %v6368_v56 = vpop.permute.xlu1 %3262 }
 0x53f   :  { %3095 = vrot.lane.b32.xlu0 %v6339_v29, %s4463_s17  ;;  %3093 = vrot.lane.b32.xlu1 %v6336_v4, %s4463_s17  ;;  %v6388_v29 = vpop.permute.xlu1 %3346  ;;  %v6391_v4 = vadd.f32 %v6108_v39, %v2840_v30  ;;  %v2770_v30 = vadd.f32 %v6074_v53, %v6242_v42  ;;  %v6421_v42 = vpop.permute.xlu0 %3202 }
 0x541   :  { %7512 = vst [vmem:[#allocation28_spill] sm:$0xff] %v6391_v4  ;;  %v2806_v45 = vmax.f32 %v2770_v30, 0.0 }
 0x543   :  { %3105 = vrot.lane.b32.xlu0 %v6363_v54, %s4463_s17  ;;  %2959 = vrot.lane.b32.xlu1 %v6360_v55, %s4462_s5  ;;  %v6408_v14 = vpop.permute.xlu1 %3214  ;;  %v2858_v20 = vmul.f32 %v6141_v40, %v2806_v45 }
 0x547   :  { %3113 = vrot.lane.b32.xlu0 %v6377_v46, %s4463_s17  ;;  %3103 = vrot.lane.b32.xlu1 %v6360_v55, %s4463_s17  ;;  %v2850_v55 = vmul.f32 %v6092_v3, %v2798_v59  ;;  %v6423_v59 = vpop.permute.xlu1 %3350 }
 0x549   :  { %v6415_v21 = vadd.f32 %v6130_v27, %v2850_v55  ;;  %v2754_v55 = vadd.f32 %v6258_v60, %v6072_v63 }
 0x54b   :  { %2963 = vrot.lane.b32.xlu0 %v6391_v4, %s4462_s5  ;;  %2961 = vrot.lane.b32.xlu1 %v6363_v54, %s4462_s5  ;;  %7513 = vst [vmem:[#allocation29_spill] sm:$0xff] %v6415_v21  ;;  %v2771_v54 = vadd.f32 %v6074_v53, %v6251_v9  ;;  %v6441_v9 = vadd.f32 %v6156_v49, %v2858_v20 }
 0x54d   :  { %v2807_v30 = vmax.f32 %v2771_v54, 0.0  ;;  %7514 = vst [vmem:[#allocation30_spill] sm:$0xff] %v6441_v9  ;;  %v2772_v54 = vadd.f32 %v6271_v8, %v6074_v53  ;;  %v3270_v53 = vmul.f32 %v6329_v25, %v6099_v7 }
 0x54f   :  { %2971 = vrot.lane.b32.xlu0 %v6399_v12, %s4462_s5  ;;  %2969 = vrot.lane.b32.xlu1 %v6377_v46, %s4462_s5  ;;  %v2849_v46 = vmul.f32 %v6092_v3, %v2797_v6  ;;  %v2790_v6 = vmax.f32 %v2754_v55, 0.0  ;;  %v2859_v63 = vmul.f32 %v6141_v40, %v2807_v30  ;;  %v2808_v30 = vmax.f32 %v2772_v54, 0.0 }
 0x551   :  { %v6438_v35 = vadd.f32 %v6130_v27, %v2849_v46  ;;  %v2860_v7 = vmul.f32 %v6141_v40, %v2808_v30 }
 0x553   :  { %2973 = vrot.lane.b32.xlu0 %v6415_v21, %s4462_s5  ;;  %3107 = vrot.lane.b32.xlu1 %v6391_v4, %s4463_s17  ;;  %v2745_v4 = vadd.f32 %v6068_v61, %v6262_v23  ;;  %v2842_v23 = vmul.f32 %v6080_v36, %v2790_v6  ;;  %v6471_v36 = vadd.f32 %v6156_v49, %v2859_v63 }
 0x554   :  { %v2763_v6 = vadd.f32 %v6070_v13, %v6279_v22 }
 0x555   :  { %v2781_v61 = vmax.f32 %v2745_v4, 0.0  ;;  %v6475_v4 = vadd.f32 %v6108_v39, %v2842_v23  ;;  %v3279_v23 = vmul.f32 %v6353_v1, %v6120_v47 }
 0x556   :  { %v2799_v39 = vmax.f32 %v2763_v6, 0.0  ;;  %v3288_v6 = vmul.f32 %v6368_v56, %v6139_v10  ;;  %v4444_v10 = vld [vmem:[%s7351_s9] sm:$0x1] }
 0x557   :  { %3117 = vrot.lane.b32.xlu0 %v6415_v21, %s4463_s17  ;;  %3115 = vrot.lane.b32.xlu1 %v6399_v12, %s4463_s17  ;;  %v2833_v8 = vmul.f32 %v6077_v34, %v2781_v61  ;;  %7517 = vst [vmem:[#allocation33_spill] sm:$0xff] %v6475_v4 }
 0x558   :  { %v2851_v40 = vmul.f32 %v6092_v3, %v2799_v39 }
 0x559   :  { %v6443_v45 = vpop.permute.xlu0 %3057  ;;  %v6445_v60 = vpop.permute.xlu1 %2913  ;;  %v6489_v34 = vadd.f32 %v6086_v2, %v2833_v8  ;;  %v6503_v2 = vadd.f32 %v6156_v49, %v2860_v7 }
 0x55a   :  { %7515 = vst [vmem:[#allocation31_spill] sm:$0xff] %v6443_v45  ;;  %7516 = vst [vmem:[#allocation32_spill] sm:$0xff] %v6445_v60  ;;  %v6525_v3 = vadd.f32 %v6130_v27, %v2851_v40 }
 0x55b   :  { %2967 = vrot.lane.b32.xlu0 %v6441_v9, %s4462_s5  ;;  %2965 = vrot.lane.b32.xlu1 %v6438_v35, %s4462_s5  ;;  %7520 = vst [vmem:[#allocation36_spill] sm:$0xff] %v6489_v34  ;;  %7521 = vst [vmem:[#allocation37_spill] sm:$0xff] %v6503_v2 }
 0x55c   :  { %7523 = vst [vmem:[#allocation39_spill] sm:$0xff] %v6525_v3 }
 0x55d   :  { %v6455_v46 = vpop.permute.xlu0 %3065  ;;  %v6457_v20 = vpop.permute.xlu1 %2921 }
 0x55e   :  { %v3013_v55 = vsel %vm726_vm9, %v6445_v60, %v6457_v20 }
 0x55f   :  { %v3022_v45 = vmul.f32 %v3013_v55, %v5216_v41  ;;  %3111 = vrot.lane.b32.xlu0 %v6441_v9, %s4463_s17  ;;  %3109 = vrot.lane.b32.xlu1 %v6438_v35, %s4463_s17 }
 0x561   :  { %v3218_v55 = vmul.f32 %v6421_v42, %v3022_v45  ;;  %v6480_v60 = vpop.permute.xlu1 %3059  ;;  %v6482_v9 = vpop.permute.xlu0 %2915 }
 0x562   :  { %7518 = vst [vmem:[#allocation34_spill] sm:$0xff] %v6480_v60  ;;  %7519 = vst [vmem:[#allocation35_spill] sm:$0xff] %v6482_v9 }
 0x563   :  { %v3306_v21 = vadd.f32 %v3270_v53, %v3218_v55  ;;  %2979 = vrot.lane.b32.xlu0 %v6475_v4, %s4462_s5  ;;  %2975 = vrot.lane.b32.xlu1 %v6471_v36, %s4462_s5 }
 0x565   :  { %v6492_v13 = vpop.permute.xlu1 %3067  ;;  %v2924_v22 = vpop.permute.xlu0 %2923 }
 0x566   :  { %v3014_v45 = vsel %vm726_vm9, %v6482_v9, %v2924_v22 }
 0x567   :  { %v3031_v63 = vmul.f32 %v3014_v45, %v5216_v41  ;;  %3121 = vrot.lane.b32.xlu0 %v6489_v34, %s4463_s17  ;;  %3123 = vrot.lane.b32.xlu1 %v6475_v4, %s4463_s17 }
 0x569   :  { %v3227_v61 = vmul.f32 %v6314_v48, %v3031_v63  ;;  %v6509_v54 = vpop.permute.xlu1 %2917  ;;  %v6511_v53 = vpop.permute.xlu0 %2925 }
 0x56a   :  { %7522 = vst [vmem:[#allocation38_spill] sm:$0xff] %v6509_v54  ;;  %v3015_v8 = vsel %vm726_vm9, %v6509_v54, %v6511_v53 }
 0x56b   :  { %v6517_v30 = vadd.f32 %v3279_v23, %v3227_v61  ;;  %v3040_v49 = vmul.f32 %v3015_v8, %v5216_v41  ;;  %2983 = vrot.lane.b32.xlu0 %v6503_v2, %s4462_s5  ;;  %2977 = vrot.lane.b32.xlu1 %v6489_v34, %s4462_s5 }
 0x56d   :  { %v3236_v47 = vmul.f32 %v6348_v0, %v3040_v49  ;;  %v6530_v55 = vpop.permute.xlu1 %3061  ;;  %v6532_v7 = vpop.permute.xlu0 %3069 }
 0x56e   :  { %7524 = vst [vmem:[#allocation40_spill] sm:$0xff] %v6530_v55 }
 0x56f   :  { %v6534_v39 = vadd.f32 %v3288_v6, %v3236_v47  ;;  %3127 = vrot.lane.b32.xlu0 %v6503_v2, %s4463_s17  ;;  %2981 = vrot.lane.b32.xlu1 %v6525_v3, %s4462_s5  ;;  %v3297_v6 = vmul.f32 %v6370_v62, %v6169_v26 }
 0x571   :  { %v6540_v45 = vpop.permute.xlu0 %3063  ;;  %v6542_v27 = vpop.permute.xlu1 %2919 }
 0x572   :  { %7525 = vst [vmem:[#allocation41_spill] sm:$0xff] %v6540_v45  ;;  %7526 = vst [vmem:[#allocation42_spill] sm:$0xff] %v6542_v27 }
 0x573   :  { %3537 = vperm.xlu0 %4436, %v4444_v10   ;;  %3125 = vrot.lane.b32.xlu1 %v6525_v3, %s4463_s17 }
 0x575   :  { %v6549_v63 = vpop.permute.xlu1 %2927  ;;  %v3074_v40 = vpop.permute.xlu0 %3073 }
 0x576   :  { %v3016_v61 = vsel %vm726_vm9, %v6542_v27, %v6549_v63  ;;  %v3153_v23 = vsel %vm810_vm1, %v6455_v46, %v3074_v40 }
 0x577   :  { %v3049_v8 = vmul.f32 %v3016_v61, %v5216_v41  ;;  %v3166_v49 = vmul.f32 %v3153_v23, %v7493_v51  ;;  %3119 = vrot.lane.b32.xlu1 %v6471_v36, %s4463_s17  ;;  %4439 = vset.pattern.permute.xlu0 %v7489_v17 }
 0x579   :  { %v3245_v47 = vmul.f32 %v6408_v14, %v3049_v8  ;;  %v3358_v54 = vmul.f32 %v6386_v50, %v3166_v49  ;;  %v6567_v27 = vpop.permute.xlu1 %3071  ;;  %v6569_v9 = vpop.permute.xlu0 %3081 }
 0x57a   :  { %v3149_v41 = vsel %vm810_vm1, %v3074_v40, %v6569_v9 }
 0x57b   :  { %v6574_v61 = vadd.f32 %v3297_v6, %v3245_v47  ;;  %v3394_v23 = vadd.f32 %v3358_v54, %v3306_v21  ;;  %3511 = vperm.xlu1 %4437, %v4444_v10   ;;  %v3167_v8 = vmul.f32 %v3149_v41, %v7496_v5  ;;  %v3271_v54 = vmul.f32 %v6329_v25, %v6172_v38 }
 0x57c   :  { %v3272_v41 = vmul.f32 %v6329_v25, %v6185_v19 }
 0x57d   :  { %v2930_v3 = vpop.permute.xlu1 %2929  ;;  %v2932_v2 = vpop.permute.xlu0 %2931  ;;  %v3359_v6 = vmul.f32 %v6386_v50, %v3167_v8 }
 0x57e   :  { %v3009_v26 = vsel %vm726_vm9, %v6457_v20, %v2930_v3  ;;  %v3010_v49 = vsel %vm726_vm9, %v2924_v22, %v2932_v2  ;;  %v3280_v20 = vmul.f32 %v6353_v1, %v6196_v16 }
 0x57f   :  { %v3023_v34 = vmul.f32 %v3009_v26, %v7483_v58  ;;  %v3032_v45 = vmul.f32 %v3010_v49, %v7483_v58  ;;  %4438 = vset.pattern.permute.xlu1 %v7489_v17 }
 0x580   :  { %3554 = vperm.xlu1 %4438, %v4444_v10  }
 0x581   :  { %v3219_v21 = vmul.f32 %v6421_v42, %v3023_v34  ;;  %v3228_v40 = vmul.f32 %v6314_v48, %v3032_v45  ;;  %v6591_v47 = vpop.permute.xlu1 %2937  ;;  %v6593_v22 = vpop.permute.xlu0 %2939 }
 0x582   :  { %v3005_v17 = vsel %vm726_vm9, %v2930_v3, %v6591_v47  ;;  %v3006_v34 = vsel %vm726_vm9, %v2932_v2, %v6593_v22  ;;  %v3281_v3 = vmul.f32 %v6353_v1, %v6208_v11 }
 0x583   :  { %v3307_v38 = vadd.f32 %v3271_v54, %v3219_v21  ;;  %v3316_v10 = vadd.f32 %v3280_v20, %v3228_v40  ;;  %v3024_v45 = vmul.f32 %v3005_v17, %v7485_v31  ;;  %v3033_v16 = vmul.f32 %v3006_v34, %v7485_v31 }
 0x585   :  { %v3395_v26 = vadd.f32 %v3359_v6, %v3307_v38  ;;  %v3220_v8 = vmul.f32 %v6421_v42, %v3024_v45  ;;  %v3229_v49 = vmul.f32 %v6314_v48, %v3033_v16  ;;  %v3076_v55 = vpop.permute.xlu1 %3075  ;;  %v6610_v4 = vpop.permute.xlu0 %2941 }
 0x586   :  { %v3154_v2 = vsel %vm810_vm1, %v6492_v13, %v3076_v55 }
 0x587   :  { %v3308_v21 = vadd.f32 %v3272_v41, %v3220_v8  ;;  %v6615_v54 = vadd.f32 %v3281_v3, %v3229_v49  ;;  %v3175_v19 = vmul.f32 %v3154_v2, %v7493_v51 }
 0x589   :  { %v3367_v40 = vmul.f32 %v6388_v29, %v3175_v19  ;;  %v6619_v20 = vpop.permute.xlu1 %3083  ;;  %v6621_v6 = vpop.permute.xlu0 %3085  ;;  %v3289_v19 = vmul.f32 %v6368_v56, %v6245_v57 }
 0x58a   :  { %v3150_v11 = vsel %vm810_vm1, %v3076_v55, %v6619_v20 }
 0x58b   :  { %v3403_v17 = vadd.f32 %v3367_v40, %v6517_v30  ;;  %v3176_v34 = vmul.f32 %v3150_v11, %v7496_v5  ;;  %v3290_v40 = vmul.f32 %v6368_v56, %v6222_v44 }
 0x58d   :  { %v3438_v38 = vadd.f32 %v3403_v17, %v3394_v23  ;;  %v3368_v45 = vmul.f32 %v6388_v29, %v3176_v34  ;;  %v2934_v16 = vpop.permute.xlu1 %2933  ;;  %v2936_v41 = vpop.permute.xlu0 %2935 }
 0x58e   :  { %v3007_v8 = vsel %vm726_vm9, %v2934_v16, %v6610_v4  ;;  %v3011_v49 = vsel %vm726_vm9, %v6511_v53, %v2934_v16  ;;  %v3012_v55 = vsel %vm726_vm9, %v6549_v63, %v2936_v41  ;;  %v3298_v53 = vmul.f32 %v6370_v62, %v6248_v52 }
 0x58f   :  { %v3404_v30 = vadd.f32 %v3368_v45, %v3316_v10  ;;  %v3041_v3 = vmul.f32 %v3011_v49, %v7483_v58  ;;  %v3042_v23 = vmul.f32 %v3007_v8, %v7485_v31  ;;  %v3050_v2 = vmul.f32 %v3012_v55, %v7483_v58 }
 0x591   :  { %v3447_v11 = vadd.f32 %v3404_v30, %v3395_v26  ;;  %v3237_v17 = vmul.f32 %v6348_v0, %v3041_v3  ;;  %v3238_v63 = vmul.f32 %v6348_v0, %v3042_v23  ;;  %v3246_v10 = vmul.f32 %v6408_v14, %v3050_v2  ;;  %v3078_v34 = vpop.permute.xlu1 %3077  ;;  %v3080_v45 = vpop.permute.xlu0 %3079 }
 0x592   :  { %v3151_v58 = vsel %vm810_vm1, %v3078_v34, %v6621_v6  ;;  %v3155_v44 = vsel %vm810_vm1, %v6532_v7, %v3078_v34  ;;  %v3156_v57 = vsel %vm810_vm1, %v6567_v27, %v3080_v45 }
 0x593   :  { %v3325_v52 = vadd.f32 %v3289_v19, %v3237_v17  ;;  %v6659_v26 = vadd.f32 %v3290_v40, %v3238_v63  ;;  %v3334_v16 = vadd.f32 %v3298_v53, %v3246_v10  ;;  %v3184_v8 = vmul.f32 %v3155_v44, %v7493_v51 }
 0x594   :  { %v3185_v49 = vmul.f32 %v3151_v58, %v7496_v5  ;;  %v3193_v55 = vmul.f32 %v3156_v57, %v7493_v51 }
 0x595   :  { %v3376_v30 = vmul.f32 %v6423_v59, %v3184_v8  ;;  %v3090_v3 = vpop.permute.xlu0 %3089  ;;  %v6665_v23 = vpop.permute.xlu1 %2943 }
 0x596   :  { %v3377_v2 = vmul.f32 %v6423_v59, %v3185_v49  ;;  %v3385_v34 = vmul.f32 %v6406_v24, %v3193_v55  ;;  %v3145_v19 = vsel %vm810_vm1, %v6569_v9, %v3090_v3  ;;  %v3008_v40 = vsel %vm726_vm9, %v2936_v41, %v6665_v23 }
 0x597   :  { %v3412_v53 = vadd.f32 %v3376_v30, %v6534_v39  ;;  %v3168_v51 = vmul.f32 %v3145_v19, %v7495_v15  ;;  %v3051_v17 = vmul.f32 %v3008_v40, %v7485_v31  ;;  %v3299_v9 = vmul.f32 %v6370_v62, %v6269_v28 }
 0x598   :  { %v3413_v63 = vadd.f32 %v3377_v2, %v3325_v52  ;;  %v3421_v10 = vadd.f32 %v3385_v34, %v6574_v61  ;;  %v3282_v19 = vmul.f32 %v6353_v1, %v6295_v33 }
 0x599   :  { %v3439_v58 = vadd.f32 %v3438_v38, %v3412_v53  ;;  %v3360_v44 = vmul.f32 %v6386_v50, %v3168_v51  ;;  %v3247_v57 = vmul.f32 %v6408_v14, %v3051_v17  ;;  %v6683_v8 = vpop.permute.xlu0 %3097  ;;  %v3088_v41 = vpop.permute.xlu1 %3087  ;;  %v3273_v53 = vmul.f32 %v6329_v25, %v6274_v18 }
 0x59a   :  { %v3448_v49 = vadd.f32 %v3447_v11, %v3413_v63  ;;  %v3141_v39 = vsel %vm810_vm1, %v3090_v3, %v6683_v8  ;;  %v3152_v31 = vsel %vm810_vm1, %v3080_v45, %v3088_v41 }
 0x59b   :  { %v6690_v61 = vadd.f32 %v3439_v58, %v3421_v10  ;;  %v3396_v38 = vadd.f32 %v3360_v44, %v3308_v21  ;;  %v6692_v52 = vadd.f32 %v3299_v9, %v3247_v57  ;;  %v3194_v55 = vmul.f32 %v3152_v31, %v7496_v5  ;;  %v7527_v58 = vld [vmem:[#allocation18_spill] sm:$0xff] }
 0x59c   :  { %v3169_v21 = vmul.f32 %v3141_v39, %v5371_v43  ;;  %v7528_v39 = vld [vmem:[#allocation14_spill] sm:$0xff] }
 0x59d   :  { %v6695_v30 = vpop.permute.xlu0 %2947  ;;  %v2946_v28 = vpop.permute.xlu1 %2945  ;;  %v3386_v2 = vmul.f32 %v6406_v24, %v3194_v55  ;;  %v3274_v31 = vmul.f32 %v6329_v25, %v7528_v39  ;;  %v7530_v39 = vld [vmem:[#allocation24_spill] sm:$0xff] }
 0x59e   :  { %v3002_v11 = vsel %vm726_vm9, %v6593_v22, %v6695_v30  ;;  %v3001_v45 = vsel %vm726_vm9, %v6591_v47, %v2946_v28  ;;  %v3361_v63 = vmul.f32 %v6386_v50, %v3169_v21 }
 0x59f   :  { %v3034_v3 = vmul.f32 %v3002_v11, %v7487_v32  ;;  %v3025_v5 = vmul.f32 %v3001_v45, %v7487_v32  ;;  %v3422_v34 = vadd.f32 %v3386_v2, %v3334_v16 }
 0x5a1   :  { %v3230_v40 = vmul.f32 %v6314_v48, %v3034_v3  ;;  %v3221_v22 = vmul.f32 %v6421_v42, %v3025_v5  ;;  %v6714_v51 = vpop.permute.xlu0 %2955  ;;  %v6716_v47 = vpop.permute.xlu1 %2953  ;;  %v6718_v17 = vadd.f32 %v3448_v49, %v3422_v34 }
 0x5a2   :  { %v2997_v16 = vsel %vm726_vm9, %v2946_v28, %v6716_v47 }
 0x5a3   :  { %v3318_v33 = vadd.f32 %v3282_v19, %v3230_v40  ;;  %v3309_v10 = vadd.f32 %v3273_v53, %v3221_v22  ;;  %v3026_v44 = vmul.f32 %v2997_v16, %v7527_v58 }
 0x5a5   :  { %v3397_v57 = vadd.f32 %v3361_v63, %v3309_v10  ;;  %v6725_v18 = vpop.permute.xlu0 %2957  ;;  %v3092_v9 = vpop.permute.xlu1 %3091  ;;  %v3222_v49 = vmul.f32 %v6421_v42, %v3026_v44  ;;  %v7529_v10 = vld [vmem:[#allocation23_spill] sm:$0xff] }
 0x5a6   :  { %v3146_v55 = vsel %vm810_vm1, %v6619_v20, %v3092_v9  ;;  %v3291_v44 = vmul.f32 %v6368_v56, %v7529_v10 }
 0x5a7   :  { %v3177_v28 = vmul.f32 %v3146_v55, %v7495_v15  ;;  %v6734_v2 = vadd.f32 %v3274_v31, %v3222_v49  ;;  %v3300_v31 = vmul.f32 %v6370_v62, %v7530_v39 }
 0x5a9   :  { %v3369_v11 = vmul.f32 %v6388_v29, %v3177_v28  ;;  %v6737_v45 = vpop.permute.xlu0 %3101  ;;  %v6739_v21 = vpop.permute.xlu1 %3099 }
 0x5aa   :  { %v3142_v3 = vsel %vm810_vm1, %v3092_v9, %v6739_v21 }
 0x5ab   :  { %v3405_v5 = vadd.f32 %v3369_v11, %v6615_v54  ;;  %v3178_v34 = vmul.f32 %v3142_v3, %v5371_v43 }
 0x5ad   :  { %v3456_v19 = vadd.f32 %v3405_v5, %v3396_v38  ;;  %v3370_v20 = vmul.f32 %v6388_v29, %v3178_v34  ;;  %v6747_v40 = vpop.permute.xlu0 %2951  ;;  %v6749_v53 = vpop.permute.xlu1 %2949 }
 0x5ae   :  { %v3004_v22 = vsel %vm726_vm9, %v6665_v23, %v6747_v40  ;;  %v3003_v16 = vsel %vm726_vm9, %v6610_v4, %v6749_v53 }
 0x5af   :  { %v3406_v54 = vadd.f32 %v3370_v20, %v3318_v33  ;;  %v3052_v63 = vmul.f32 %v3004_v22, %v7487_v32  ;;  %v3043_v38 = vmul.f32 %v3003_v16, %v7487_v32 }
 0x5b1   :  { %v3465_v9 = vadd.f32 %v3406_v54, %v3397_v57  ;;  %v3248_v49 = vmul.f32 %v6408_v14, %v3052_v63  ;;  %v3239_v23 = vmul.f32 %v6348_v0, %v3043_v38  ;;  %v3096_v55 = vpop.permute.xlu0 %3095  ;;  %v3094_v28 = vpop.permute.xlu1 %3093  ;;  %v3803_v63 = vld [vmem:[%s7356_s3 + $0x18] sm:$0xff]  ;;  %v3800_v38 = vld [vmem:[%s7356_s3] sm:$0xff] }
 0x5b2   :  { %v3148_v4 = vsel %vm810_vm1, %v3088_v41, %v3096_v55  ;;  %v3143_v32 = vsel %vm810_vm1, %v3094_v28, %v6737_v45  ;;  %v3147_v33 = vsel %vm810_vm1, %v6621_v6, %v3094_v28 }
 0x5b3   :  { %v3336_v57 = vadd.f32 %v3300_v31, %v3248_v49  ;;  %v3327_v11 = vadd.f32 %v3291_v44, %v3239_v23  ;;  %v3195_v3 = vmul.f32 %v3148_v4, %v7495_v15  ;;  %v3186_v5 = vmul.f32 %v3147_v33, %v7495_v15  ;;  %v3801_v15 = vld [vmem:[%s7356_s3 + $0x8] sm:$0xff]  ;;  %v3807_v23 = vld [vmem:[%s7356_s3 + $0x38] sm:$0xff]  ;;  %v3804_v33 = vld [vmem:[%s7356_s3 + $0x20] sm:$0xff] }
 0x5b4   :  { %v3187_v34 = vmul.f32 %v3143_v32, %v5371_v43  ;;  %v7531_v44 = vld [vmem:[#allocation19_spill] sm:$0xff]  ;;  %v4279_v31 = vpack.c.bf16 %v3803_v63, %v3801_v15 }
 0x5b5   :  { %v3387_v20 = vmul.f32 %v6406_v24, %v3195_v3  ;;  %v6779_v22 = vpop.permute.xlu0 %3105  ;;  %v6781_v41 = vpop.permute.xlu1 %2959  ;;  %v3378_v16 = vmul.f32 %v6423_v59, %v3186_v5  ;;  %v3805_v49 = vld [vmem:[%s7356_s3 + $0x28] sm:$0xff]  ;;  %v3806_v3 = vld [vmem:[%s7356_s3 + $0x30] sm:$0xff] }
 0x5b6   :  { %v3379_v54 = vmul.f32 %v6423_v59, %v3187_v34  ;;  %v3137_v6 = vsel %vm810_vm1, %v6683_v8, %v6779_v22  ;;  %v3802_v8 = vld [vmem:[%s7356_s3 + $0x10] sm:$0xff]  ;;  %4280 = vmatprep.subr.bf16.mxu0 %v4279_v31  ;;  %v4285_v15 = vpack.c.bf16 %v3806_v3, %v3804_v33  ;;  %v7535_v33 = vld [vmem:[#allocation13_spill] sm:$0xff] }
 0x5b7   :  { %v3423_v10 = vadd.f32 %v3387_v20, %v6692_v52  ;;  %v3170_v39 = vmul.f32 %v3137_v6, %v7531_v44  ;;  %v3414_v28 = vadd.f32 %v3378_v16, %v6659_v26  ;;  %v4281_v32 = vpack.c.bf16 %v3802_v8, %v3800_v38  ;;  %v3809_v26 = vld [vmem:[%s7356_s3 + $0x48] sm:$0xff] }
 0x5b8   :  { %v3415_v4 = vadd.f32 %v3379_v54, %v3327_v11  ;;  %v4283_v52 = vpack.c.bf16 %v3807_v23, %v3805_v49  ;;  %v3811_v11 = vld [vmem:[%s7356_s3 + $0x58] sm:$0xff]  ;;  %v6863_v3 = vmul.f32 %v6353_v1, %v7535_v33 }
 0x5b9   :  { %v3362_v5 = vmul.f32 %v6386_v50, %v3170_v39  ;;  %v6817_v34 = vpop.permute.xlu0 %3113  ;;  %v6819_v20 = vpop.permute.xlu1 %3103  ;;  %v3457_v16 = vadd.f32 %v3456_v19, %v3414_v28  ;;  %4282 = vmatpush1.bf16.msra.mxu0 %v4281_v32  ;;  %v3808_v39 = vld [vmem:[%s7356_s3 + $0x40] sm:$0xff]  ;;  %v3810_v19 = vld [vmem:[%s7356_s3 + $0x50] sm:$0xff]  ;;  %v4287_v31 = vpack.c.bf16 %v3811_v11, %v3809_v26 }
 0x5ba   :  { %v3466_v54 = vadd.f32 %v3465_v9, %v3415_v4  ;;  %v3144_v6 = vsel %vm810_vm1, %v3096_v55, %v6819_v20  ;;  %4284 = vmatprep.subr.bf16.mxu0 %v4283_v52  ;;  %v7532_v28 = vld [vmem:[#allocation20_spill] sm:$0xff]  ;;  %v7533_v32 = vld [vmem:[#allocation11_spill] sm:$0xff]  ;;  %v7536_v26 = vld [vmem:[#allocation26_spill] sm:$0xff] }
 0x5bb   :  { %v6831_v63 = vadd.f32 %v3362_v5, %v6734_v2  ;;  %v3196_v38 = vmul.f32 %v3144_v6, %v5371_v43  ;;  %v6840_v9 = vadd.f32 %v3457_v16, %v3423_v10  ;;  %v2998_v2 = vsel %vm726_vm9, %v6695_v30, %v6714_v51  ;;  %v7537_v6 = vld [vmem:[#allocation17_spill] sm:$0xff] }
 0x5bc   :  { %v4289_v10 = vpack.c.bf16 %v3810_v19, %v3808_v39  ;;  %v6858_v30 = vmul.f32 %v6329_v25, %v7533_v32  ;;  %v3035_v52 = vmul.f32 %v2998_v2, %v7527_v58  ;;  %v7540_v19 = vld [vmem:[#allocation22_spill] sm:$0xff]  ;;  %v7541_v2 = vld [vmem:[#allocation9_spill] sm:$0xff] }
 0x5bd   :  { %v3388_v55 = vmul.f32 %v6406_v24, %v3196_v38  ;;  %v6847_v43 = vpop.permute.xlu0 %2963  ;;  %v6849_v8 = vpop.permute.xlu1 %2961  ;;  %4286 = vmatpush1.bf16.msra.mxu0 %v4285_v15  ;;  %v6876_v15 = vmul.f32 %v6368_v56, %v7537_v6  ;;  %v7539_v38 = vld [vmem:[#allocation12_spill] sm:$0xff] }
 0x5be   :  { %v2993_v49 = vsel %vm726_vm9, %v6716_v47, %v6849_v8  ;;  %4288 = vmatprep.subr.bf16.mxu0 %v4287_v31  ;;  %7534 = vst [vmem:[#allocation18_spill] sm:$0xff] %v6858_v30  ;;  %v3275_v47 = vmul.f32 %v6329_v25, %v7536_v26  ;;  %v3283_v39 = vmul.f32 %v6353_v1, %v7539_v38  ;;  %v7545_v26 = vld [vmem:[#allocation27_spill] sm:$0xff] }
 0x5bf   :  { %v3424_v23 = vadd.f32 %v3388_v55, %v3336_v57  ;;  %v3027_v4 = vmul.f32 %v2993_v49, %v7532_v28  ;;  %7538 = vst [vmem:[#allocation14_spill] sm:$0xff] %v6876_v15  ;;  %v2994_v31 = vsel %vm726_vm9, %v6714_v51, %v6847_v43  ;;  %v6890_v55 = vmul.f32 %v6370_v62, %v7541_v2  ;;  %v7543_v49 = vld [vmem:[#allocation25_spill] sm:$0xff] }
 0x5c0   :  { %v6900_v6 = vmul.f32 %v6329_v25, %v7545_v26  ;;  %v3231_v38 = vmul.f32 %v6314_v48, %v3035_v52  ;;  %v6905_v51 = vmul.f32 %v6353_v1, %v6399_v12  ;;  %v7549_v12 = vld [vmem:[#allocation30_spill] sm:$0xff] }
 0x5c1   :  { %v6865_v5 = vadd.f32 %v3466_v54, %v3424_v23  ;;  %v3223_v57 = vmul.f32 %v6421_v42, %v3027_v4  ;;  %v6870_v11 = vpop.permute.xlu0 %2971  ;;  %v6872_v16 = vpop.permute.xlu1 %2969  ;;  %v6882_v54 = vmul.f32 %v6368_v56, %v7540_v19  ;;  %7542 = vst [vmem:[#allocation23_spill] sm:$0xff] %v6890_v55  ;;  %4290 = vmatpush1.bf16.msra.mxu0 %v4289_v10  ;;  %v7544_v4 = vld [vmem:[#allocation28_spill] sm:$0xff]  ;;  %v7546_v19 = vld [vmem:[#allocation29_spill] sm:$0xff] }
 0x5c2   :  { %v6894_v23 = vmul.f32 %v6370_v62, %v7543_v49  ;;  %v3284_v32 = vmul.f32 %v6353_v1, %v7544_v4  ;;  %v6909_v10 = vmul.f32 %v6368_v56, %v6438_v35  ;;  %v6913_v2 = vmul.f32 %v6368_v56, %v7546_v19 }
 0x5c3   :  { %v3311_v33 = vadd.f32 %v3275_v47, %v3223_v57  ;;  %v7548_v47 = vld [vmem:[#allocation31_spill] sm:$0xff]  ;;  %v3036_v49 = vmul.f32 %v2994_v31, %v7532_v28  ;;  %v6924_v26 = vmul.f32 %v6370_v62, %v7549_v12  ;;  %v6928_v35 = vmul.f32 %v6370_v62, %v6471_v36  ;;  %v7551_v12 = vld [vmem:[#allocation33_spill] sm:$0xff]  ;;  %v7553_v36 = vld [vmem:[#allocation40_spill] sm:$0xff] }
 0x5c4   :  { %7547 = vst [vmem:[#allocation24_spill] sm:$0xff] %v6913_v2  ;;  %v3157_v57 = vsel %vm810_vm1, %v7548_v47, %v6455_v46  ;;  %v3158_v19 = vsel %vm810_vm1, %v6480_v60, %v6492_v13  ;;  %v3133_v46 = vsel %vm810_vm1, %v6779_v22, %v6817_v34  ;;  %v6943_v15 = vmul.f32 %v6353_v1, %v7551_v12  ;;  %v7554_v13 = vld [vmem:[#allocation41_spill] sm:$0xff]  ;;  %v7555_v60 = vld [vmem:[#allocation8_spill] sm:$0xff] }
 0x5c5   :  { %v6920_v52 = vpop.permute.xlu0 %2973  ;;  %v3108_v4 = vpop.permute.xlu1 %3107  ;;  %7550 = vst [vmem:[#allocation19_spill] sm:$0xff] %v6928_v35  ;;  %v3159_v35 = vsel %vm810_vm1, %v7553_v36, %v6532_v7  ;;  %v3160_v30 = vsel %vm810_vm1, %v7554_v13, %v6567_v27  ;;  %v3441_v22 = vrot.slane %v6690_v61, 4  ;;  %v3319_v47 = vadd.f32 %v3283_v39, %v3231_v38  ;;  %v7556_v12 = vld [vmem:[#allocation36_spill] sm:$0xff]  ;;  %v7558_v36 = vld [vmem:[#allocation21_spill] sm:$0xff] }
 0x5c6   :  { %v3138_v31 = vsel %vm810_vm1, %v6739_v21, %v3108_v4  ;;  %7552 = vst [vmem:[#allocation20_spill] sm:$0xff] %v6943_v15  ;;  %v3165_v21 = vmul.f32 %v3157_v57, %v7555_v60  ;;  %v2999_v1 = vsel %vm726_vm9, %v6749_v53, %v6725_v18  ;;  %v6962_v7 = vmul.f32 %v6329_v25, %v7556_v12 }
 0x5c7   :  { %v3179_v55 = vmul.f32 %v3138_v31, %v7531_v44  ;;  %v3000_v27 = vsel %vm726_vm9, %v6747_v40, %v6781_v41  ;;  %v3171_v13 = vmul.f32 %v3133_v46, %v7558_v36  ;;  %v3232_v31 = vmul.f32 %v6314_v48, %v3036_v49 }
 0x5c8   :  { %7557 = vst [vmem:[#allocation11_spill] sm:$0xff] %v6962_v7  ;;  %v3174_v53 = vmul.f32 %v3158_v19, %v7555_v60  ;;  %v3183_v25 = vmul.f32 %v3159_v35, %v7555_v60  ;;  %v3192_v12 = vmul.f32 %v3160_v30, %v7555_v60  ;;  %v6982_v46 = vadd.f32 %v3441_v22, %v6690_v61  ;;  %v7559_v7 = vld [vmem:[#allocation37_spill] sm:$0xff]  ;;  %v7560_v30 = vld [vmem:[#allocation39_spill] sm:$0xff] }
 0x5c9   :  { %v3371_v39 = vmul.f32 %v6388_v29, %v3179_v55  ;;  %v6971_v38 = vpop.permute.xlu0 %3117  ;;  %v6973_v57 = vpop.permute.xlu1 %3115  ;;  %v6987_v15 = vmul.f32 %v6370_v62, %v7559_v7  ;;  %v3450_v19 = vrot.slane %v6718_v17, 4  ;;  %v3044_v35 = vmul.f32 %v2999_v1, %v7527_v58 }
 0x5ca   :  { %v3134_v40 = vsel %vm810_vm1, %v3108_v4, %v6973_v57  ;;  %v3053_v60 = vmul.f32 %v3000_v27, %v7527_v58  ;;  %v6994_v2 = vmul.f32 %v6368_v56, %v7560_v30  ;;  %v3363_v61 = vmul.f32 %v6386_v50, %v3171_v13 }
 0x5cb   :  { %v3407_v49 = vadd.f32 %v3371_v39, %v3319_v47  ;;  %v3180_v55 = vmul.f32 %v3134_v40, %v7558_v36  ;;  %v3320_v4 = vadd.f32 %v3284_v32, %v3232_v31  ;;  %v7002_v7 = vmul.f32 %v6386_v50, %v3165_v21 }
 0x5cc   :  { %v7005_v1 = vmul.f32 %v6388_v29, %v3174_v53  ;;  %v7008_v58 = vmul.f32 %v6423_v59, %v3183_v25  ;;  %v7011_v56 = vmul.f32 %v6406_v24, %v3192_v12  ;;  %v3443_v32 = vrot.slane %v6982_v46, 2 }
 0x5cd   :  { %v3474_v47 = vadd.f32 %v3407_v49, %v6831_v63  ;;  %v3372_v22 = vmul.f32 %v6388_v29, %v3180_v55  ;;  %v6999_v39 = vpop.permute.xlu0 %2967  ;;  %v2966_v62 = vpop.permute.xlu1 %2965  ;;  %v3459_v63 = vrot.slane %v6840_v9, 4  ;;  %v3399_v13 = vadd.f32 %v3363_v61, %v3311_v33 }
 0x5ce   :  { %v7016_v31 = vadd.f32 %v3450_v19, %v6718_v17  ;;  %v3240_v21 = vmul.f32 %v6348_v0, %v3044_v35  ;;  %v3468_v53 = vrot.slane %v6865_v5, 4  ;;  %v2990_v25 = vsel %vm726_vm9, %v6847_v43, %v6870_v11 }
 0x5cf   :  { %v3408_v27 = vadd.f32 %v3372_v22, %v3320_v4  ;;  %v3249_v12 = vmul.f32 %v6408_v14, %v3053_v60  ;;  %v2989_v33 = vsel %vm726_vm9, %v6849_v8, %v6872_v16  ;;  %v2995_v17 = vsel %vm726_vm9, %v6725_v18, %v2966_v62  ;;  %v7561_v60 = vld [vmem:[#allocation15_spill] sm:$0xff] }
 0x5d0   :  { %v2996_v43 = vsel %vm726_vm9, %v6781_v41, %v6999_v39  ;;  %v2991_v19 = vsel %vm726_vm9, %v2966_v62, %v6920_v52  ;;  %v7051_v35 = vadd.f32 %v3459_v63, %v6840_v9  ;;  %v3037_v30 = vmul.f32 %v2990_v25, %v7561_v60 }
 0x5d1   :  { %v7029_v40 = vadd.f32 %v3408_v27, %v3399_v13  ;;  %v7034_v49 = vpop.permute.xlu0 %3111  ;;  %v3110_v55 = vpop.permute.xlu1 %3109  ;;  %v7059_v4 = vadd.f32 %v3468_v53, %v6865_v5  ;;  %v3045_v22 = vmul.f32 %v2995_v17, %v7532_v28  ;;  %v3452_v9 = vrot.slane %v7016_v31, 2 }
 0x5d2   :  { %v3140_v8 = vsel %vm810_vm1, %v6819_v20, %v7034_v49  ;;  %v3139_v18 = vsel %vm810_vm1, %v6737_v45, %v3110_v55  ;;  %v3135_v61 = vsel %vm810_vm1, %v3110_v55, %v6971_v38  ;;  %v3028_v20 = vmul.f32 %v2989_v33, %v7561_v60  ;;  %v7562_v33 = vld [vmem:[#allocation35_spill] sm:$0xff] }
 0x5d3   :  { %v3197_v41 = vmul.f32 %v3140_v8, %v7531_v44  ;;  %v3188_v45 = vmul.f32 %v3139_v18, %v7531_v44  ;;  %v3328_v62 = vadd.f32 %v6882_v54, %v3240_v21  ;;  %v3054_v63 = vmul.f32 %v2996_v43, %v7532_v28  ;;  %v7563_v21 = vld [vmem:[#allocation6_spill] sm:$0xff] }
 0x5d4   :  { %v3046_v13 = vmul.f32 %v2991_v19, %v7561_v60  ;;  %v3189_v5 = vmul.f32 %v3135_v61, %v7558_v36  ;;  %v3337_v54 = vadd.f32 %v6894_v23, %v3249_v12  ;;  %v3233_v28 = vmul.f32 %v6314_v48, %v3037_v30 }
 0x5d5   :  { %v2980_v27 = vpop.permute.xlu0 %2979  ;;  %v2976_v25 = vpop.permute.xlu1 %2975  ;;  %v3389_v55 = vmul.f32 %v6406_v24, %v3197_v41  ;;  %v3380_v53 = vmul.f32 %v6423_v59, %v3188_v45  ;;  %v3224_v8 = vmul.f32 %v6421_v42, %v3028_v20  ;;  %v3241_v18 = vmul.f32 %v6348_v0, %v3045_v22 }
 0x5d6   :  { %v3018_v44 = vsel %vm726_vm9, %v2980_v27, %v7562_v33  ;;  %v3250_v61 = vmul.f32 %v6408_v14, %v3054_v63  ;;  %v3242_v45 = vmul.f32 %v6348_v0, %v3046_v13  ;;  %v2986_v33 = vsel %vm726_vm9, %v6870_v11, %v2980_v27  ;;  %v7564_v63 = vld [vmem:[#allocation16_spill] sm:$0xff] }
 0x5d7   :  { %v3030_v43 = vmul.f32 %v3018_v44, %v7563_v21  ;;  %v3416_v41 = vadd.f32 %v3380_v53, %v3328_v62  ;;  %v3425_v44 = vadd.f32 %v3389_v55, %v3337_v54  ;;  %v3381_v19 = vmul.f32 %v6423_v59, %v3189_v5  ;;  %v7565_v53 = vld [vmem:[#allocation7_spill] sm:$0xff] }
 0x5d8   :  { %v3321_v22 = vadd.f32 %v6905_v51, %v3233_v28  ;;  %v2992_v11 = vsel %vm726_vm9, %v6999_v39, %v2976_v25  ;;  %v3329_v27 = vadd.f32 %v6909_v10, %v3241_v18  ;;  %v3038_v5 = vmul.f32 %v2986_v33, %v7565_v53  ;;  %v7566_v10 = vld [vmem:[#allocation24_spill] sm:$0xff]  ;;  %v7568_v33 = vld [vmem:[#allocation42_spill] sm:$0xff] }
 0x5d9   :  { %v3226_v23 = vmul.f32 %v6314_v48, %v3030_v43  ;;  %v3122_v12 = vpop.permute.xlu0 %3121  ;;  %v3124_v30 = vpop.permute.xlu1 %3123  ;;  %v3475_v17 = vadd.f32 %v3474_v47, %v3416_v41  ;;  %v7107_v43 = vadd.f32 %v6924_v26, %v3250_v61  ;;  %v7567_v41 = vld [vmem:[#allocation31_spill] sm:$0xff]  ;;  %v7569_v61 = vld [vmem:[#allocation34_spill] sm:$0xff] }
 0x5da   :  { %v3129_v20 = vsel %vm810_vm1, %v6817_v34, %v3122_v12  ;;  %v3130_v47 = vsel %vm810_vm1, %v6973_v57, %v3124_v30  ;;  %v3312_v34 = vadd.f32 %v6900_v6, %v3224_v8  ;;  %v7112_v18 = vadd.f32 %v3381_v19, %v3329_v27  ;;  %v7571_v27 = vld [vmem:[#allocation10_spill] sm:$0xff] }
 0x5db   :  { %v3314_v62 = vadd.f32 %v6863_v3, %v3226_v23  ;;  %v3172_v13 = vmul.f32 %v3129_v20, %v7564_v63  ;;  %v3476_v55 = vadd.f32 %v3475_v17, %v3425_v44  ;;  %v3181_v54 = vmul.f32 %v3130_v47, %v7564_v63  ;;  %v7570_v20 = vld [vmem:[#allocation32_spill] sm:$0xff] }
 0x5dc   :  { %v7110_v17 = vadd.f32 %v7566_v10, %v3242_v45  ;;  %v3055_v57 = vmul.f32 %v2992_v11, %v7561_v60  ;;  %v3161_v6 = vsel %vm810_vm1, %v3122_v12, %v7567_v41  ;;  %v3234_v26 = vmul.f32 %v6314_v48, %v3038_v5  ;;  %v7573_v10 = vld [vmem:[#allocation23_spill] sm:$0xff] }
 0x5dd   :  { %v3402_v51 = vadd.f32 %v7005_v1, %v3314_v62  ;;  %v3364_v3 = vmul.f32 %v6386_v50, %v3172_v13  ;;  %v2984_v39 = vpop.permute.xlu0 %2983  ;;  %v2978_v28 = vpop.permute.xlu1 %2977  ;;  %v3373_v8 = vmul.f32 %v6388_v29, %v3181_v54  ;;  %v3162_v19 = vsel %vm810_vm1, %v3124_v30, %v7569_v61  ;;  %v7572_v54 = vld [vmem:[#allocation20_spill] sm:$0xff] }
 0x5de   :  { %v3020_v23 = vsel %vm726_vm9, %v2984_v39, %v7568_v33  ;;  %v2985_v60 = vsel %vm726_vm9, %v6872_v16, %v2978_v28  ;;  %v2988_v44 = vsel %vm726_vm9, %v2976_v25, %v2984_v39  ;;  %v3017_v62 = vsel %vm726_vm9, %v2978_v28, %v7570_v20 }
 0x5df   :  { %v3400_v1 = vadd.f32 %v3364_v3, %v3312_v34  ;;  %v3048_v45 = vmul.f32 %v3020_v23, %v7563_v21  ;;  %v3409_v12 = vadd.f32 %v3373_v8, %v3321_v22  ;;  %v3029_v48 = vmul.f32 %v2985_v60, %v7565_v53  ;;  %v7574_v8 = vld [vmem:[#allocation11_spill] sm:$0xff]  ;;  %v7575_v23 = vld [vmem:[#allocation41_spill] sm:$0xff] }
 0x5e0   :  { %v3477_v13 = vrot.slane %v3476_v55, 4  ;;  %v3173_v30 = vmul.f32 %v3161_v6, %v7571_v27  ;;  %v3021_v47 = vmul.f32 %v3017_v62, %v7563_v21  ;;  %v3251_v16 = vmul.f32 %v6408_v14, %v3055_v57 }
 0x5e1   :  { %v2982_v11 = vpop.permute.xlu1 %2981  ;;  %v3244_v5 = vmul.f32 %v6408_v14, %v3048_v45  ;;  %v3128_v34 = vpop.permute.xlu0 %3127  ;;  %v3182_v22 = vmul.f32 %v3162_v19, %v7571_v27  ;;  %v3492_v25 = vadd.f32 %v3409_v12, %v3400_v1  ;;  %v3225_v3 = vmul.f32 %v6421_v42, %v3029_v48  ;;  %v7576_v1 = vld [vmem:[#allocation38_spill] sm:$0xff] }
 0x5e2   :  { %v3322_v39 = vadd.f32 %v7572_v54, %v3234_v26  ;;  %v3056_v28 = vmul.f32 %v2988_v44, %v7565_v53  ;;  %v3217_v6 = vmul.f32 %v6421_v42, %v3021_v47  ;;  %v3164_v61 = vsel %vm810_vm1, %v3128_v34, %v7575_v23  ;;  %v7577_v12 = vld [vmem:[#allocation18_spill] sm:$0xff] }
 0x5e3   :  { %v3332_v41 = vadd.f32 %v7573_v10, %v3244_v5  ;;  %v3313_v33 = vadd.f32 %v7574_v8, %v3225_v3  ;;  %v2987_v57 = vsel %vm726_vm9, %v6920_v52, %v2982_v11  ;;  %v3019_v26 = vsel %vm726_vm9, %v2982_v11, %v7576_v1  ;;  %v7579_v3 = vld [vmem:[#allocation14_spill] sm:$0xff] }
 0x5e4   :  { %v3478_v45 = vadd.f32 %v3477_v13, %v3476_v55  ;;  %v3365_v60 = vmul.f32 %v6386_v50, %v3173_v30  ;;  %v3305_v44 = vadd.f32 %v7577_v12, %v3217_v6  ;;  %v3374_v20 = vmul.f32 %v6388_v29, %v3182_v22  ;;  %v7578_v13 = vld [vmem:[#allocation40_spill] sm:$0xff] }
 0x5e5   :  { %v3126_v19 = vpop.permute.xlu1 %3125  ;;  %v3420_v42 = vadd.f32 %v7011_v56, %v3332_v41  ;;  %v3039_v62 = vmul.f32 %v3019_v26, %v7563_v21  ;;  %v3047_v48 = vmul.f32 %v2987_v57, %v7565_v53  ;;  %v3252_v11 = vmul.f32 %v6408_v14, %v3056_v28 }
 0x5e6   :  { %v3131_v52 = vsel %vm810_vm1, %v6971_v38, %v3126_v19  ;;  %v3393_v55 = vadd.f32 %v7002_v7, %v3305_v44  ;;  %v3200_v50 = vmul.f32 %v3164_v61, %v7571_v27  ;;  %v3163_v56 = vsel %vm810_vm1, %v3126_v19, %v7578_v13 }
 0x5e7   :  { %v3401_v30 = vadd.f32 %v3365_v60, %v3313_v33  ;;  %v3235_v29 = vmul.f32 %v6348_v0, %v3039_v62  ;;  %v3243_v21 = vmul.f32 %v6348_v0, %v3047_v48  ;;  %v3190_v53 = vmul.f32 %v3131_v52, %v7564_v63 }
 0x5e8   :  { %v3429_v47 = vadd.f32 %v3402_v51, %v3393_v55  ;;  %v3191_v38 = vmul.f32 %v3163_v56, %v7571_v27  ;;  %v3410_v22 = vadd.f32 %v3374_v20, %v3322_v39  ;;  %v3392_v10 = vmul.f32 %v6406_v24, %v3200_v50 }
 0x5e9   :  { %v3120_v5 = vpop.permute.xlu1 %3119  ;;  %v3323_v54 = vadd.f32 %v7579_v3, %v3235_v29  ;;  %v3382_v28 = vmul.f32 %v6423_v59, %v3190_v53  ;;  %v3331_v51 = vadd.f32 %v6994_v2, %v3243_v21  ;;  %v3340_v8 = vadd.f32 %v6987_v15, %v3252_v11 }
 0x5ea   :  { %v3132_v14 = vsel %vm810_vm1, %v3120_v5, %v3128_v34  ;;  %v3136_v7 = vsel %vm810_vm1, %v7034_v49, %v3120_v5  ;;  %v3383_v27 = vmul.f32 %v6423_v59, %v3191_v38  ;;  %v7580_v34 = vld [vmem:[#allocation19_spill] sm:$0xff]  ;;  %v3501_v33 = vadd.f32 %v3410_v22, %v3401_v30 }
 0x5eb   :  { %v3198_v0 = vmul.f32 %v3136_v7, %v7558_v36  ;;  %v3199_v41 = vmul.f32 %v3132_v14, %v7564_v63  ;;  %v3339_v6 = vadd.f32 %v7580_v34, %v3251_v16  ;;  %v3411_v37 = vadd.f32 %v7008_v58, %v3323_v54  ;;  %v7583_v54 = vld [vmem:[#allocation3_spill] sm:$0xff] }
 0x5ec   :  { %v3418_v49 = vadd.f32 %v3382_v28, %v7110_v17  ;;  %v3419_v36 = vadd.f32 %v3383_v27, %v3331_v51  ;;  %v3484_v2 = vadd.f32 %v7029_v40, %v7112_v18  ;;  %v3479_v16 = vrot.slane %v3478_v45, 2 }
 0x5ed   :  { %v3390_v39 = vmul.f32 %v6406_v24, %v3198_v0  ;;  %v3391_v23 = vmul.f32 %v6406_v24, %v3199_v41  ;;  %v3430_v59 = vadd.f32 %v3429_v47, %v3411_v37  ;;  %v3428_v57 = vadd.f32 %v3392_v10, %v3340_v8 }
 0x5ee   :  { %v3493_v61 = vadd.f32 %v3492_v25, %v3418_v49  ;;  %v3502_v58 = vadd.f32 %v3501_v33, %v3419_v36  ;;  %v3444_v17 = vadd.f32 %v3443_v32, %v6982_v46  ;;  %v3453_v24 = vadd.f32 %v3452_v9, %v7016_v31 }
 0x5ef   :  { %v3426_v63 = vadd.f32 %v3390_v39, %v7107_v43  ;;  %v3427_v1 = vadd.f32 %v3391_v23, %v3339_v6  ;;  %v3431_v15 = vadd.f32 %v3430_v59, %v3420_v42  ;;  %v7581_v40 = vrot.slane %v7051_v35, 2 }
 0x5f0   :  { %v3503_v25 = vadd.f32 %v3502_v58, %v3428_v57  ;;  %v7582_v19 = vrot.slane %v7059_v4, 2  ;;  %v3480_v20 = vadd.f32 %v3479_v16, %v3478_v45  ;;  %v3445_v42 = vrot.slane %v3444_v17, 1 }
 0x5f1   :  { %v3485_v26 = vadd.f32 %v3484_v2, %v3426_v63  ;;  %v3462_v18 = vadd.f32 %v7581_v40, %v7051_v35  ;;  %v3494_v43 = vadd.f32 %v3493_v61, %v3427_v1  ;;  %v3432_v12 = vrot.slane %v3431_v15, 4 }
 0x5f2   :  { %v3471_v60 = vadd.f32 %v7582_v19, %v7059_v4  ;;  %v3504_v46 = vrot.slane %v3503_v25, 4  ;;  %v3454_v52 = vrot.slane %v3453_v24, 1  ;;  %v3481_v13 = vrot.slane %v3480_v20, 1  ;;  %v3538_v53 = vpop.permute.xlu0 %3537 }
 0x5f3   :  { %v3486_v44 = vrot.slane %v3485_v26, 4  ;;  %v3495_v32 = vrot.slane %v3494_v43, 4  ;;  %v3433_v62 = vadd.f32 %v3432_v12, %v3431_v15  ;;  %v3463_v31 = vrot.slane %v3462_v18, 1 }
 0x5f4   :  { %v3505_v9 = vadd.f32 %v3504_v46, %v3503_v25  ;;  %v3472_v55 = vrot.slane %v3471_v60, 1  ;;  %v3446_v29 = vadd.f32 %v3445_v42, %v3444_v17  ;;  %v3455_v45 = vadd.f32 %v3454_v52, %v3453_v24 }
 0x5f5   :  { %v3487_v48 = vadd.f32 %v3486_v44, %v3485_v26  ;;  %v3496_v11 = vadd.f32 %v3495_v32, %v3494_v43  ;;  %v3434_v35 = vrot.slane %v3433_v62, 2  ;;  %v3464_v5 = vadd.f32 %v3463_v31, %v3462_v18 }
 0x5f6   :  { %v3506_v56 = vrot.slane %v3505_v9, 2  ;;  %v3473_v7 = vadd.f32 %v3472_v55, %v3471_v60  ;;  %v3482_v0 = vadd.f32 %v3481_v13, %v3480_v20  ;;  %v3543_v27 = vrot.slane %v3538_v53, %v7583_v54 }
 0x5f7   :  { %v3488_v50 = vrot.slane %v3487_v48, 2  ;;  %v3497_v30 = vrot.slane %v3496_v11, 2  ;;  %v3435_v4 = vadd.f32 %v3434_v35, %v3433_v62 }
 0x5f8   :  { %v3507_v47 = vadd.f32 %v3506_v56, %v3505_v9 }
 0x5f9   :  { %v3489_v21 = vadd.f32 %v3488_v50, %v3487_v48  ;;  %v3498_v38 = vadd.f32 %v3497_v30, %v3496_v11  ;;  %v3436_v22 = vrot.slane %v3435_v4, 1 }
 0x5fa   :  { %v3512_v14 = vpop.permute.xlu1 %3511  ;;  %v3508_v10 = vrot.slane %v3507_v47, 1 }
 0x5fb   :  { %v3490_v3 = vrot.slane %v3489_v21, 1  ;;  %v3517_v28 = vrot.slane %v3512_v14, %v7583_v54  ;;  %v3499_v51 = vrot.slane %v3498_v38, 1  ;;  %v3437_v41 = vadd.f32 %v3436_v22, %v3435_v4 }
 0x5fc   :  { %v3509_v49 = vadd.f32 %v3508_v10, %v3507_v47  ;;  %v7585_v47 = vlaneseq  ;;  %v3815_v10 = vld [vmem:[%s7356_s3 + $0x78] sm:$0xff] }
 0x5fd   :  { %v3491_v34 = vadd.f32 %v3490_v3, %v3489_v21  ;;  %v3519_v6 = vadd.f32 %v3517_v28, %v3446_v29  ;;  %v3520_v37 = vadd.f32 %v3517_v28, %v3455_v45  ;;  %v3500_v39 = vadd.f32 %v3499_v51, %v3498_v38  ;;  %v7584_v29 = vld [vmem:[#allocation5_spill] sm:$0xff] }
 0x5fe   :  { %v3521_v8 = vadd.f32 %v3517_v28, %v3464_v5  ;;  %v3522_v33 = vadd.f32 %v3517_v28, %v3473_v7  ;;  %v3518_v36 = vadd.f32 %v3517_v28, %v3437_v41  ;;  %v3523_v23 = vadd.f32 %v3517_v28, %v3482_v0  ;;  %v3813_v0 = vld [vmem:[%s7356_s3 + $0x68] sm:$0xff]  ;;  %v3812_v51 = vld [vmem:[%s7356_s3 + $0x60] sm:$0xff]  ;;  %v3814_v41 = vld [vmem:[%s7356_s3 + $0x70] sm:$0xff] }
 0x5ff   :  { %v3524_v2 = vadd.f32 %v3517_v28, %v3491_v34  ;;  %v3528_v59 = vmax.f32 %v3519_v6, 0.0  ;;  %v3525_v61 = vadd.f32 %v3517_v28, %v3500_v39  ;;  %v3526_v63 = vadd.f32 %v3517_v28, %v3509_v49  ;;  %v3555_v26 = vpop.permute.xlu1 %3554  ;;  %v3817_v6 = vld [vmem:[%s7356_s3 + $0x88] sm:$0xff]  ;;  %v3816_v49 = vld [vmem:[%s7356_s3 + $0x80] sm:$0xff] }
 0x600   :  { %v3529_v16 = vmax.f32 %v3520_v37, 0.0  ;;  %v3530_v57 = vmax.f32 %v3521_v8, 0.0  ;;  %v3527_v58 = vmax.f32 %v3518_v36, 0.0  ;;  %v3531_v1 = vmax.f32 %v3522_v33, 0.0  ;;  %v3819_v37 = vld [vmem:[%s7356_s3 + $0x98] sm:$0xff]  ;;  %v3818_v8 = vld [vmem:[%s7356_s3 + $0x90] sm:$0xff] }
 0x601   :  { %v3532_v17 = vmax.f32 %v3523_v23, 0.0  ;;  %v3533_v15 = vmax.f32 %v3524_v2, 0.0  ;;  %v3534_v24 = vmax.f32 %v3525_v61, 0.0  ;;  %v3535_v40 = vmax.f32 %v3526_v63, 0.0  ;;  %v3821_v36 = vld [vmem:[%s7356_s3 + $0xa8] sm:$0xff]  ;;  %v3823_v23 = vld [vmem:[%s7356_s3 + $0xb8] sm:$0xff] }
 0x602   :  { %v3545_v18 = vmul.f32 %v3543_v27, %v3528_v59  ;;  %v3546_v25 = vmul.f32 %v3543_v27, %v3529_v16  ;;  %v3544_v43 = vmul.f32 %v3543_v27, %v3527_v58  ;;  %v3548_v19 = vmul.f32 %v3543_v27, %v3531_v1  ;;  %v7586_v61 = vld [vmem:[#allocation4_spill] sm:$0xff]  ;;  %v3820_v58 = vld [vmem:[%s7356_s3 + $0xa0] sm:$0xff] }
 0x603   :  { %v3549_v60 = vmul.f32 %v3543_v27, %v3532_v17  ;;  %v3550_v12 = vmul.f32 %v3543_v27, %v3533_v15  ;;  %v3551_v44 = vmul.f32 %v3543_v27, %v3534_v24  ;;  %v3552_v20 = vmul.f32 %v3543_v27, %v3535_v40  ;;  %v3822_v1 = vld [vmem:[%s7356_s3 + $0xb0] sm:$0xff]  ;;  %v3825_v17 = vld [vmem:[%s7356_s3 + $0xc8] sm:$0xff]  ;;  %v3827_v15 = vld [vmem:[%s7356_s3 + $0xd8] sm:$0xff] }
 0x604   :  { %v3547_v46 = vmul.f32 %v3543_v27, %v3530_v57  ;;  %v3560_v32 = vrot.slane %v3555_v26, %v7583_v54  ;;  %vm3645_vm2 = vcmp.lt.s32.totalorder %v7585_v47, 128  ;;  %v4291_v27 = vpack.c.bf16 %v3815_v10, %v3813_v0 }
 0x605   :  { %v4293_v34 = vpack.c.bf16 %v3814_v41, %v3812_v51  ;;  %v4295_v39 = vpack.c.bf16 %v3819_v37, %v3817_v6  ;;  %v4297_v33 = vpack.c.bf16 %v3818_v8, %v3816_v49  ;;  %v4299_v59 = vpack.c.bf16 %v3823_v23, %v3821_v36 }
 0x606   :  { %v3561_v42 = vadd.f32 %v3560_v32, %v3544_v43  ;;  %v3562_v62 = vadd.f32 %v3560_v32, %v3545_v18  ;;  %v3563_v48 = vadd.f32 %v3560_v32, %v3546_v25  ;;  %v3564_v52 = vadd.f32 %v3560_v32, %v3547_v46  ;;  %4292 = vmatprep.subr.bf16.mxu0 %v4291_v27  ;;  %v3824_v25 = vld [vmem:[%s7356_s3 + $0xc0] sm:$0xff]  ;;  %v3826_v43 = vld [vmem:[%s7356_s3 + $0xd0] sm:$0xff] }
 0x607   :  { %v3565_v31 = vadd.f32 %v3560_v32, %v3548_v19  ;;  %v3566_v9 = vadd.f32 %v3560_v32, %v3549_v60  ;;  %v3567_v11 = vadd.f32 %v3560_v32, %v3550_v12  ;;  %v3568_v55 = vadd.f32 %v3560_v32, %v3551_v44  ;;  %4294 = vmatpush1.bf16.msra.mxu0 %v4293_v34  ;;  %v3829_v60 = vld [vmem:[%s7356_s3 + $0xe8] sm:$0xff]  ;;  %v3831_v12 = vld [vmem:[%s7356_s3 + $0xf8] sm:$0xff] }
 0x608   :  { %v3569_v35 = vadd.f32 %v3560_v32, %v3552_v20  ;;  %v3579_v50 = vcombine.low %v3561_v42, %v3562_v62  ;;  %v3580_v13 = vcombine.low %v3563_v48, %v3564_v52  ;;  %4296 = vmatprep.subr.bf16.mxu0 %v4295_v39  ;;  %v4301_v40 = vpack.c.bf16 %v3822_v1, %v3820_v58  ;;  %v3828_v42 = vld [vmem:[%s7356_s3 + $0xe0] sm:$0xff]  ;;  %v3830_v62 = vld [vmem:[%s7356_s3 + $0xf0] sm:$0xff]  ;;  %v3833_v52 = vld [vmem:[%s7356_s3 + $0x108] sm:$0xff] }
 0x609   :  { %v3581_v56 = vcombine.low %v3565_v31, %v3566_v9  ;;  %v3582_v30 = vcombine.low %v3567_v11, %v3568_v55  ;;  %v4303_v18 = vpack.c.bf16 %v3827_v15, %v3825_v17  ;;  %v4305_v44 = vpack.c.bf16 %v3826_v43, %v3824_v25  ;;  %v3835_v31 = vld [vmem:[%s7356_s3 + $0x118] sm:$0xff] }
 0x60a   :  { %v3589_v4 = vrot.slane %v3579_v50, %v7584_v29  ;;  %v3596_v21 = vrot.slane %v3580_v13, %v7584_v29  ;;  %v3634_v53 = vrot.slane %v3569_v35, %v7584_v29  ;;  %v4307_v32 = vpack.c.bf16 %v3831_v12, %v3829_v60  ;;  %v3832_v50 = vld [vmem:[%s7356_s3 + $0x100] sm:$0xff]  ;;  %v3834_v13 = vld [vmem:[%s7356_s3 + $0x110] sm:$0xff] }
 0x60b   :  { %v3603_v45 = vrot.slane %v3581_v56, %v7584_v29  ;;  %v3610_v5 = vrot.slane %v3582_v30, %v7584_v29  ;;  %4298 = vmatpush1.bf16.msra.mxu0 %v4297_v33  ;;  %v4309_v9 = vpack.c.bf16 %v3830_v62, %v3828_v42  ;;  %v4311_v35 = vpack.c.bf16 %v3835_v31, %v3833_v52  ;;  %v4034_v42 = vld [vmem:[%s7350_s4 + $0x3] ss:$4 sm:$0x3] }
 0x60c   :  { %v3611_v38 = vcombine.low %v3589_v4, %v3596_v21  ;;  %v3641_v14 = vrot.slane %v3634_v53, %v7584_v29  ;;  %4300 = vmatprep.subr.bf16.mxu0 %v4299_v59  ;;  %v4313_v30 = vpack.c.bf16 %v3834_v13, %v3832_v50 }
 0x60d   :  { %v3612_v7 = vcombine.low %v3603_v45, %v3610_v5 }
 0x60e   :  { %3647 = vst.msk [vmem:[#allocation2 + $0x8] sm:$0x1] %vm3645_vm2, %v3641_v14  ;;  %v3619_v22 = vrot.slane %v3611_v38, %v7584_v29 }
 0x60f   :  { %v3626_v3 = vrot.slane %v3612_v7, %v7584_v29  ;;  %4302 = vmatpush1.bf16.msra.mxu0 %v4301_v40 }
 0x610   :  { %4304 = vmatprep.subr.bf16.mxu0 %v4303_v18 }
 0x611   :  { %v3627_v28 = vcombine.low %v3619_v22, %v3626_v3 }
 0x613   :  { %3644 = vst [vmem:[#allocation2] sm:$0xff] %v3627_v28  ;;  %4306 = vmatpush1.bf16.msra.mxu0 %v4305_v44 }
 0x614   :  { %4308 = vmatprep.subr.bf16.mxu0 %v4307_v32 }
 0x617   :  { %4310 = vmatpush1.bf16.msra.mxu0 %v4309_v9  ;;  %v3935_v9 = vrot.slane %v4034_v42, %v7586_v61 }
 0x618   :  { %4312 = vmatprep.subr.bf16.mxu0 %v4311_v35 }
 0x61a   :  { %v3649_v2 = vld [vmem:[#allocation2 + $0x1] sm:$0x3]  ;;  %v3651_v19 = vld [vmem:[#allocation2 + $0x3] sm:$0x3]  ;;  %v3653_v56 = vld [vmem:[#allocation2 + $0x5] sm:$0x3] }
 0x61b   :  { %v3675_v63 = vrot.slane %v3649_v2, %v7586_v61  ;;  %v3671_v16 = vrot.slane %v3649_v2, %v7583_v54  ;;  %v3650_v57 = vld [vmem:[#allocation2 + $0x2] sm:$0x3]  ;;  %v3707_v20 = vrot.slane %v3651_v19, %v7586_v61  ;;  %v3703_v46 = vrot.slane %v3651_v19, %v7583_v54  ;;  %v3652_v48 = vld [vmem:[#allocation2 + $0x4] sm:$0x3]  ;;  %v3654_v21 = vld [vmem:[#allocation2 + $0x6] sm:$0x3]  ;;  %4314 = vmatpush1.bf16.msra.mxu0 %v4313_v30 }
 0x61c   :  { %v3691_v26 = vrot.slane %v3650_v57, %v7586_v61  ;;  %v3687_v24 = vrot.slane %v3650_v57, %v7583_v54  ;;  %v3723_v11 = vrot.slane %v3652_v48, %v7586_v61  ;;  %v3719_v55 = vrot.slane %v3652_v48, %v7583_v54  ;;  %v3655_v5 = vld [vmem:[#allocation2 + $0x7] sm:$0x3]  ;;  %v3648_v27 = vld [vmem:[#allocation2] sm:$0x3] }
 0x61d   :  { %3678 = vrot.lane.b32.xlu0 %v3675_v63, %s4457_s15  ;;  %3676 = vrot.lane.b32.xlu1 %v3671_v16, %s4457_s15  ;;  %v3739_v29 = vrot.slane %v3653_v56, %v7586_v61  ;;  %v3735_v4 = vrot.slane %v3653_v56, %v7583_v54  ;;  %v3755_v53 = vrot.slane %v3654_v21, %v7586_v61 }
 0x61e   :  { %v3751_v45 = vrot.slane %v3654_v21, %v7583_v54  ;;  %v3771_v47 = vrot.slane %v3655_v5, %v7586_v61  ;;  %v3767_v38 = vrot.slane %v3655_v5, %v7583_v54  ;;  %v3664_v6 = vrot.slane %v3648_v27, %v7586_v61 }
 0x61f   :  { %v3660_v49 = vrot.slane %v3648_v27, %v7583_v54 }
 0x621   :  { %3694 = vrot.lane.b32.xlu0 %v3691_v26, %s4455_s30  ;;  %3692 = vrot.lane.b32.xlu1 %v3687_v24, %s4455_s30 }
 0x625   :  { %3710 = vrot.lane.b32.xlu0 %v3707_v20, %s4456_s0  ;;  %3708 = vrot.lane.b32.xlu1 %v3703_v46, %s4456_s0  ;;  %v4032_v20 = vld [vmem:[%s7350_s4 + $0x2] ss:$4 sm:$0x3]  ;;  %s4464_s4 = smov 123  }
 0x626   :  { %v3842_v46 = vrot.slane %v4032_v20, %v7583_v54  ;;  %v3846_v32 = vrot.slane %v4032_v20, %v7586_v61 }
 0x629   :  { %3726 = vrot.lane.b32.xlu0 %v3723_v11, %s4451_s2  ;;  %3724 = vrot.lane.b32.xlu1 %v3719_v55, %s4451_s2  ;;  %v3931_v55 = vrot.slane %v4034_v42, %v7583_v54 }
 0x62d   :  { %3742 = vrot.lane.b32.xlu0 %v3739_v29, %s4453_s28  ;;  %3740 = vrot.lane.b32.xlu1 %v3735_v4, %s4453_s28  ;;  %v4446_v29 = vld [vmem:[%s7351_s9] ss:$0 sm:$0xff] }
 0x631   :  { %3758 = vrot.lane.b32.xlu0 %v3755_v53, %s4454_s29  ;;  %3756 = vrot.lane.b32.xlu1 %v3751_v45, %s4454_s29 }
 0x635   :  { %3774 = vrot.lane.b32.xlu0 %v3771_v47, %s4452_s27  ;;  %3772 = vrot.lane.b32.xlu1 %v3767_v38, %s4452_s27 }
 0x68f   :  { %v3679_v14 = vpop.permute.xlu0 %3678  ;;  %v3677_v7 = vpop.permute.xlu1 %3676 }
 0x690   :  { %v3680_v37 = vsel %vm621_vm15, %v3677_v7, %v3679_v14  ;;  %v3781_v8 = vsel %vm3779_vm3, %v3664_v6, %v3679_v14 }
 0x691   :  { %v3780_v36 = vsel %vm3779_vm3, %v3660_v49, %v3680_v37 }
 0x693   :  { %v3695_v22 = vpop.permute.xlu0 %3694  ;;  %v3693_v3 = vpop.permute.xlu1 %3692 }
 0x694   :  { %v3696_v39 = vsel %vm610_vm7, %v3693_v3, %v3695_v22  ;;  %v3784_v23 = vsel %vm3782_vm4, %v3781_v8, %v3695_v22  ;;  %vm7587_vm7 = vcmask 261120  }
 0x695   :  { %v3783_v16 = vsel %vm3782_vm4, %v3780_v36, %v3696_v39 }
 0x697   :  { %v3711_v28 = vpop.permute.xlu0 %3710  ;;  %v3709_v0 = vpop.permute.xlu1 %3708 }
 0x698   :  { %v3712_v33 = vsel %vm599_vm6, %v3709_v0, %v3711_v28  ;;  %v3787_v57 = vsel %vm3785_vm5, %v3784_v23, %v3711_v28 }
 0x699   :  { %v3786_v1 = vsel %vm3785_vm5, %v3783_v16, %v3712_v33 }
 0x69b   :  { %v3727_v10 = vpop.permute.xlu0 %3726  ;;  %v3725_v51 = vpop.permute.xlu1 %3724 }
 0x69c   :  { %v3728_v2 = vsel %vm581_vm14, %v3725_v51, %v3727_v10  ;;  %v3790_v17 = vsel %vm3788_vm8, %v3787_v57, %v3727_v10 }
 0x69d   :  { %v3789_v26 = vsel %vm3788_vm8, %v3786_v1, %v3728_v2 }
 0x69f   :  { %v3743_v41 = vpop.permute.xlu0 %3742  ;;  %v3741_v34 = vpop.permute.xlu1 %3740 }
 0x6a0   :  { %v3744_v58 = vsel %vm556_vm12, %v3741_v34, %v3743_v41  ;;  %v3793_v24 = vsel %vm3791_vm10, %v3790_v17, %v3743_v41  ;;  %vm3960_vm12 = vcmask 7168  }
 0x6a1   :  { %v3792_v40 = vsel %vm3791_vm10, %v3789_v26, %v3744_v58 }
 0x6a3   :  { %v3759_v59 = vpop.permute.xlu0 %3758  ;;  %v3757_v63 = vpop.permute.xlu1 %3756 }
 0x6a4   :  { %v3760_v15 = vsel %vm7587_vm7, %v3757_v63, %v3759_v59  ;;  %v3796_v18 = vsel %vm3794_vm11, %v3793_v24, %v3759_v59 }
 0x6a5   :  { %v3795_v19 = vsel %vm3794_vm11, %v3792_v40, %v3760_v15 }
 0x6a7   :  { %v3775_v25 = vpop.permute.xlu0 %3774  ;;  %v3773_v43 = vpop.permute.xlu1 %3772 }
 0x6a8   :  { %v3799_v60 = vsel %vm3797_vm13, %v3796_v18, %v3775_v25  ;;  %v3776_v12 = vsel %vm66_vm0, %v3773_v43, %v3775_v25 }
 0x6a9   :  { %v3798_v44 = vsel %vm3797_vm13, %v3795_v19, %v3776_v12  ;;  %4033 = vmatprep.mubr.msk.f32.mxu0 %vm66_vm0, %v3799_v60 }
 0x6aa   :  { %3917 = vmatmul.mubr.f32.vlgmr.msra.gmra.mrb[20].mxu0 %v3798_v44 }
 0x77d   :  { %v3918_v62 = vpop.f32.mrb[20].mxu0 }
 0x77e   :  { %v3919_v48 = vadd.f32 %v3918_v62, %v3842_v46  ;;  %v3920_v52 = vpop.f32.mrb[21].mxu0 }
 0x77f   :  { %v3921_v31 = vadd.f32 %v3920_v52, %v3846_v32 }
 0x780   :  { %v3923_v11 = vmax.f32 %v3919_v48, 0.0 }
 0x781   :  { %v3924_v35 = vmax.f32 %v3921_v31, 0.0 }
 0x782   :  { %v3938_v13 = vmul.f32 %v3931_v55, %v3923_v11 }
 0x783   :  { %v3939_v50 = vmul.f32 %v3935_v9, %v3924_v35 }
 0x785   :  { %v3940_v56 = vsel %vm66_vm0, %v3939_v50, 0.0 }
 0x786   :  { %v3941_v30 = vadd.f32 %v3940_v56, %v3938_v13 }
 0x788   :  { %3942 = vadd.xlane.f32.xlu1 %v3941_v30 }
 0x815   :  { %v3943_v4 = vpop.xlane.xlu1 %3942 }
 0x816   :  { %v3949_v21 = vadd.f32 %v4446_v29, %v3943_v4 }
 0x818   :  { %v3950_v53 = vsub.f32 0.0, %v3949_v21 }
 0x81a   :  { %v3951_v45 = vmul.f32 1.442695, %v3950_v53 }
 0x81c   :  { %4440 = vpow2.f32 %v3951_v45 }
 0x826   :  { %v4441_v61 = vpop.eup %4440 }
 0x827   :  { %v3953_v5 = vadd.f32 1.0, %v4441_v61 }
 0x829   :  { %4442 = vrcp.f32 %v3953_v5 }
 0x833   :  { %v4443_v54 = vpop.eup %4442 }
 0x834   :  { %3957 = vrot.lane.b32.xlu0 %v4443_v54, %s4464_s4 }
 0x8a6   :  { %v3958_v47 = vpop.permute.xlu0 %3957 }
 0x8a7   :  { %3961 = vst.msk [vmem:[%s7357_s10] sm:$0xff] %vm3960_vm12, %v3958_v47 }

</bundles_post_ra>
